<compile_context>
chip_gen: v7x
topology: tpu7x:2x2x1
jax: 0.10.0
libtpu: 0.0.40
codegen_flags: <defaults>
</compile_context>

<pallas_src>
import jax
import jax.numpy as jnp
from jax import lax
from jax.experimental import pallas as pl
from jax.experimental.pallas import tpu as pltpu


# ----------------------------------------------------------------------------
# Fused: decode_task_layer + conditioned token embeddings + vocab head +
# online-softmax cross-entropy.  Grid = (num_row_tiles, num_vocab_tiles).
# ----------------------------------------------------------------------------
def fused_token_loss(quant, target, params, *, row_tile=128, tv=512):
    """Mean cross-entropy over all B*NT target tokens (fused Pallas kernel)."""
    B, T, C = quant.shape
    NT = target.shape[1]
    D = params["w2"].shape[1]
    V = params["head_w"].shape[1]
    assert row_tile % 128 == 0 and tv % 128 == 0

    # ---- Row (token) tiling: flatten B*NT rows, pad to a multiple of row_tile.
    N = B * NT
    num_r = pl.cdiv(N, row_tile)
    n_pad = num_r * row_tile
    tgt_flat = target.reshape(-1).astype(jnp.int32)                       # (N,)
    img_flat = jnp.repeat(jnp.arange(B, dtype=jnp.int32), NT)             # (N,)
    tgt_row = jnp.pad(tgt_flat, (0, n_pad - N),
                      constant_values=-1).reshape(1, n_pad)
    img_row = jnp.pad(img_flat, (0, n_pad - N)).reshape(1, n_pad)

    # ---- Embedding gather done once on the XLA side: O(N*D), bf16, streamed
    # per row tile as a lane-dense (D, R) slab (replaces the O(N*V*D) one-hot
    # MXU gather + VMEM-resident (V, D) table of the previous version).
    emb = jnp.take(params["tok_emb"].astype(jnp.bfloat16), tgt_flat, axis=0)
    emb_t = jnp.pad(emb, ((0, n_pad - N), (0, 0))).T                      # (D, n_pad)

    # ---- Vocab tiling (tail tile padded; padded columns get a -1e30 bias so
    # exp(..) == 0 and they never win the running max / match a target).
    nk = pl.cdiv(V, tv)
    v_pad = nk * tv
    hw_t = jnp.pad(params["head_w"].T.astype(jnp.bfloat16),
                   ((0, v_pad - V), (0, 0)))                              # (v_pad, D)
    hb_c = jnp.pad(params["head_b"].reshape(V, 1).astype(jnp.float32),
                   ((0, v_pad - V), (0, 0)), constant_values=-1e30)       # (v_pad, 1)

    # ---- decode_task_layer operands, pre-transposed so every in-kernel
    # reduction and the loss store are lane-dense (no in-kernel relayouts).
    quant_t = quant.reshape(B * T, C).T.astype(jnp.float32)               # (C, B*T)
    w1_t = params["w1"].T.astype(jnp.float32)                             # (C, C)
    b1_c = params["b1"].reshape(C, 1).astype(jnp.float32)
    w2_t = params["w2"].T.astype(jnp.float32)                             # (D, C)
    b2_c = params["b2"].reshape(D, 1).astype(jnp.float32)

    def kernel(quant_ref, w1_ref, b1_ref, w2_ref, b2_ref,
               embt_ref, tgt_ref, img_ref, hwt_ref, hb_ref,
               loss_ref, ht_ref, m_ref, l_ref, tl_ref):
        k = pl.program_id(1)
        nk_ = pl.num_programs(1)
        tgt = tgt_ref[...]                                                # (1, R)

        @pl.when(k == 0)
        def _init():
            # decode_task_layer: Linear(C,C) -> Tanh -> Linear(C,D), in
            # transposed form so the T query tokens of every image sit on lanes.
            h1 = jnp.tanh(jnp.dot(w1_ref[...], quant_ref[...],
                                  preferred_element_type=jnp.float32) + b1_ref[...])
            up = jnp.dot(w2_ref[...], h1,
                         preferred_element_type=jnp.float32) + b2_ref[...]  # (D, B*T)

            # Pool the T query outputs per image and scatter to this tile's
            # rows (statically unrolled over the small batch -> pure VPU work,
            # no dynamic gather / tiny-K matmul needed).
            img = img_ref[...]                                            # (1, R)
            cond = jnp.zeros(ht_ref.shape, jnp.float32)                   # (D, R)
            for b in range(B):
                cond_b = jnp.mean(up[:, b * T:(b + 1) * T], axis=1, keepdims=True)
                cond = cond + jnp.where(img == b, 1.0, 0.0) * cond_b
            ht_ref[...] = (embt_ref[...].astype(jnp.float32)
                           + cond).astype(jnp.bfloat16)

            m_ref[...] = jnp.full_like(m_ref, -jnp.inf)
            l_ref[...] = jnp.zeros_like(l_ref)
            tl_ref[...] = jnp.zeros_like(tl_ref)

        # Vocab-tile head matmul: logits^T is (tv, R) and never leaves VMEM.
        logits = jnp.dot(hwt_ref[...], ht_ref[...],
                         preferred_element_type=jnp.float32) + hb_ref[...]  # (tv, R)

        # True-class logit: each target falls in exactly one vocab tile
        # (VALU/XLU filler, hidden under the EUP-bound exp below).
        vocab_ids = k * tv + lax.broadcasted_iota(jnp.int32, logits.shape, 0)
        tl_ref[...] += jnp.sum(jnp.where(vocab_ids == tgt, logits, 0.0),
                               axis=0, keepdims=True)

        # Online logsumexp across vocab tiles; all state f32, lane-dense (1, R).
        m_prev = m_ref[...]
        m_new = jnp.maximum(m_prev, jnp.max(logits, axis=0, keepdims=True))
        alpha = jnp.exp(m_prev - m_new)
        l_ref[...] = alpha * l_ref[...] + jnp.sum(jnp.exp(logits - m_new),
                                                  axis=0, keepdims=True)
        m_ref[...] = m_new

        @pl.when(k == nk_ - 1)
        def _finalize():
            lse = m_ref[...] + jnp.log(l_ref[...])
            # Padded rows (tgt == -1) are masked to exactly 0; wrapper divides
            # by the true token count.
            loss_ref[...] = jnp.where(tgt >= 0, lse - tl_ref[...], 0.0)

    # Rough VMEM footprint (streamed tiles double-buffered + resident constants
    # + scratch) -> scoped VMEM limit.  NOTE(v7x): keep under ~48-56 MiB when
    # growing row_tile / tv (64 MiB physical).
    streamed = (D * row_tile * 2 + 2 * row_tile * 4
                + tv * D * 2 + tv * 4 + row_tile * 4)
    resident = (C * B * T + C * C + C + D * C + D) * 4
    scratch = D * row_tile * 2 + 3 * row_tile * 4
    vmem_limit = int(min(100 * 2 ** 20,
                         max(32 * 2 ** 20, 4 * (2 * streamed + resident + scratch))))

    losses = pl.pallas_call(
        kernel,
        out_shape=jax.ShapeDtypeStruct((1, n_pad), jnp.float32),
        grid_spec=pltpu.PrefetchScalarGridSpec(
            num_scalar_prefetch=0,
            grid=(num_r, nk),                    # rows parallel, vocab reduction last
            in_specs=[
                pl.BlockSpec((C, B * T), lambda r, k: (0, 0)),     # quant^T (resident)
                pl.BlockSpec((C, C), lambda r, k: (0, 0)),         # W1^T
                pl.BlockSpec((C, 1), lambda r, k: (0, 0)),         # b1
                pl.BlockSpec((D, C), lambda r, k: (0, 0)),         # W2^T
                pl.BlockSpec((D, 1), lambda r, k: (0, 0)),         # b2
                pl.BlockSpec((D, row_tile), lambda r, k: (0, r)),  # emb^T (row tile, bf16)
                pl.BlockSpec((1, row_tile), lambda r, k: (0, r)),  # targets (lane-dense)
                pl.BlockSpec((1, row_tile), lambda r, k: (0, r)),  # image ids
                pl.BlockSpec((tv, D), lambda r, k: (k, 0)),        # head_w^T (vocab tile)
                pl.BlockSpec((tv, 1), lambda r, k: (k, 0)),        # head_b (vocab tile)
            ],
            out_specs=pl.BlockSpec((1, row_tile), lambda r, k: (0, r)),
            scratch_shapes=[
                pltpu.VMEM((D, row_tile), jnp.bfloat16),   # conditioned embeddings h^T
                pltpu.VMEM((1, row_tile), jnp.float32),    # running max m
                pltpu.VMEM((1, row_tile), jnp.float32),    # running sum-exp l
                pltpu.VMEM((1, row_tile), jnp.float32),    # true-class logit
            ]),
        compiler_params=pltpu.CompilerParams(
            dimension_semantics=("parallel", "arbitrary"),
            vmem_limit_bytes=vmem_limit),
    )(quant_t, w1_t, b1_c, w2_t, b2_c, emb_t, tgt_row, img_row, hw_t, hb_c)

    # Padded rows contribute exactly 0; divide by the true token count
    # (matches F.cross_entropy(..., reduction='mean')).
    return jnp.sum(losses) / N


# ----------------------------------------------------------------------------
# VisualTokenizer.forward
# ----------------------------------------------------------------------------
def _standin_vqgan_codes(params, vqgan_image):
    # TODO(synk): the real self.taming_model is a Net2NetTransformer (VQGAN
    # encoder + GPT) from an external OmegaConf config/checkpoint; this is a
    # minimal deterministic stand-in (4x4 patch pooling + nearest-codebook
    # assignment) preserving the (logits, target) -> cross_entropy interface.
    B, ch, H, W = vqgan_image.shape
    P = 4
    patches = vqgan_image.reshape(B, ch, H // P, P, W // P, P).mean(axis=(3, 5))
    patches = patches.transpose(0, 2, 3, 1).reshape(B, (H // P) * (W // P), ch)
    d = jnp.sum((patches[:, :, None, :] - params["img_codebook"][None, None]) ** 2, -1)
    return jnp.argmin(d, axis=-1).astype(jnp.int32)                       # (B, NT)


def visual_tokenizer_forward(params, vqgan_image, quant):
    target = _standin_vqgan_codes(params, vqgan_image)
    return fused_token_loss(quant, target, params)


def reference_forward(params, vqgan_image, quant):
    """Pure-JAX f32 reference with identical stand-in semantics."""
    target = _standin_vqgan_codes(params, vqgan_image)
    up = jnp.tanh(quant @ params["w1"] + params["b1"]) @ params["w2"] + params["b2"]
    cond = up.mean(axis=1, keepdims=True)                                 # (B, 1, D)
    h = params["tok_emb"][target] + cond                                  # (B, NT, D)
    logits = h @ params["head_w"] + params["head_b"]                      # (B, NT, V)
    lse = jax.scipy.special.logsumexp(logits, axis=-1)
    tl = jnp.take_along_axis(logits, target[..., None], axis=-1)[..., 0]
    return jnp.mean(lse - tl)


def init_params(key, C=32, D=128, V=1024):
    ks = jax.random.split(key, 6)
    return {
        "w1": 0.02 * jax.random.normal(ks[0], (C, C), jnp.float32),
        "b1": jnp.zeros((C,), jnp.float32),
        "w2": 0.02 * jax.random.normal(ks[1], (C, D), jnp.float32),
        "b2": jnp.zeros((D,), jnp.float32),
        "head_w": (1.0 / D ** 0.5) * jax.random.normal(ks[2], (D, V), jnp.float32),
        "head_b": jnp.zeros((V,), jnp.float32),
        "tok_emb": jax.random.normal(ks[3], (V, D), jnp.float32),
        "img_codebook": jax.random.normal(ks[4], (V, 3), jnp.float32),
    }


if __name__ == "__main__":
    # batch=3 (odd -> exercises row padding + masking), num_query_token=32,
    # codebook_embed_dim=32, stand-in taming n_embd=128, stand-in vocab=1024.
    # Stand-in VQGAN: 32x32 image, 4x4 patches -> 64 targets per image, so
    # B*NT = 192 rows -> two 128-row tiles (one half-padded) and two 512-wide
    # vocab tiles -> full tiled online-logsumexp + masking paths exercised.
    B, T, C, D, V = 3, 32, 32, 128, 1024
    key = jax.random.PRNGKey(0)
    k_img, k_quant, k_params = jax.random.split(key, 3)

    vqgan_image = jax.random.normal(k_img, (B, 3, 32, 32), jnp.float32)   # NCHW
    quant = jax.random.normal(k_quant, (B, T, C), jnp.float32)
    params = init_params(k_params, C=C, D=D, V=V)

    loss = jax.jit(visual_tokenizer_forward)(params, vqgan_image, quant)
    jax.block_until_ready(loss)
    ref = reference_forward(params, vqgan_image, quant)

    assert loss.shape == () and bool(jnp.isfinite(loss))
    assert abs(float(loss) - float(ref)) < 5e-2, (float(loss), float(ref))
    print("KERNEL_OK")
</pallas_src>

<mosaic_0001>
module attributes {stable_mosaic.version = 11 : i64} {
  func.func @kernel(%arg0: i32, %arg1: i32, %arg2: memref<32x96xf32, #tpu.memory_space<vmem>>, %arg3: memref<32x32xf32, #tpu.memory_space<vmem>>, %arg4: memref<32x1xf32, #tpu.memory_space<vmem>>, %arg5: memref<128x32xf32, #tpu.memory_space<vmem>>, %arg6: memref<128x1xf32, #tpu.memory_space<vmem>>, %arg7: memref<128x128xbf16, #tpu.memory_space<vmem>>, %arg8: memref<1x128xi32, #tpu.memory_space<vmem>>, %arg9: memref<1x128xi32, #tpu.memory_space<vmem>>, %arg10: memref<512x128xbf16, #tpu.memory_space<vmem>>, %arg11: memref<512x1xf32, #tpu.memory_space<vmem>>, %arg12: memref<1x128xf32, #tpu.memory_space<vmem>>, %arg13: memref<128x128xbf16, #tpu.memory_space<vmem>>, %arg14: memref<1x128xf32, #tpu.memory_space<vmem>>, %arg15: memref<1x128xf32, #tpu.memory_space<vmem>>, %arg16: memref<1x128xf32, #tpu.memory_space<vmem>>) attributes {dimension_semantics = [#tpu.dimension_semantics<parallel>, #tpu.dimension_semantics<arbitrary>], iteration_bounds = array<i64: 2, 2>, scalar_prefetch = 0 : i64, scratch_operands = 4 : i64, tpu.core_type = #tpu.core_type<tc>, window_params = [{pipeline_mode = #tpu.pipeline_mode<synchronous>, transform_indices = @transform_0, window_bounds = array<i64: 32, 96>}, {pipeline_mode = #tpu.pipeline_mode<synchronous>, transform_indices = @transform_1, window_bounds = array<i64: 32, 32>}, {pipeline_mode = #tpu.pipeline_mode<synchronous>, transform_indices = @transform_2, window_bounds = array<i64: 32, 1>}, {pipeline_mode = #tpu.pipeline_mode<synchronous>, transform_indices = @transform_3, window_bounds = array<i64: 128, 32>}, {pipeline_mode = #tpu.pipeline_mode<synchronous>, transform_indices = @transform_4, window_bounds = array<i64: 128, 1>}, {transform_indices = @transform_5, window_bounds = array<i64: 128, 128>}, {transform_indices = @transform_6, window_bounds = array<i64: 1, 128>}, {transform_indices = @transform_7, window_bounds = array<i64: 1, 128>}, {transform_indices = @transform_8, window_bounds = array<i64: 512, 128>}, {transform_indices = @transform_9, window_bounds = array<i64: 512, 1>}, {transform_indices = @transform_10, window_bounds = array<i64: 1, 128>}]} {
    %c0 = arith.constant 0 : index
    %c0_0 = arith.constant 0 : index
    %0 = vector.load %arg8[%c0, %c0_0] : memref<1x128xi32, #tpu.memory_space<vmem>>, vector<1x128xi32>
    %c0_i32 = arith.constant 0 : i32
    %1 = arith.cmpi eq, %arg1, %c0_i32 : i32
    %2 = arith.extui %1 : i1 to i32
    %c0_i32_1 = arith.constant 0 : i32
    %3 = arith.cmpi ne, %2, %c0_i32_1 : i32
    scf.if %3 {
      %c0_25 = arith.constant 0 : index
      %c0_26 = arith.constant 0 : index
      %42 = vector.load %arg3[%c0_25, %c0_26] : memref<32x32xf32, #tpu.memory_space<vmem>>, vector<32x32xf32>
      %c0_27 = arith.constant 0 : index
      %c0_28 = arith.constant 0 : index
      %43 = vector.load %arg2[%c0_27, %c0_28] : memref<32x96xf32, #tpu.memory_space<vmem>>, vector<32x96xf32>
      %cst_29 = arith.constant dense<0.000000e+00> : vector<32x96xf32>
      %44 = tpu.matmul %42, %43, %cst_29 {dimension_numbers = #tpu.dot_dimension_numbers<[1], [0], [0], [1], [0, 0, 1, 1], [], []>} : vector<32x32xf32>, vector<32x96xf32>, vector<32x96xf32> -> vector<32x96xf32>
      %c0_30 = arith.constant 0 : index
      %c0_31 = arith.constant 0 : index
      %45 = vector.load %arg4[%c0_30, %c0_31] : memref<32x1xf32, #tpu.memory_space<vmem>>, vector<32x1xf32>
      %46 = vector.broadcast %45 : vector<32x1xf32> to vector<32x96xf32>
      %47 = arith.addf %44, %46 : vector<32x96xf32>
      %48 = math.tanh %47 : vector<32x96xf32>
      %c0_32 = arith.constant 0 : index
      %c0_33 = arith.constant 0 : index
      %49 = vector.load %arg5[%c0_32, %c0_33] : memref<128x32xf32, #tpu.memory_space<vmem>>, vector<128x32xf32>
      %cst_34 = arith.constant dense<0.000000e+00> : vector<128x96xf32>
      %50 = tpu.matmul %49, %48, %cst_34 {dimension_numbers = #tpu.dot_dimension_numbers<[1], [0], [0], [1], [0, 0, 1, 1], [], []>} : vector<128x32xf32>, vector<32x96xf32>, vector<128x96xf32> -> vector<128x96xf32>
      %c0_35 = arith.constant 0 : index
      %c0_36 = arith.constant 0 : index
      %51 = vector.load %arg6[%c0_35, %c0_36] : memref<128x1xf32, #tpu.memory_space<vmem>>, vector<128x1xf32>
      %52 = vector.broadcast %51 : vector<128x1xf32> to vector<128x96xf32>
      %53 = arith.addf %50, %52 : vector<128x96xf32>
      %c0_37 = arith.constant 0 : index
      %c0_38 = arith.constant 0 : index
      %54 = vector.load %arg9[%c0_37, %c0_38] : memref<1x128xi32, #tpu.memory_space<vmem>>, vector<1x128xi32>
      %cst_39 = arith.constant 0.000000e+00 : f32
      %55 = vector.broadcast %cst_39 : f32 to vector<128x128xf32>
      %56 = vector.extract_strided_slice %53 {offsets = [0, 0], sizes = [128, 32], strides = [1, 1]} : vector<128x96xf32> to vector<128x32xf32>
      %cst_40 = arith.constant dense<0.000000e+00> : vector<128xf32>
      %57 = vector.multi_reduction <add>, %56, %cst_40 [1] : vector<128x32xf32> to vector<128xf32>
      %58 = vector.shape_cast %57 : vector<128xf32> to vector<128x1xf32>
      %cst_41 = arith.constant 3.200000e+01 : f32
      %59 = vector.broadcast %cst_41 : f32 to vector<128x1xf32>
      %60 = arith.divf %58, %59 : vector<128x1xf32>
      %c0_i32_42 = arith.constant 0 : i32
      %61 = vector.broadcast %c0_i32_42 : i32 to vector<1x128xi32>
      %62 = arith.cmpi eq, %54, %61 : vector<1x128xi32>
      %cst_43 = arith.constant 1.000000e+00 : f32
      %cst_44 = arith.constant 0.000000e+00 : f32
      %63 = vector.broadcast %cst_43 : f32 to vector<1x128xf32>
      %64 = vector.broadcast %cst_44 : f32 to vector<1x128xf32>
      %65 = arith.select %62, %63, %64 : vector<1x128xi1>, vector<1x128xf32>
      %66 = vector.broadcast %65 : vector<1x128xf32> to vector<128x128xf32>
      %67 = vector.broadcast %60 : vector<128x1xf32> to vector<128x128xf32>
      %68 = arith.mulf %66, %67 : vector<128x128xf32>
      %69 = arith.addf %55, %68 : vector<128x128xf32>
      %70 = vector.extract_strided_slice %53 {offsets = [0, 32], sizes = [128, 32], strides = [1, 1]} : vector<128x96xf32> to vector<128x32xf32>
      %cst_45 = arith.constant dense<0.000000e+00> : vector<128xf32>
      %71 = vector.multi_reduction <add>, %70, %cst_45 [1] : vector<128x32xf32> to vector<128xf32>
      %72 = vector.shape_cast %71 : vector<128xf32> to vector<128x1xf32>
      %cst_46 = arith.constant 3.200000e+01 : f32
      %73 = vector.broadcast %cst_46 : f32 to vector<128x1xf32>
      %74 = arith.divf %72, %73 : vector<128x1xf32>
      %c1_i32_47 = arith.constant 1 : i32
      %75 = vector.broadcast %c1_i32_47 : i32 to vector<1x128xi32>
      %76 = arith.cmpi eq, %54, %75 : vector<1x128xi32>
      %cst_48 = arith.constant 1.000000e+00 : f32
      %cst_49 = arith.constant 0.000000e+00 : f32
      %77 = vector.broadcast %cst_48 : f32 to vector<1x128xf32>
      %78 = vector.broadcast %cst_49 : f32 to vector<1x128xf32>
      %79 = arith.select %76, %77, %78 : vector<1x128xi1>, vector<1x128xf32>
      %80 = vector.broadcast %79 : vector<1x128xf32> to vector<128x128xf32>
      %81 = vector.broadcast %74 : vector<128x1xf32> to vector<128x128xf32>
      %82 = arith.mulf %80, %81 : vector<128x128xf32>
      %83 = arith.addf %69, %82 : vector<128x128xf32>
      %84 = vector.extract_strided_slice %53 {offsets = [0, 64], sizes = [128, 32], strides = [1, 1]} : vector<128x96xf32> to vector<128x32xf32>
      %cst_50 = arith.constant dense<0.000000e+00> : vector<128xf32>
      %85 = vector.multi_reduction <add>, %84, %cst_50 [1] : vector<128x32xf32> to vector<128xf32>
      %86 = vector.shape_cast %85 : vector<128xf32> to vector<128x1xf32>
      %cst_51 = arith.constant 3.200000e+01 : f32
      %87 = vector.broadcast %cst_51 : f32 to vector<128x1xf32>
      %88 = arith.divf %86, %87 : vector<128x1xf32>
      %c2_i32 = arith.constant 2 : i32
      %89 = vector.broadcast %c2_i32 : i32 to vector<1x128xi32>
      %90 = arith.cmpi eq, %54, %89 : vector<1x128xi32>
      %cst_52 = arith.constant 1.000000e+00 : f32
      %cst_53 = arith.constant 0.000000e+00 : f32
      %91 = vector.broadcast %cst_52 : f32 to vector<1x128xf32>
      %92 = vector.broadcast %cst_53 : f32 to vector<1x128xf32>
      %93 = arith.select %90, %91, %92 : vector<1x128xi1>, vector<1x128xf32>
      %94 = vector.broadcast %93 : vector<1x128xf32> to vector<128x128xf32>
      %95 = vector.broadcast %88 : vector<128x1xf32> to vector<128x128xf32>
      %96 = arith.mulf %94, %95 : vector<128x128xf32>
      %97 = arith.addf %83, %96 : vector<128x128xf32>
      %c0_54 = arith.constant 0 : index
      %c0_55 = arith.constant 0 : index
      %98 = vector.load %arg7[%c0_54, %c0_55] : memref<128x128xbf16, #tpu.memory_space<vmem>>, vector<128x128xbf16>
      %99 = arith.extf %98 : vector<128x128xbf16> to vector<128x128xf32>
      %100 = arith.addf %99, %97 : vector<128x128xf32>
      %101 = arith.truncf %100 : vector<128x128xf32> to vector<128x128xbf16>
      %c0_56 = arith.constant 0 : index
      %c0_57 = arith.constant 0 : index
      %102 = vector.load %arg13[%c0_56, %c0_57] : memref<128x128xbf16, #tpu.memory_space<vmem>>, vector<128x128xbf16>
      tpu.vector_store %arg13[%c0_56, %c0_57], %101 {strides = array<i32>} : memref<128x128xbf16, #tpu.memory_space<vmem>>, vector<128x128xbf16>,
      %cst_58 = arith.constant 0xFF800000 : f32
      %103 = vector.broadcast %cst_58 : f32 to vector<1x128xf32>
      %c0_59 = arith.constant 0 : index
      %c0_60 = arith.constant 0 : index
      %104 = vector.load %arg14[%c0_59, %c0_60] : memref<1x128xf32, #tpu.memory_space<vmem>>, vector<1x128xf32>
      tpu.vector_store %arg14[%c0_59, %c0_60], %103 {strides = array<i32>} : memref<1x128xf32, #tpu.memory_space<vmem>>, vector<1x128xf32>,
      %cst_61 = arith.constant 0.000000e+00 : f32
      %105 = vector.broadcast %cst_61 : f32 to vector<1x128xf32>
      %c0_62 = arith.constant 0 : index
      %c0_63 = arith.constant 0 : index
      %106 = vector.load %arg15[%c0_62, %c0_63] : memref<1x128xf32, #tpu.memory_space<vmem>>, vector<1x128xf32>
      tpu.vector_store %arg15[%c0_62, %c0_63], %105 {strides = array<i32>} : memref<1x128xf32, #tpu.memory_space<vmem>>, vector<1x128xf32>,
      %cst_64 = arith.constant 0.000000e+00 : f32
      %107 = vector.broadcast %cst_64 : f32 to vector<1x128xf32>
      %c0_65 = arith.constant 0 : index
      %c0_66 = arith.constant 0 : index
      %108 = vector.load %arg16[%c0_65, %c0_66] : memref<1x128xf32, #tpu.memory_space<vmem>>, vector<1x128xf32>
      tpu.vector_store %arg16[%c0_65, %c0_66], %107 {strides = array<i32>} : memref<1x128xf32, #tpu.memory_space<vmem>>, vector<1x128xf32>,
    } else {
    }
    %c0_2 = arith.constant 0 : index
    %c0_3 = arith.constant 0 : index
    %4 = vector.load %arg10[%c0_2, %c0_3] : memref<512x128xbf16, #tpu.memory_space<vmem>>, vector<512x128xbf16>
    %c0_4 = arith.constant 0 : index
    %c0_5 = arith.constant 0 : index
    %5 = vector.load %arg13[%c0_4, %c0_5] : memref<128x128xbf16, #tpu.memory_space<vmem>>, vector<128x128xbf16>
    %cst = arith.constant dense<0.000000e+00> : vector<512x128xf32>
    %6 = tpu.matmul %4, %5, %cst {dimension_numbers = #tpu.dot_dimension_numbers<[1], [0], [0], [1], [0, 0, 1, 1], [], []>} : vector<512x128xbf16>, vector<128x128xbf16>, vector<512x128xf32> -> vector<512x128xf32>
    %c0_6 = arith.constant 0 : index
    %c0_7 = arith.constant 0 : index
    %7 = vector.load %arg11[%c0_6, %c0_7] : memref<512x1xf32, #tpu.memory_space<vmem>>, vector<512x1xf32>
    %8 = vector.broadcast %7 : vector<512x1xf32> to vector<512x128xf32>
    %9 = arith.addf %6, %8 : vector<512x128xf32>
    %c512_i32 = arith.constant 512 : i32
    %10 = arith.muli %arg1, %c512_i32 : i32
    %11 = tpu.iota {dimensions = array<i32: 0>} : vector<512x128xi32>
    %12 = vector.broadcast %10 : i32 to vector<512x128xi32>
    %13 = arith.addi %12, %11 : vector<512x128xi32>
    %c0_8 = arith.constant 0 : index
    %c0_9 = arith.constant 0 : index
    %14 = vector.load %arg16[%c0_8, %c0_9] : memref<1x128xf32, #tpu.memory_space<vmem>>, vector<1x128xf32>
    %15 = vector.broadcast %0 : vector<1x128xi32> to vector<512x128xi32>
    %16 = arith.cmpi eq, %13, %15 : vector<512x128xi32>
    %cst_10 = arith.constant 0.000000e+00 : f32
    %17 = vector.broadcast %cst_10 : f32 to vector<512x128xf32>
    %18 = arith.select %16, %9, %17 : vector<512x128xi1>, vector<512x128xf32>
    %cst_11 = arith.constant dense<0.000000e+00> : vector<128xf32>
    %19 = vector.multi_reduction <add>, %18, %cst_11 [0] : vector<512x128xf32> to vector<128xf32>
    %20 = vector.shape_cast %19 : vector<128xf32> to vector<1x128xf32>
    %21 = arith.addf %14, %20 : vector<1x128xf32>
    %c0_12 = arith.constant 0 : index
    %c0_13 = arith.constant 0 : index
    %22 = vector.load %arg16[%c0_12, %c0_13] : memref<1x128xf32, #tpu.memory_space<vmem>>, vector<1x128xf32>
    tpu.vector_store %arg16[%c0_12, %c0_13], %21 {strides = array<i32>} : memref<1x128xf32, #tpu.memory_space<vmem>>, vector<1x128xf32>,
    %c0_14 = arith.constant 0 : index
    %c0_15 = arith.constant 0 : index
    %23 = vector.load %arg14[%c0_14, %c0_15] : memref<1x128xf32, #tpu.memory_space<vmem>>, vector<1x128xf32>
    %cst_16 = arith.constant dense<0xFF800000> : vector<128xf32>
    %24 = vector.multi_reduction <maximumf>, %9, %cst_16 [0] : vector<512x128xf32> to vector<128xf32>
    %25 = vector.shape_cast %24 : vector<128xf32> to vector<1x128xf32>
    %26 = arith.maximumf %23, %25 : vector<1x128xf32>
    %27 = arith.subf %23, %26 : vector<1x128xf32>
    %28 = math.exp %27 : vector<1x128xf32>
    %c0_17 = arith.constant 0 : index
    %c0_18 = arith.constant 0 : index
    %29 = vector.load %arg15[%c0_17, %c0_18] : memref<1x128xf32, #tpu.memory_space<vmem>>, vector<1x128xf32>
    %30 = arith.mulf %28, %29 : vector<1x128xf32>
    %31 = vector.broadcast %26 : vector<1x128xf32> to vector<512x128xf32>
    %32 = arith.subf %9, %31 : vector<512x128xf32>
    %33 = math.exp %32 : vector<512x128xf32>
    %cst_19 = arith.constant dense<0.000000e+00> : vector<128xf32>
    %34 = vector.multi_reduction <add>, %33, %cst_19 [0] : vector<512x128xf32> to vector<128xf32>
    %35 = vector.shape_cast %34 : vector<128xf32> to vector<1x128xf32>
    %36 = arith.addf %30, %35 : vector<1x128xf32>
    %c0_20 = arith.constant 0 : index
    %c0_21 = arith.constant 0 : index
    %37 = vector.load %arg15[%c0_20, %c0_21] : memref<1x128xf32, #tpu.memory_space<vmem>>, vector<1x128xf32>
    tpu.vector_store %arg15[%c0_20, %c0_21], %36 {strides = array<i32>} : memref<1x128xf32, #tpu.memory_space<vmem>>, vector<1x128xf32>,
    %c0_22 = arith.constant 0 : index
    %c0_23 = arith.constant 0 : index
    %38 = vector.load %arg14[%c0_22, %c0_23] : memref<1x128xf32, #tpu.memory_space<vmem>>, vector<1x128xf32>
    tpu.vector_store %arg14[%c0_22, %c0_23], %26 {strides = array<i32>} : memref<1x128xf32, #tpu.memory_space<vmem>>, vector<1x128xf32>,
    %c1_i32 = arith.constant 1 : i32
    %39 = arith.cmpi eq, %arg1, %c1_i32 : i32
    %40 = arith.extui %39 : i1 to i32
    %c0_i32_24 = arith.constant 0 : i32
    %41 = arith.cmpi ne, %40, %c0_i32_24 : i32
    scf.if %41 {
      %c0_25 = arith.constant 0 : index
      %c0_26 = arith.constant 0 : index
      %42 = vector.load %arg14[%c0_25, %c0_26] : memref<1x128xf32, #tpu.memory_space<vmem>>, vector<1x128xf32>
      %c0_27 = arith.constant 0 : index
      %c0_28 = arith.constant 0 : index
      %43 = vector.load %arg15[%c0_27, %c0_28] : memref<1x128xf32, #tpu.memory_space<vmem>>, vector<1x128xf32>
      %44 = math.log %43 : vector<1x128xf32>
      %45 = arith.addf %42, %44 : vector<1x128xf32>
      %c0_i32_29 = arith.constant 0 : i32
      %46 = vector.broadcast %c0_i32_29 : i32 to vector<1x128xi32>
      %47 = arith.cmpi sge, %0, %46 : vector<1x128xi32>
      %c0_30 = arith.constant 0 : index
      %c0_31 = arith.constant 0 : index
      %48 = vector.load %arg16[%c0_30, %c0_31] : memref<1x128xf32, #tpu.memory_space<vmem>>, vector<1x128xf32>
      %49 = arith.subf %45, %48 : vector<1x128xf32>
      %cst_32 = arith.constant 0.000000e+00 : f32
      %50 = vector.broadcast %cst_32 : f32 to vector<1x128xf32>
      %51 = arith.select %47, %49, %50 : vector<1x128xi1>, vector<1x128xf32>
      %c0_33 = arith.constant 0 : index
      %c0_34 = arith.constant 0 : index
      %52 = vector.load %arg12[%c0_33, %c0_34] : memref<1x128xf32, #tpu.memory_space<vmem>>, vector<1x128xf32>
      tpu.vector_store %arg12[%c0_33, %c0_34], %51 {strides = array<i32>} : memref<1x128xf32, #tpu.memory_space<vmem>>, vector<1x128xf32>,
    } else {
    }
    return
  }
  func.func @transform_0(%arg0: i32, %arg1: i32) -> (i32, i32) {
    %c0_i32 = arith.constant 0 : i32
    %c0_i32_0 = arith.constant 0 : i32
    %c0_i32_1 = arith.constant 0 : i32
    return %c0_i32, %c0_i32_0 : i32, i32
  }
  func.func @transform_1(%arg0: i32, %arg1: i32) -> (i32, i32) {
    %c0_i32 = arith.constant 0 : i32
    %c0_i32_0 = arith.constant 0 : i32
    %c0_i32_1 = arith.constant 0 : i32
    return %c0_i32, %c0_i32_0 : i32, i32
  }
  func.func @transform_2(%arg0: i32, %arg1: i32) -> (i32, i32) {
    %c0_i32 = arith.constant 0 : i32
    %c0_i32_0 = arith.constant 0 : i32
    %c0_i32_1 = arith.constant 0 : i32
    return %c0_i32, %c0_i32_0 : i32, i32
  }
  func.func @transform_3(%arg0: i32, %arg1: i32) -> (i32, i32) {
    %c0_i32 = arith.constant 0 : i32
    %c0_i32_0 = arith.constant 0 : i32
    %c0_i32_1 = arith.constant 0 : i32
    return %c0_i32, %c0_i32_0 : i32, i32
  }
  func.func @transform_4(%arg0: i32, %arg1: i32) -> (i32, i32) {
    %c0_i32 = arith.constant 0 : i32
    %c0_i32_0 = arith.constant 0 : i32
    %c0_i32_1 = arith.constant 0 : i32
    return %c0_i32, %c0_i32_0 : i32, i32
  }
  func.func @transform_5(%arg0: i32, %arg1: i32) -> (i32, i32) {
    %c0_i32 = arith.constant 0 : i32
    %c0_i32_0 = arith.constant 0 : i32
    return %c0_i32, %arg0 : i32, i32
  }
  func.func @transform_6(%arg0: i32, %arg1: i32) -> (i32, i32) {
    %c0_i32 = arith.constant 0 : i32
    %c0_i32_0 = arith.constant 0 : i32
    return %c0_i32, %arg0 : i32, i32
  }
  func.func @transform_7(%arg0: i32, %arg1: i32) -> (i32, i32) {
    %c0_i32 = arith.constant 0 : i32
    %c0_i32_0 = arith.constant 0 : i32
    return %c0_i32, %arg0 : i32, i32
  }
  func.func @transform_8(%arg0: i32, %arg1: i32) -> (i32, i32) {
    %c0_i32 = arith.constant 0 : i32
    %c0_i32_0 = arith.constant 0 : i32
    return %arg1, %c0_i32 : i32, i32
  }
  func.func @transform_9(%arg0: i32, %arg1: i32) -> (i32, i32) {
    %c0_i32 = arith.constant 0 : i32
    %c0_i32_0 = arith.constant 0 : i32
    return %arg1, %c0_i32 : i32, i32
  }
  func.func @transform_10(%arg0: i32, %arg1: i32) -> (i32, i32) {
    %c0_i32 = arith.constant 0 : i32
    %c0_i32_0 = arith.constant 0 : i32
    return %c0_i32, %arg0 : i32, i32
  }
}

</mosaic_0001>

<bundles_post_ra>
// kernel: sub.8
= control target key start
LH: loop header
LB: loop body
LE: loop exit
PB: predicated region body
PF: predicated region fallthrough
CT: control target
= control target key end

     0   :  { %vm4_vm0 = vcmask 1047556   ;;  %s213_s14 = smov 48   ;;  %s214_s15 = smov 56   ;;  %vm6_vm1 = vcmask 64512   ;;  %vm25_vm2 = vcmask 523712   ;;  %vm46_vm3 = vcmask 458112   ;;  %s319_s0 = inlined_call_operand.vmem [shape: f32[3,8,8,3], index: 0, kind: input, shape index: {}]   ;;  %s320_s1 = inlined_call_operand.vmem [shape: f32[3,64,3], index: 1, kind: output, shape index: {}]  }
   0x1   :  { %v186_v0 = vld [vmem:[%s319_s0 + $0x6] ss:$8 sm:$0xf]   ;;  %v183_v2 = vld [vmem:[%s319_s0 + $0x7] ss:$8 sm:$0xf]  }
   0x2   :  { %v187_v1 = vld [vmem:[%s319_s0 + $0x6] ss:$8 sm:$0xf0]   ;;  %v184_v4 = vld [vmem:[%s319_s0 + $0x7] ss:$8 sm:$0xf0]  }
   0x3   :  { %v43_v3 = vsel %vm4_vm0, %v187_v1, %v186_v0  ;;  %v22_v5 = vsel %vm4_vm0, %v184_v4, %v183_v2  ;;  %v188_v6 = vld [vmem:[%s319_s0 + $0x46] sm:$0x1]   ;;  %v185_v7 = vld [vmem:[%s319_s0 + $0x47] sm:$0x1]   ;;  %v191_v10 = vld [vmem:[%s319_s0 + $0x45] sm:$0x1]  }
   0x4   :  { %44 = vrot.lane.b32.xlu1 %v43_v3, %s213_s14  ;;  %23 = vrot.lane.b32.xlu0 %v22_v5, %s214_s15  ;;  %v189_v8 = vld [vmem:[%s319_s0 + $0x5] ss:$8 sm:$0xf]   ;;  %v192_v12 = vld [vmem:[%s319_s0 + $0x4] ss:$8 sm:$0xf]  }
   0x5   :  { %v190_v9 = vld [vmem:[%s319_s0 + $0x5] ss:$8 sm:$0xf0]   ;;  %v193_v13 = vld [vmem:[%s319_s0 + $0x4] ss:$8 sm:$0xf0]  }
   0x6   :  { %v64_v11 = vsel %vm4_vm0, %v190_v9, %v189_v8  ;;  %s215_s30 = smov 40   ;;  %v2_v14 = vld [vmem:[%s319_s0] ss:$8 sm:$0xf]   ;;  %v194_v16 = vld [vmem:[%s319_s0 + $0x44] sm:$0x1]   ;;  %v85_v19 = vsel %vm4_vm0, %v193_v13, %v192_v12 }
   0x7   :  { %v3_v15 = vld [vmem:[%s319_s0] ss:$8 sm:$0xf0]   ;;  %v195_v20 = vld [vmem:[%s319_s0 + $0x3] ss:$8 sm:$0xf]  }
   0x8   :  { %54 = vrot.lane.b32.xlu1 %v188_v6, %s213_s14  ;;  %33 = vrot.lane.b32.xlu0 %v185_v7, %s214_s15  ;;  %v5_v17 = vsel %vm4_vm0, %v3_v15, %v2_v14  ;;  %v182_v18 = vld [vmem:[%s319_s0 + $0x40] sm:$0x1]   ;;  %v196_v21 = vld [vmem:[%s319_s0 + $0x3] ss:$8 sm:$0xf0]   ;;  %s216_s14 = smov 32  }
   0x9   :  { %7 = vst.msk [vmem:[#allocation0] sm:$0x7] %vm6_vm1, %v5_v17   ;;  %9 = vst.msk [vmem:[#allocation0 + $0x5] sm:$0x38] %vm6_vm1, %v5_v17   ;;  %v197_v22 = vld [vmem:[%s319_s0 + $0x43] sm:$0x1]   ;;  %v106_v23 = vsel %vm4_vm0, %v196_v21, %v195_v20 }
   0xa   :  { %11 = vst.msk [vmem:[#allocation0 + $0xa] sm:$0xc0] %vm6_vm1, %v5_v17   ;;  %16 = vst.msk [vmem:[#allocation0 + $0x12] sm:$0x1] %vm6_vm1, %v182_v18   ;;  %s217_s21 = smov 24   ;;  %s218_s28 = smov 16  }
   0xb   :  { %v198_v24 = vld [vmem:[%s319_s0 + $0x2] ss:$8 sm:$0xf]   ;;  %v201_v28 = vld [vmem:[%s319_s0 + $0x1] ss:$8 sm:$0xf]  }
   0xc   :  { %75 = vrot.lane.b32.xlu1 %v191_v10, %s215_s30  ;;  %65 = vrot.lane.b32.xlu0 %v64_v11, %s215_s30  ;;  %v199_v25 = vld [vmem:[%s319_s0 + $0x2] ss:$8 sm:$0xf0]   ;;  %v202_v29 = vld [vmem:[%s319_s0 + $0x1] ss:$8 sm:$0xf0]  }
   0xd   :  { %v200_v26 = vld [vmem:[%s319_s0 + $0x42] sm:$0x1]   ;;  %v127_v27 = vsel %vm4_vm0, %v199_v25, %v198_v24  ;;  %v203_v30 = vld [vmem:[%s319_s0 + $0x41] sm:$0x1]   ;;  %v148_v31 = vsel %vm4_vm0, %v202_v29, %v201_v28  ;;  %s219_s0 = smov 8   ;;  %vm67_vm4 = vcmask 392512  }
   0xe   :  { %vm88_vm5 = vcmask 326912   ;;  %vm109_vm6 = vcmask 261312   ;;  %vm130_vm7 = vcmask 195712   ;;  %vm151_vm8 = vcmask 130112  }
  0x10   :  { %96 = vrot.lane.b32.xlu1 %v194_v16, %s216_s14  ;;  %86 = vrot.lane.b32.xlu0 %v85_v19, %s216_s14 }
  0x14   :  { %117 = vrot.lane.b32.xlu1 %v197_v22, %s217_s21  ;;  %107 = vrot.lane.b32.xlu0 %v106_v23, %s217_s21 }
  0x18   :  { %138 = vrot.lane.b32.xlu1 %v200_v26, %s218_s28  ;;  %128 = vrot.lane.b32.xlu0 %v127_v27, %s218_s28 }
  0x1c   :  { %159 = vrot.lane.b32.xlu1 %v203_v30, %s219_s0  ;;  %149 = vrot.lane.b32.xlu0 %v148_v31, %s219_s0 }
  0x76   :  { %v45_v32 = vpop.permute.xlu1 %44   ;;  %v24_v33 = vpop.permute.xlu0 %23  }
  0x77   :  { %26 = vst.msk [vmem:[#allocation0] sm:$0x7] %vm25_vm2, %v24_v33   ;;  %28 = vst.msk [vmem:[#allocation0 + $0x5] sm:$0x38] %vm25_vm2, %v24_v33  }
  0x78   :  { %30 = vst.msk [vmem:[#allocation0 + $0xa] sm:$0xc0] %vm25_vm2, %v24_v33  }
  0x79   :  { %47 = vst.msk [vmem:[#allocation0] sm:$0x7] %vm46_vm3, %v45_v32   ;;  %49 = vst.msk [vmem:[#allocation0 + $0x5] sm:$0x38] %vm46_vm3, %v45_v32  }
  0x7a   :  { %51 = vst.msk [vmem:[#allocation0 + $0xa] sm:$0xc0] %vm46_vm3, %v45_v32   ;;  %v55_v34 = vpop.permute.xlu1 %54   ;;  %v34_v35 = vpop.permute.xlu0 %33  }
  0x7b   :  { %37 = vst.msk [vmem:[#allocation0 + $0x12] sm:$0x1] %vm25_vm2, %v34_v35  }
  0x7c   :  { %58 = vst.msk [vmem:[#allocation0 + $0x12] sm:$0x1] %vm46_vm3, %v55_v34  }
  0x7e   :  { %v76_v36 = vpop.permute.xlu1 %75   ;;  %v66_v37 = vpop.permute.xlu0 %65  }
  0x7f   :  { %79 = vst.msk [vmem:[#allocation0 + $0x12] sm:$0x1] %vm67_vm4, %v76_v36   ;;  %68 = vst.msk [vmem:[#allocation0] sm:$0x7] %vm67_vm4, %v66_v37  }
  0x80   :  { %70 = vst.msk [vmem:[#allocation0 + $0x5] sm:$0x38] %vm67_vm4, %v66_v37   ;;  %72 = vst.msk [vmem:[#allocation0 + $0xa] sm:$0xc0] %vm67_vm4, %v66_v37  }
  0x82   :  { %v97_v38 = vpop.permute.xlu1 %96   ;;  %v87_v39 = vpop.permute.xlu0 %86  }
  0x83   :  { %100 = vst.msk [vmem:[#allocation0 + $0x12] sm:$0x1] %vm88_vm5, %v97_v38   ;;  %89 = vst.msk [vmem:[#allocation0] sm:$0x7] %vm88_vm5, %v87_v39  }
  0x84   :  { %91 = vst.msk [vmem:[#allocation0 + $0x5] sm:$0x38] %vm88_vm5, %v87_v39   ;;  %93 = vst.msk [vmem:[#allocation0 + $0xa] sm:$0xc0] %vm88_vm5, %v87_v39  }
  0x86   :  { %v118_v40 = vpop.permute.xlu1 %117   ;;  %v108_v41 = vpop.permute.xlu0 %107  }
  0x87   :  { %121 = vst.msk [vmem:[#allocation0 + $0x12] sm:$0x1] %vm109_vm6, %v118_v40   ;;  %110 = vst.msk [vmem:[#allocation0] sm:$0x7] %vm109_vm6, %v108_v41  }
  0x88   :  { %112 = vst.msk [vmem:[#allocation0 + $0x5] sm:$0x38] %vm109_vm6, %v108_v41   ;;  %114 = vst.msk [vmem:[#allocation0 + $0xa] sm:$0xc0] %vm109_vm6, %v108_v41  }
  0x8a   :  { %v139_v42 = vpop.permute.xlu1 %138   ;;  %v129_v43 = vpop.permute.xlu0 %128  }
  0x8b   :  { %142 = vst.msk [vmem:[#allocation0 + $0x12] sm:$0x1] %vm130_vm7, %v139_v42   ;;  %131 = vst.msk [vmem:[#allocation0] sm:$0x7] %vm130_vm7, %v129_v43  }
  0x8c   :  { %133 = vst.msk [vmem:[#allocation0 + $0x5] sm:$0x38] %vm130_vm7, %v129_v43   ;;  %135 = vst.msk [vmem:[#allocation0 + $0xa] sm:$0xc0] %vm130_vm7, %v129_v43  }
  0x8e   :  { %v160_v44 = vpop.permute.xlu1 %159   ;;  %v150_v45 = vpop.permute.xlu0 %149  }
  0x8f   :  { %163 = vst.msk [vmem:[#allocation0 + $0x12] sm:$0x1] %vm151_vm8, %v160_v44   ;;  %152 = vst.msk [vmem:[#allocation0] sm:$0x7] %vm151_vm8, %v150_v45  }
  0x90   :  { %154 = vst.msk [vmem:[#allocation0 + $0x5] sm:$0x38] %vm151_vm8, %v150_v45   ;;  %156 = vst.msk [vmem:[#allocation0 + $0xa] sm:$0xc0] %vm151_vm8, %v150_v45  }
  0x96   :  { %v167_v46 = vld [vmem:[#allocation0] sm:$0xf] }
  0x97   :  { %v171_v47 = vld [vmem:[#allocation0 + $0x8] sm:$0xf]  ;;  %v176_v48 = vld [vmem:[#allocation0 + $0x10] sm:$0xf]  ;;  %169 = vst [vmem:[%s320_s1] sm:$0xf] %v167_v46 }
  0x98   :  { %204 = vst [vmem:[%s320_s1 + $0x4] sm:$0xf] %v171_v47  ;;  %205 = vst [vmem:[%s320_s1 + $0x8] sm:$0xf] %v176_v48 }

// kernel: visual_tokenizer_forward.1
= control target key start
LH: loop header
LB: loop body
LE: loop exit
PB: predicated region body
PF: predicated region fallthrough
CT: control target
= control target key end

     0   :  { %s5729_s0 = inlined_call_operand.vmem [shape: f32[32,96], index: 0, kind: input, shape index: {}]   ;;  %s5730_s1 = inlined_call_operand.vmem [shape: f32[32,32], index: 1, kind: input, shape index: {}]   ;;  %s5731_s2 = inlined_call_operand.vmem [shape: f32[32,1], index: 2, kind: input, shape index: {}]   ;;  %s5732_s3 = inlined_call_operand.vmem [shape: f32[128,32], index: 3, kind: input, shape index: {}]   ;;  %s5733_s4 = inlined_call_operand.vmem [shape: f32[128,1], index: 4, kind: input, shape index: {}]   ;;  %s5734_s5 = inlined_call_operand.vmem [shape: bf16[128,256], index: 5, kind: input, shape index: {}]   ;;  %s5735_s6 = inlined_call_operand.vmem [shape: s32[1,256], index: 6, kind: input, shape index: {}]   ;;  %s5736_s7 = inlined_call_operand.vmem [shape: s32[1,256], index: 7, kind: input, shape index: {}]   ;;  %s5737_s8 = inlined_call_operand.vmem [shape: bf16[1024,128], index: 8, kind: input, shape index: {}]   ;;  %s5738_s9 = inlined_call_operand.vmem [shape: f32[1024,1], index: 9, kind: input, shape index: {}]   ;;  %s5739_s10 = inlined_call_operand.vmem [shape: f32[1,256], index: 10, kind: output, shape index: {}]  }
   0x1   :  { %5826 = sst [smem:[#allocation88_spill]] %s5734_s5 }
   0x2   :  { %5827 = sst [smem:[#allocation89_spill]] %s5735_s6 }
   0x3   :  { %s3910_s13 = smov 0   ;;  %s3912_s14 = smov 0  }
   0x4   :  { %s3914_s15 = smov 0   ;;  %s3916_s16 = smov 0  }
   0x5   :  { %s3918_s17 = smov 0   ;;  %s3920_s18 = smov 0  }
   0x6   :  { %s3922_s19 = smov 0  }
   0x7 LB: > { %5828 = sst [smem:[#allocation7_spill]] %s3839_s17  ;;  %s29_s20 = sadd.s32 1, %s3839_s17  ;;  %s3847_s19 = sphi %s3922_s19, %s20_s19   ;;  %s3843_s18 = sphi %s3920_s18, %s6054_s18   ;;  %s3839_s17 = sphi %s3918_s17, %s6053_s17   ;;  %s3835_s16 = sphi %s3916_s16, %s6052_s16   ;;  %s3831_s15 = sphi %s3914_s15, %s6051_s15   ;;  %s3827_s14 = sphi %s3912_s14, %s6056_s14   ;;  %s3823_s13 = sphi %s3910_s13, %s6055_s13  }
   0x8   : > { %5829 = sst [smem:[#allocation8_spill]] %s3843_s18  ;;  %p30_p0 = scmp.ge.s32.totalorder %s29_s20, 2 }
   0x9   : > { %s32_s21 = sadd.s32 1, %s3843_s18  ;;  %p151_p1 = scmp.ne.s32.totalorder %s3827_s14, %s3823_s13 }
   0xa   : > { %p152_p2 = scmp.eq.s32.totalorder %s3847_s19, 0  ;;  %s6058_s20 = smov (%p30_p0, %s29_s20), 0 }
   0xb   : > { %5830 = sst [smem:[#allocation9_spill]] %s6058_s20  ;;  %s6060_s21 = smov (!%p30_p0, %s32_s21), %s3843_s18 }
   0xc   : > { %p153_p3 = por %p152_p2, %p151_p1  ;;  %p34_p4 = scmp.ge.s32.totalorder %s6060_s21, 2 }
   0xd   : > { %s144_s23 = sadd.s32 1, %s3827_s14  ;;  %p3220_p6 = scmp.ge.s32.totalorder %s3847_s19, 4 }
   0xe   : > { %s6062_s21 = smov (%p34_p4, %s6060_s21), 0 }
   0xf   : > { %5831 = sst [smem:[#allocation10_spill]] %s6062_s21  ;;  %s141_s22 = ssub.s32 %s3843_s18, %s6062_s21 }
  0x10   : > { %p142_p5 = scmp.eq.s32.totalorder %s141_s22, 0  ;;  %322 = sbr.rel (%p3220_p6) target bundleno = 43 (0x2b), region = 36 }
  0x12   : > { %s3959_s24 = scalar_select %p142_p5, %s3827_s14, %s144_s23  }
  0x17   : > { %325 = sbr.rel (!%p153_p3) target bundleno = 43 (0x2b), region = 40  ;;  %s327_s25 = sand.u32 (%p153_p3), 1, %s3827_s14  }
  0x18   : > { %s3222_s26 = sshll.u32 (%p153_p3), %s3843_s18, 2  ;;  %s3221_s27 = sshll.u32 (%p153_p3), %s327_s25, 6 }
  0x19   : > { %s5832_s5 = sld [smem:[#allocation88_spill]] (%p153_p3)  ;;  %s329_s11 = scalar_lea.vmem (%p153_p3), [#allocation6], %s3221_s27 }
  0x1f   : > { %s3967_s30 = scalar_lea.vmem %s5832_s5, %s3222_s26 }
  0x20   : > { %v347_v0 = vld [vmem:[%s3967_s30] sm:$0xf]  ;;  %v349_v1 = vld [vmem:[%s3967_s30 + $0x8] sm:$0xf]  ;;  %v351_v2 = vld [vmem:[%s3967_s30 + $0x10] sm:$0xf] }
  0x21   : > { %348 = vst [vmem:[%s329_s11] sm:$0xf] %v347_v0  ;;  %350 = vst [vmem:[%s329_s11 + $0x4] sm:$0xf] %v349_v1  ;;  %v353_v3 = vld [vmem:[%s3967_s30 + $0x18] sm:$0xf] }
  0x22   : > { %v355_v4 = vld [vmem:[%s3967_s30 + $0x20] sm:$0xf]  ;;  %352 = vst [vmem:[%s329_s11 + $0x8] sm:$0xf] %v351_v2  ;;  %354 = vst [vmem:[%s329_s11 + $0xc] sm:$0xf] %v353_v3 }
  0x23   : > { %356 = vst [vmem:[%s329_s11 + $0x10] sm:$0xf] %v355_v4  ;;  %v357_v5 = vld [vmem:[%s3967_s30 + $0x28] sm:$0xf]  ;;  %v359_v6 = vld [vmem:[%s3967_s30 + $0x30] sm:$0xf] }
  0x24   : > { %v361_v7 = vld [vmem:[%s3967_s30 + $0x38] sm:$0xf]  ;;  %358 = vst [vmem:[%s329_s11 + $0x14] sm:$0xf] %v357_v5  ;;  %360 = vst [vmem:[%s329_s11 + $0x18] sm:$0xf] %v359_v6 }
  0x25   : > { %362 = vst [vmem:[%s329_s11 + $0x1c] sm:$0xf] %v361_v7  ;;  %v363_v8 = vld [vmem:[%s3967_s30 + $0x40] sm:$0xf]  ;;  %v365_v9 = vld [vmem:[%s3967_s30 + $0x48] sm:$0xf] }
  0x26   : > { %v367_v10 = vld [vmem:[%s3967_s30 + $0x50] sm:$0xf]  ;;  %364 = vst [vmem:[%s329_s11 + $0x20] sm:$0xf] %v363_v8  ;;  %366 = vst [vmem:[%s329_s11 + $0x24] sm:$0xf] %v365_v9 }
  0x27   : > { %368 = vst [vmem:[%s329_s11 + $0x28] sm:$0xf] %v367_v10  ;;  %v369_v11 = vld [vmem:[%s3967_s30 + $0x58] sm:$0xf]  ;;  %v371_v12 = vld [vmem:[%s3967_s30 + $0x60] sm:$0xf] }
  0x28   : > { %v373_v13 = vld [vmem:[%s3967_s30 + $0x68] sm:$0xf]  ;;  %370 = vst [vmem:[%s329_s11 + $0x2c] sm:$0xf] %v369_v11  ;;  %372 = vst [vmem:[%s329_s11 + $0x30] sm:$0xf] %v371_v12 }
  0x29   : > { %374 = vst [vmem:[%s329_s11 + $0x34] sm:$0xf] %v373_v13  ;;  %v375_v14 = vld [vmem:[%s3967_s30 + $0x70] sm:$0xf]  ;;  %v377_v15 = vld [vmem:[%s3967_s30 + $0x78] sm:$0xf] }
  0x2a   : > { %376 = vst [vmem:[%s329_s11 + $0x38] sm:$0xf] %v375_v14  ;;  %378 = vst [vmem:[%s329_s11 + $0x3c] sm:$0xf] %v377_v15 }
  0x2b PF: > { %p3223_p7 = scmp.ge.s32.totalorder %s3847_s19, 1  ;;  %p462_p8 = scmp.lt.s32.totalorder %s3847_s19, 5 }
  0x2d   : > { %p463_p9 = pnand %p3223_p7, %p462_p8 }
  0x2f   : > { %466 = sbr.rel (%p463_p9) target bundleno = 1669 (0x685), region = 97 }
  0x36   : > { %s469_s12 = sand.u32 1, %s3823_s13   ;;  %p520_p10 = scmp.lt.s32.totalorder %s3835_s16, 1 }
  0x37   : > { %s3224_s22 = sshll.u32 %s469_s12, 6  ;;  %s3225_s23 = sshll.u32 %s3831_s15, 6 }
  0x38   : > { %p527_p11 = scmp.lt.s32.totalorder %s3225_s23, 127  ;;  %s6064_s16 = smov (!%p520_p10, %s3835_s16), 1 }
  0x39   : > { %s5833_s6 = sld [smem:[#allocation89_spill]]  ;;  %s525_s30 = scalar_lea.vmem %s5736_s7, %s6064_s16 }
  0x3a   : > { %s6066_s23 = smov (!%p527_p11, %s3225_s23), 127  ;;  %s4017_s28 = scalar_lea.vmem [#allocation6], %s3224_s22 }
  0x3b   : > { %s3226_s11 = sshll.u32 %s6066_s23, 2  ;;  %s3228_s13 = sshll.u32 %s6066_s23, 3 }
  0x3c   : > { %s4006_s21 = scalar_lea.vmem %s5737_s8, %s3226_s11  ;;  %s4011_s17 = scalar_lea.vmem %s5738_s9, %s3228_s13 }
  0x3d   : > { %p3229_p12 = scmp.ne.s32.totalorder %s3831_s15, 0 }
  0x3e   : > { %v551_v17 = vld [vmem:[%s5729_s0] sm:$0xff] (!%p3229_p12)  ;;  %v552_v18 = vld [vmem:[%s5729_s0 + $0x8] sm:$0xff] (!%p3229_p12)  ;;  %v553_v19 = vld [vmem:[%s5729_s0 + $0x10] sm:$0xff] (!%p3229_p12)  ;;  %vm579_vm0 = vcmask (!%p3229_p12), 261120   ;;  %v3849_v23 = vmov (!%p3229_p12), 0   ;;  %s3850_s18 = smov (!%p3229_p12), 96  }
  0x3f   : > { %s522_s27 = scalar_lea.vmem %s5833_s6, %s6064_s16  ;;  %s540_s6 = scalar_lea.vmem %s5739_s10, %s6064_s16  ;;  %v3519_v20 = vpack.c.bf16 (!%p3229_p12), %v552_v18, %v551_v17  ;;  %v554_v21 = vld [vmem:[%s5729_s0 + $0x18] sm:$0xff] (!%p3229_p12)  ;;  %v547_v22 = vld [vmem:[%s5730_s1] sm:$0xff] (!%p3229_p12)  ;;  %3617 = vset.pattern.permute.xlu0 (!%p3229_p12), %v3849_v23  ;;  %3618 = vset.pattern.permute.xlu1 (!%p3229_p12), %v3849_v23  ;;  %v557_v26 = vld [vmem:[%s5731_s2 + $0x10] sm:$0xff] (!%p3229_p12) }
  0x40   : > { %v4001_v16 = vld [vmem:[%s522_s27] sm:$0x1]  ;;  %546 = sbr.rel (%p3229_p12) target bundleno = 1119 (0x45f), region = 105  ;;  %v3523_v24 = vpack.c.bf16 (!%p3229_p12), %v554_v21, %v553_v19  ;;  %3401 = vmatprep.mubr.msk.f32.mxu0 (!%p3229_p12), %vm579_vm0, %v547_v22  ;;  %571 = vperm.xlu1 (!%p3229_p12), %3618, %v557_v26   ;;  %v556_v27 = vld [vmem:[%s5731_s2 + $0x8] sm:$0xff] (!%p3229_p12)  ;;  %v558_v28 = vld [vmem:[%s5731_s2 + $0x18] sm:$0xff] (!%p3229_p12)  ;;  %s3851_s20 = smov (!%p3229_p12), 64  }
  0x41   : > { %5834 = vst [vmem:[#allocation11_spill] sm:$0xff] %v4001_v16  ;;  %v555_v25 = vld [vmem:[%s5731_s2] sm:$0xff] (!%p3229_p12)  ;;  %3520 = vmatprep.subr.bf16.mxu0 (!%p3229_p12), %v3519_v20  ;;  %v548_v29 = vld [vmem:[%s5730_s1 + $0x8] sm:$0xff] (!%p3229_p12)  ;;  %v549_v31 = vld [vmem:[%s5730_s1 + $0x10] sm:$0xff] (!%p3229_p12) }
  0x42   : > { %561 = vperm.xlu0 (!%p3229_p12), %3617, %v555_v25   ;;  %3522 = vmatpush3.bf16.msra.mxu0 (!%p3229_p12), %v3519_v20  ;;  %v697_v30 = vld [vmem:[%s5733_s4] sm:$0xff] (!%p3229_p12)  ;;  %v698_v32 = vld [vmem:[%s5733_s4 + $0x8] sm:$0xff] (!%p3229_p12)  ;;  %v550_v33 = vld [vmem:[%s5730_s1 + $0x18] sm:$0xff] (!%p3229_p12) }
  0x43   : > { %3524 = vmatprep.subr.bf16.mxu0 (!%p3229_p12), %v3523_v24  ;;  %v699_v34 = vld [vmem:[%s5733_s4 + $0x10] sm:$0xff] (!%p3229_p12)  ;;  %v700_v35 = vld [vmem:[%s5733_s4 + $0x18] sm:$0xff] (!%p3229_p12)  ;;  %v701_v36 = vld [vmem:[%s5733_s4 + $0x20] sm:$0xff] (!%p3229_p12) }
  0x44   : > { %576 = vperm.xlu1 (!%p3229_p12), %3618, %v558_v28   ;;  %v702_v37 = vld [vmem:[%s5733_s4 + $0x28] sm:$0xff] (!%p3229_p12)  ;;  %v703_v38 = vld [vmem:[%s5733_s4 + $0x30] sm:$0xff] (!%p3229_p12)  ;;  %v704_v39 = vld [vmem:[%s5733_s4 + $0x38] sm:$0xff] (!%p3229_p12) }
  0x45   : > { %v705_v40 = vld [vmem:[%s5733_s4 + $0x40] sm:$0xff] (!%p3229_p12)  ;;  %v706_v41 = vld [vmem:[%s5733_s4 + $0x48] sm:$0xff] (!%p3229_p12)  ;;  %v707_v42 = vld [vmem:[%s5733_s4 + $0x50] sm:$0xff] (!%p3229_p12) }
  0x46   : > { %566 = vperm.xlu0 (!%p3229_p12), %3617, %v556_v27   ;;  %3526 = vmatpush3.bf16.msra.mxu0 (!%p3229_p12), %v3523_v24  ;;  %v708_v43 = vld [vmem:[%s5733_s4 + $0x58] sm:$0xff] (!%p3229_p12)  ;;  %v709_v44 = vld [vmem:[%s5733_s4 + $0x60] sm:$0xff] (!%p3229_p12)  ;;  %v710_v45 = vld [vmem:[%s5733_s4 + $0x68] sm:$0xff] (!%p3229_p12) }
  0x47   : > { %v711_v46 = vld [vmem:[%s5733_s4 + $0x70] sm:$0xff]  ;;  %v712_v47 = vld [vmem:[%s5733_s4 + $0x78] sm:$0xff]  ;;  %v681_v48 = vld [vmem:[%s5732_s3] sm:$0xff] }
  0x48   : > { %720 = vperm.xlu1 %3618, %v698_v32   ;;  %v687_v49 = vld [vmem:[%s5732_s3 + $0x30] sm:$0xff]  ;;  %v682_v4 = vld [vmem:[%s5732_s3 + $0x8] sm:$0xff]  ;;  %v688_v5 = vld [vmem:[%s5732_s3 + $0x38] sm:$0xff] }
  0x49   : > { %3402 = vmatmul.mubr.msk.f32.vlgmr.msra.gmra.mrb[0].mxu0 %vm579_vm0, %v548_v29  ;;  %3424 = vmatprep.mubr.msk.f32.mxu1 %vm579_vm0, %v687_v49  ;;  %v683_v6 = vld [vmem:[%s5732_s3 + $0x10] sm:$0xff]  ;;  %v689_v7 = vld [vmem:[%s5732_s3 + $0x40] sm:$0xff]  ;;  %v684_v8 = vld [vmem:[%s5732_s3 + $0x18] sm:$0xff] }
  0x4a   : > { %715 = vperm.xlu0 %3617, %v697_v30   ;;  %3404 = vmatprep.mubr.msk.f32.mxu0 %vm579_vm0, %v549_v31  ;;  %v690_v9 = vld [vmem:[%s5732_s3 + $0x48] sm:$0xff]  ;;  %v685_v10 = vld [vmem:[%s5732_s3 + $0x20] sm:$0xff]  ;;  %v691_v11 = vld [vmem:[%s5732_s3 + $0x50] sm:$0xff] }
  0x4b   : > { %v686_v12 = vld [vmem:[%s5732_s3 + $0x28] sm:$0xff]  ;;  %v692_v13 = vld [vmem:[%s5732_s3 + $0x58] sm:$0xff]  ;;  %v693_v14 = vld [vmem:[%s5732_s3 + $0x60] sm:$0xff] }
  0x4c   : > { %730 = vperm.xlu1 %3618, %v700_v35   ;;  %v694_v15 = vld [vmem:[%s5732_s3 + $0x68] sm:$0xff]  ;;  %v695_v17 = vld [vmem:[%s5732_s3 + $0x70] sm:$0xff]  ;;  %v696_v18 = vld [vmem:[%s5732_s3 + $0x78] sm:$0xff] }
  0x4d   : > { %3405 = vmatmul.mubr.msk.f32.gmra.mrb[2].mxu0 %vm579_vm0, %v550_v33 }
  0x4e   : > { %725 = vperm.xlu0 %3617, %v699_v34   ;;  %3415 = vmatprep.mubr.msk.f32.mxu0 %vm579_vm0, %v681_v48 }
  0x50   : > { %740 = vperm.xlu1 %3618, %v702_v37  }
  0x52   : > { %735 = vperm.xlu0 %3617, %v701_v36  }
  0x54   : > { %750 = vperm.xlu1 %3618, %v704_v39  }
  0x56   : > { %745 = vperm.xlu0 %3617, %v703_v38  }
  0x58   : > { %760 = vperm.xlu1 %3618, %v706_v41  }
  0x5a   : > { %755 = vperm.xlu0 %3617, %v705_v40  }
  0x5c   : > { %770 = vperm.xlu1 %3618, %v708_v43  }
  0x5e   : > { %765 = vperm.xlu0 %3617, %v707_v42  }
  0x60   : > { %780 = vperm.xlu1 %3618, %v710_v45  }
  0x62   : > { %775 = vperm.xlu0 %3617, %v709_v44   ;;  %v3852_v44 = vmov 0.0  }
  0x63   : > { %1477 = vst [vmem:[#allocation4] sm:$0x1] %v3852_v44  ;;  %1478 = vst [vmem:[#allocation5] sm:$0x1] %v3852_v44 }
  0x64   : > { %790 = vperm.xlu1 %3618, %v712_v47  }
  0x66   : > { %785 = vperm.xlu0 %3617, %v711_v46  }
  0xbf   : > { %v572_v51 = vpop.permute.xlu1 %571 }
  0xc1   : > { %v562_v50 = vpop.permute.xlu0 %561 }
  0xc3   : > { %v577_v57 = vpop.permute.xlu1 %576 }
  0xc5   : > { %v567_v52 = vpop.permute.xlu0 %566 }
  0xc7   : > { %v721_v19 = vpop.permute.xlu1 %720 }
  0xc9   : > { %v716_v42 = vpop.permute.xlu0 %715 }
  0xcb   : > { %v731_v20 = vpop.permute.xlu1 %730 }
  0xcd   : > { %v726_v43 = vpop.permute.xlu0 %725 }
  0xcf   : > { %v4172_v21 = vpop.permute.xlu1 %740 }
  0xd1   : > { %v736_v46 = vpop.permute.xlu0 %735 }
  0xd3   : > { %v751_v22 = vpop.permute.xlu1 %750 }
  0xd5   : > { %v746_v47 = vpop.permute.xlu0 %745 }
 0x11c   : > { %v3403_v53 = vpop.f32.mrb[0].mxu0 }
 0x11d   : > { %v664_v54 = vadd.f32 %v3403_v53, %v567_v52  ;;  %v658_v55 = vpop.f32.mrb[1].mxu0  ;;  %v761_v52 = vpop.permute.xlu1 %760 }
 0x11e   : > { %v659_v56 = vadd.f32 %v658_v55, %v562_v50 }
 0x11f   : > { %3619 = vtanh.f32 %v664_v54 }
 0x120   : > { %3621 = vtanh.f32 %v659_v56  ;;  %v3406_v58 = vpop.f32.mrb[2].mxu0 }
 0x121   : > { %v674_v59 = vadd.f32 %v3406_v58, %v577_v57  ;;  %v668_v60 = vpop.f32.mrb[3].mxu0  ;;  %v756_v57 = vpop.permute.xlu0 %755 }
 0x122   : > { %v669_v61 = vadd.f32 %v668_v60, %v572_v51 }
 0x123   : > { %3623 = vtanh.f32 %v674_v59 }
 0x124   : > { %3625 = vtanh.f32 %v669_v61 }
 0x129   : > { %v3620_v62 = vpop.eup %3619 }
 0x12a   : > { %v3622_v63 = vpop.eup %3621 }
 0x12b   : > { %v3527_v0 = vpack.c.bf16 %v3620_v62, %v3622_v63  ;;  %v771_v62 = vpop.permute.xlu1 %770 }
 0x12d   : > { %v3624_v1 = vpop.eup %3623  ;;  %3528 = vmatprep.subr.bf16.mxu0 %v3527_v0  ;;  %3535 = vmatprep.subr.bf16.mxu1 %v3527_v0 }
 0x12e   : > { %v3626_v2 = vpop.eup %3625  ;;  %3530 = vmatpush3.bf16.msra.mxu0 %v3527_v0  ;;  %3537 = vmatpush3.bf16.msra.mxu1 %v3527_v0 }
 0x12f   : > { %v3531_v3 = vpack.c.bf16 %v3624_v1, %v3626_v2 }
 0x131   : > { %3532 = vmatprep.subr.bf16.mxu0 %v3531_v3  ;;  %3536 = vmatprep.subr.bf16.mxu1 %v3531_v3 }
 0x132   : > { %3534 = vmatpush3.bf16.msra.mxu0 %v3531_v3  ;;  %3538 = vmatpush3.bf16.msra.mxu1 %v3531_v3 }
 0x135   : > { %3416 = vmatmul.mubr.msk.f32.vlgmr.msra.gmra.mrb[4].mxu0 %vm579_vm0, %v682_v4  ;;  %3425 = vmatmul.mubr.msk.f32.vlgmr.msra.gmra.mrb[0].mxu1 %vm579_vm0, %v688_v5  ;;  %v766_v4 = vpop.permute.xlu0 %765 }
 0x136   : > { %3418 = vmatprep.mubr.msk.f32.mxu0 %vm579_vm0, %v683_v6  ;;  %3427 = vmatprep.mubr.msk.f32.mxu1 %vm579_vm0, %v689_v7  ;;  %v781_v6 = vpop.permute.xlu1 %780 }
 0x139   : > { %3419 = vmatmul.mubr.msk.f32.gmra.mrb[6].mxu0 %vm579_vm0, %v684_v8  ;;  %3428 = vmatmul.mubr.msk.f32.gmra.mrb[2].mxu1 %vm579_vm0, %v690_v9 }
 0x13a   : > { %3421 = vmatprep.mubr.msk.f32.mxu0 %vm579_vm0, %v685_v10  ;;  %3430 = vmatprep.mubr.msk.f32.mxu1 %vm579_vm0, %v691_v11  ;;  %v776_v11 = vpop.permute.xlu0 %775 }
 0x13d   : > { %3422 = vmatmul.mubr.msk.f32.gmra.mrb[8].mxu0 %vm579_vm0, %v686_v12  ;;  %3431 = vmatmul.mubr.msk.f32.gmra.mrb[4].mxu1 %vm579_vm0, %v692_v13 }
 0x13e   : > { %3433 = vmatprep.mubr.msk.f32.mxu1 %vm579_vm0, %v693_v14  ;;  %v786_v13 = vpop.permute.xlu0 %785  ;;  %v791_v14 = vpop.permute.xlu1 %790 }
 0x141   : > { %3434 = vmatmul.mubr.msk.f32.gmra.mrb[6].mxu1 %vm579_vm0, %v694_v15 }
 0x142   : > { %3436 = vmatprep.mubr.msk.f32.mxu1 %vm579_vm0, %v695_v17 }
 0x145   : > { %3437 = vmatmul.mubr.msk.f32.gmra.mrb[8].mxu1 %vm579_vm0, %v696_v18 }
 0x208   : > { %v3417_v23 = vpop.f32.mrb[4].mxu0  ;;  %v3426_v24 = vpop.f32.mrb[0].mxu1 }
 0x209   : > { %v913_v25 = vadd.f32 %v3417_v23, %v721_v19  ;;  %v943_v26 = vadd.f32 %v3426_v24, %v751_v22  ;;  %v907_v27 = vpop.f32.mrb[5].mxu0  ;;  %v937_v28 = vpop.f32.mrb[1].mxu1 }
 0x20a   : > { %v938_v48 = vadd.f32 %v937_v28, %v746_v47  ;;  %v908_v49 = vadd.f32 %v907_v27, %v716_v42 }
 0x20b   : > { %1122 = vrot.lane.b32.xlu1 %v943_v26, %s3850_s18  ;;  %1110 = vrot.lane.b32.xlu0 %v913_v25, %s3850_s18  ;;  %v1008_v41 = vsel %vm579_vm0, %v943_v26, 0.0  ;;  %v990_v45 = vsel %vm579_vm0, %v913_v25, 0.0 }
 0x20c   : > { %v3420_v29 = vpop.f32.mrb[6].mxu0  ;;  %v3429_v30 = vpop.f32.mrb[2].mxu1  ;;  %v987_v51 = vsel %vm579_vm0, %v908_v49, 0.0  ;;  %v1005_v55 = vsel %vm579_vm0, %v938_v48, 0.0 }
 0x20d   : > { %v917_v31 = vpop.f32.mrb[7].mxu0  ;;  %v947_v32 = vpop.f32.mrb[3].mxu1  ;;  %v923_v50 = vadd.f32 %v3420_v29, %v731_v20  ;;  %v953_v53 = vadd.f32 %v3429_v30, %v761_v52 }
 0x20e   : > { %v948_v58 = vadd.f32 %v947_v32, %v756_v57  ;;  %v918_v59 = vadd.f32 %v917_v31, %v726_v43 }
 0x20f   : > { %1262 = vrot.lane.b32.xlu1 %v913_v25, %s3851_s20  ;;  %v996_v54 = vsel %vm579_vm0, %v923_v50, 0.0  ;;  %v1014_v56 = vsel %vm579_vm0, %v953_v53, 0.0 }
 0x210   : > { %v3423_v33 = vpop.f32.mrb[8].mxu0  ;;  %v3432_v34 = vpop.f32.mrb[4].mxu1  ;;  %v993_v61 = vsel %vm579_vm0, %v918_v59, 0.0  ;;  %v1011_v1 = vsel %vm579_vm0, %v948_v58, 0.0 }
 0x211   : > { %v927_v35 = vpop.f32.mrb[9].mxu0  ;;  %v957_v36 = vpop.f32.mrb[5].mxu1  ;;  %v933_v60 = vadd.f32 %v3423_v33, %v4172_v21  ;;  %v963_v63 = vadd.f32 %v3432_v34, %v771_v62 }
 0x212   : > { %v928_v3 = vadd.f32 %v927_v35, %v736_v46  ;;  %v958_v5 = vadd.f32 %v957_v36, %v766_v4 }
 0x213   : > { %1274 = vrot.lane.b32.xlu1 %v943_v26, %s3851_s20  ;;  %v1002_v0 = vsel %vm579_vm0, %v933_v60, 0.0  ;;  %v1020_v2 = vsel %vm579_vm0, %v963_v63, 0.0 }
 0x214   : > { %v4178_v37 = vpop.f32.mrb[6].mxu1  ;;  %v999_v8 = vsel %vm579_vm0, %v928_v3, 0.0  ;;  %v1017_v10 = vsel %vm579_vm0, %v958_v5, 0.0 }
 0x215   : > { %v4180_v38 = vpop.f32.mrb[7].mxu1  ;;  %v973_v7 = vadd.f32 %v4178_v37, %v781_v6 }
 0x216   : > { %v968_v12 = vadd.f32 %v4180_v38, %v776_v11 }
 0x217   : > { %v1026_v9 = vsel %vm579_vm0, %v973_v7, 0.0 }
 0x218   : > { %v4182_v39 = vpop.f32.mrb[8].mxu1  ;;  %v1023_v20 = vsel %vm579_vm0, %v968_v12, 0.0 }
 0x219   : > { %v4184_v40 = vpop.f32.mrb[9].mxu1  ;;  %v983_v17 = vadd.f32 %v4182_v39, %v791_v14 }
 0x21a   : > { %v978_v28 = vadd.f32 %v4184_v40, %v786_v13 }
 0x21b   : > { %v1032_v19 = vsel %vm579_vm0, %v983_v17, 0.0 }
 0x21c   : > { %v1029_v43 = vsel %vm579_vm0, %v978_v28, 0.0 }
 0x22a   : > { %1009 = vadd.xlane.f32.xlu0 %v1008_v41 }
 0x237   : > { %991 = vadd.xlane.f32.xlu1 %v990_v45 }
 0x240   : > { %1120 = vrot.lane.b32.xlu0 %v938_v48, %s3850_s18 }
 0x244   : > { %1260 = vrot.lane.b32.xlu0 %v908_v49, %s3851_s20 }
 0x248   : > { %1272 = vrot.lane.b32.xlu0 %v938_v48, %s3851_s20  ;;  %1108 = vrot.lane.b32.xlu1 %v908_v49, %s3850_s18 }
 0x267   : > { %988 = vadd.xlane.f32.xlu0 %v987_v51 }
 0x26b   : > { %997 = vadd.xlane.f32.xlu0 %v996_v54 }
 0x26c   : > { %1006 = vadd.xlane.f32.xlu1 %v1005_v55 }
 0x26f   : > { %1015 = vadd.xlane.f32.xlu0 %v1014_v56 }
 0x27d   : > { %1114 = vrot.lane.b32.xlu1 %v923_v50, %s3850_s18  ;;  %v1111_v15 = vpop.permute.xlu0 %1110  ;;  %v1123_v21 = vpop.permute.xlu1 %1122 }
 0x27e   : > { %v1177_v42 = vsel %vm579_vm0, %v1123_v21, 0.0  ;;  %v1159_v48 = vsel %vm579_vm0, %v1111_v15, 0.0 }
 0x281   : > { %1126 = vrot.lane.b32.xlu1 %v953_v53, %s3850_s18  ;;  %v1263_v23 = vpop.permute.xlu1 %1262 }
 0x282   : > { %v1311_v47 = vsel %vm579_vm0, %v1263_v23, 0.0 }
 0x285   : > { %1266 = vrot.lane.b32.xlu1 %v923_v50, %s3851_s20  ;;  %1124 = vrot.lane.b32.xlu0 %v948_v58, %s3850_s18  ;;  %v1275_v25 = vpop.permute.xlu1 %1274 }
 0x286   : > { %v1329_v50 = vsel %vm579_vm0, %v1275_v25, 0.0 }
 0x289   : > { %1278 = vrot.lane.b32.xlu1 %v953_v53, %s3851_s20  ;;  %1264 = vrot.lane.b32.xlu0 %v918_v59, %s3851_s20 }
 0x28d   : > { %1112 = vrot.lane.b32.xlu1 %v918_v59, %s3850_s18  ;;  %1276 = vrot.lane.b32.xlu0 %v948_v58, %s3851_s20 }
 0x2ac   : > { %994 = vadd.xlane.f32.xlu0 %v993_v61 }
 0x2b0   : > { %1003 = vadd.xlane.f32.xlu0 %v1002_v0 }
 0x2b1   : > { %1012 = vadd.xlane.f32.xlu1 %v1011_v1 }
 0x2b4   : > { %1021 = vadd.xlane.f32.xlu0 %v1020_v2 }
 0x2b7   : > { %v4229_v18 = vpop.xlane.xlu0 %1009 }
 0x2bb   : > { %v1121_v22 = vpop.permute.xlu0 %1120 }
 0x2bc   : > { %v1174_v51 = vsel %vm579_vm0, %v1121_v22, 0.0 }
 0x2bf   : > { %v1261_v24 = vpop.permute.xlu0 %1260 }
 0x2c0   : > { %v1308_v55 = vsel %vm579_vm0, %v1261_v24, 0.0 }
 0x2c2   : > { %1118 = vrot.lane.b32.xlu1 %v933_v60, %s3850_s18 }
 0x2c3   : > { %v1273_v26 = vpop.permute.xlu0 %1272 }
 0x2c4   : > { %v4234_v27 = vpop.xlane.xlu1 %991  ;;  %v1326_v58 = vsel %vm579_vm0, %v1273_v26, 0.0 }
 0x2c6   : > { %1130 = vrot.lane.b32.xlu1 %v963_v63, %s3850_s18 }
 0x2c8   : > { %v1109_v30 = vpop.permute.xlu1 %1108 }
 0x2c9   : > { %v1156_v53 = vsel %vm579_vm0, %v1109_v30, 0.0 }
 0x2ca   : > { %1270 = vrot.lane.b32.xlu1 %v933_v60, %s3851_s20  ;;  %1116 = vrot.lane.b32.xlu0 %v928_v3, %s3850_s18 }
 0x2ce   : > { %1282 = vrot.lane.b32.xlu1 %v963_v63, %s3851_s20  ;;  %1128 = vrot.lane.b32.xlu0 %v958_v5, %s3850_s18 }
 0x2d2   : > { %1268 = vrot.lane.b32.xlu0 %v928_v3, %s3851_s20 }
 0x2d6   : > { %1280 = vrot.lane.b32.xlu0 %v958_v5, %s3851_s20 }
 0x2f2   : > { %1000 = vadd.xlane.f32.xlu1 %v999_v8 }
 0x2f4   : > { %v4237_v29 = vpop.xlane.xlu0 %988 }
 0x2f5   : > { %1027 = vadd.xlane.f32.xlu0 %v1026_v9 }
 0x2f6   : > { %1018 = vadd.xlane.f32.xlu1 %v1017_v10 }
 0x2f8   : > { %v4241_v31 = vpop.xlane.xlu0 %997 }
 0x2f9   : > { %v4244_v32 = vpop.xlane.xlu1 %1006 }
 0x2fc   : > { %v4246_v33 = vpop.xlane.xlu0 %1015 }
 0x2fd   : > { %v1115_v34 = vpop.permute.xlu1 %1114 }
 0x2fe   : > { %v1165_v57 = vsel %vm579_vm0, %v1115_v34, 0.0 }
 0x300   : > { %v1125_v35 = vpop.permute.xlu0 %1124 }
 0x301   : > { %v1127_v36 = vpop.permute.xlu1 %1126  ;;  %v1180_v61 = vsel %vm579_vm0, %v1125_v35, 0.0 }
 0x302   : > { %v1183_v60 = vsel %vm579_vm0, %v1127_v36, 0.0 }
 0x304   : > { %v1265_v37 = vpop.permute.xlu0 %1264 }
 0x305   : > { %v1267_v38 = vpop.permute.xlu1 %1266  ;;  %v1314_v1 = vsel %vm579_vm0, %v1265_v37, 0.0 }
 0x306   : > { %v1317_v63 = vsel %vm579_vm0, %v1267_v38, 0.0 }
 0x307   : > { %1134 = vrot.lane.b32.xlu1 %v973_v7, %s3850_s18 }
 0x308   : > { %v1277_v39 = vpop.permute.xlu0 %1276 }
 0x309   : > { %v1279_v40 = vpop.permute.xlu1 %1278  ;;  %v1332_v4 = vsel %vm579_vm0, %v1277_v39, 0.0 }
 0x30a   : > { %v1335_v3 = vsel %vm579_vm0, %v1279_v40, 0.0 }
 0x30b   : > { %1286 = vrot.lane.b32.xlu1 %v973_v7, %s3851_s20  ;;  %1132 = vrot.lane.b32.xlu0 %v968_v12, %s3850_s18 }
 0x30d   : > { %v1113_v45 = vpop.permute.xlu1 %1112 }
 0x30e   : > { %v1162_v6 = vsel %vm579_vm0, %v1113_v45, 0.0 }
 0x30f   : > { %1284 = vrot.lane.b32.xlu0 %v968_v12, %s3851_s20 }
 0x32e   : > { %1033 = vadd.xlane.f32.xlu0 %v1032_v19 }
 0x32f   : > { %1024 = vadd.xlane.f32.xlu1 %v1023_v20 }
 0x339   : > { %v4248_v41 = vpop.xlane.xlu0 %994 }
 0x33d   : > { %v4252_v46 = vpop.xlane.xlu0 %1003 }
 0x33e   : > { %v4256_v49 = vpop.xlane.xlu1 %1012 }
 0x340   : > { %1138 = vrot.lane.b32.xlu1 %v983_v17, %s3850_s18 }
 0x341   : > { %v4260_v52 = vpop.xlane.xlu0 %1021 }
 0x342   : > { %v1119_v54 = vpop.permute.xlu1 %1118 }
 0x343   : > { %v1171_v10 = vsel %vm579_vm0, %v1119_v54, 0.0 }
 0x344   : > { %1290 = vrot.lane.b32.xlu1 %v983_v17, %s3851_s20  ;;  %1136 = vrot.lane.b32.xlu0 %v978_v28, %s3850_s18 }
 0x345   : > { %v1117_v56 = vpop.permute.xlu0 %1116 }
 0x346   : > { %v1131_v59 = vpop.permute.xlu1 %1130  ;;  %v1168_v7 = vsel %vm579_vm0, %v1117_v56, 0.0 }
 0x347   : > { %v1189_v13 = vsel %vm579_vm0, %v1131_v59, 0.0 }
 0x348   : > { %1288 = vrot.lane.b32.xlu0 %v978_v28, %s3851_s20 }
 0x349   : > { %v1129_v62 = vpop.permute.xlu0 %1128 }
 0x34a   : > { %v1271_v0 = vpop.permute.xlu1 %1270  ;;  %v1186_v11 = vsel %vm579_vm0, %v1129_v62, 0.0 }
 0x34b   : > { %v1323_v19 = vsel %vm579_vm0, %v1271_v0, 0.0 }
 0x34d   : > { %v1269_v2 = vpop.permute.xlu0 %1268 }
 0x34e   : > { %v1283_v5 = vpop.permute.xlu1 %1282  ;;  %v1320_v15 = vsel %vm579_vm0, %v1269_v2, 0.0 }
 0x34f   : > { %v1341_v22 = vsel %vm579_vm0, %v1283_v5, 0.0 }
 0x351   : > { %v1281_v8 = vpop.permute.xlu0 %1280 }
 0x352   : > { %v1338_v20 = vsel %vm579_vm0, %v1281_v8, 0.0 }
 0x367   : > { %1178 = vadd.xlane.f32.xlu0 %v1177_v42 }
 0x368   : > { %1030 = vadd.xlane.f32.xlu1 %v1029_v43 }
 0x36b   : > { %1312 = vadd.xlane.f32.xlu0 %v1311_v47  ;;  %v3853_v47 = vmov -inf  }
 0x36c   : > { %1160 = vadd.xlane.f32.xlu1 %v1159_v48  ;;  %1476 = vst [vmem:[#allocation3] sm:$0x1] %v3853_v47  ;;  %v1055_v48 = vlaneseq }
 0x36f   : > { %1330 = vadd.xlane.f32.xlu0 %v1329_v50  ;;  %v986_v50 = vld [vmem:[%s525_s30] sm:$0x1] }
 0x370   : > { %1175 = vadd.xlane.f32.xlu1 %v1174_v51  ;;  %vm1220_vm1 = vcmp.eq.s32.totalorder %v986_v50, 1  ;;  %vm1052_vm2 = vcmp.eq.s32.totalorder %v986_v50, 0  ;;  %vm1372_vm3 = vcmp.eq.s32.totalorder %v986_v50, 2 }
 0x371   : > { %v1053_v59 = vsel %vm1052_vm2, 1.0, %v3852_v44 }
 0x373   : > { %1157 = vadd.xlane.f32.xlu0 %v1156_v53  ;;  %v1056_v53 = vshrl.u32 %v1055_v48, 7 }
 0x374   : > { %1309 = vadd.xlane.f32.xlu1 %v1308_v55  ;;  %v1221_v55 = vsel %vm1220_vm1, 1.0, %v3852_v44 }
 0x377   : > { %1166 = vadd.xlane.f32.xlu0 %v1165_v57  ;;  %v1057_v57 = vsub.s32 0, %v1056_v53 }
 0x378   : > { %1327 = vadd.xlane.f32.xlu1 %v1326_v58 }
 0x379   : > { %v4309_v62 = vrot.slane %v1221_v55, %v1057_v57 }
 0x37b   : > { %1184 = vadd.xlane.f32.xlu0 %v1183_v60 }
 0x37c   : > { %1181 = vadd.xlane.f32.xlu1 %v1180_v61  ;;  %v1037_v61 = vmul.f32 0.03125, %v4234_v27  ;;  %v1043_v27 = vmul.f32 0.03125, %v4229_v18 }
 0x37f   : > { %1318 = vadd.xlane.f32.xlu0 %v1317_v63  ;;  %v4274_v9 = vpop.xlane.xlu1 %1000  ;;  %v1373_v63 = vsel %vm1372_vm3, 1.0, %v3852_v44 }
 0x380   : > { %1315 = vadd.xlane.f32.xlu1 %v1314_v1  ;;  %v4312_v1 = vrot.slane %v1053_v59, %v1057_v57 }
 0x382   : > { %v4278_v12 = vpop.xlane.xlu0 %1027  ;;  %v1061_v5 = vmul.f32 %v4312_v1, %v1037_v61  ;;  %v1067_v18 = vmul.f32 %v4312_v1, %v1043_v27 }
 0x383   : > { %1336 = vadd.xlane.f32.xlu0 %v1335_v3  ;;  %v4281_v14 = vpop.xlane.xlu1 %1018 }
 0x384   : > { %1333 = vadd.xlane.f32.xlu1 %v1332_v4 }
 0x386   : > { %v1133_v17 = vpop.permute.xlu0 %1132 }
 0x387   : > { %1163 = vadd.xlane.f32.xlu0 %v1162_v6  ;;  %v1135_v21 = vpop.permute.xlu1 %1134  ;;  %v1192_v23 = vsel %vm579_vm0, %v1133_v17, 0.0  ;;  %v1036_v6 = vmul.f32 0.03125, %v4237_v29 }
 0x388   : > { %1169 = vadd.xlane.f32.xlu1 %v1168_v7  ;;  %v1195_v25 = vsel %vm579_vm0, %v1135_v21, 0.0  ;;  %v4317_v7 = vrot.slane %v1373_v63, %v1057_v57  ;;  %v3287_v21 = vld [vmem:[%s4017_s28] sm:$0xff]  }
 0x389   : > { %v1060_v29 = vmul.f32 %v4312_v1, %v1036_v6 }
 0x38a   : > { %v1285_v24 = vpop.permute.xlu0 %1284 }
 0x38b   : > { %1172 = vadd.xlane.f32.xlu0 %v1171_v10  ;;  %v1287_v26 = vpop.permute.xlu1 %1286  ;;  %v1344_v28 = vsel %vm579_vm0, %v1285_v24, 0.0 }
 0x38c   : > { %1187 = vadd.xlane.f32.xlu1 %v1186_v11  ;;  %v1347_v30 = vsel %vm579_vm0, %v1287_v26, 0.0 }
 0x38f   : > { %1190 = vadd.xlane.f32.xlu0 %v1189_v13 }
 0x390   : > { %1321 = vadd.xlane.f32.xlu1 %v1320_v15 }
 0x393   : > { %1324 = vadd.xlane.f32.xlu0 %v1323_v19  ;;  %v1042_v19 = vmul.f32 0.03125, %v4244_v32 }
 0x394   : > { %1339 = vadd.xlane.f32.xlu1 %v1338_v20 }
 0x397   : > { %1342 = vadd.xlane.f32.xlu0 %v1341_v22 }
 0x398   : > { %1193 = vadd.xlane.f32.xlu1 %v1192_v23 }
 0x39b   : > { %1196 = vadd.xlane.f32.xlu0 %v1195_v25  ;;  %v3320_v25 = vld [vmem:[%s4017_s28 + $0x18] sm:$0xff]  }
 0x39c   : > { %1345 = vadd.xlane.f32.xlu1 %v1344_v28  ;;  %v3301_v47 = vunpack.c.h.bf16 %v3320_v25  ;;  %v3300_v53 = vunpack.c.l.bf16 %v3320_v25 }
 0x39f   : > { %1348 = vadd.xlane.f32.xlu0 %v1347_v30 }
 0x3bb   : > { %v4291_v34 = vpop.xlane.xlu0 %1033 }
 0x3bc   : > { %v4293_v35 = vpop.xlane.xlu1 %1024 }
 0x3bf   : > { %v1137_v36 = vpop.permute.xlu0 %1136 }
 0x3c0   : > { %v1139_v37 = vpop.permute.xlu1 %1138  ;;  %v1198_v38 = vsel %vm579_vm0, %v1137_v36, 0.0  ;;  %v3289_v36 = vunpack.c.h.bf16 %v3287_v21 }
 0x3c1   : > { %v1201_v39 = vsel %vm579_vm0, %v1139_v37, 0.0  ;;  %1199 = vadd.xlane.f32.xlu1 %v1198_v38 }
 0x3c2   : > { %1202 = vadd.xlane.f32.xlu0 %v1201_v39  ;;  %v3288_v39 = vunpack.c.l.bf16 %v3287_v21 }
 0x3c3   : > { %v1289_v40 = vpop.permute.xlu0 %1288 }
 0x3c4   : > { %v1291_v42 = vpop.permute.xlu1 %1290  ;;  %v1350_v43 = vsel %vm579_vm0, %v1289_v40, 0.0 }
 0x3c5   : > { %v1353_v45 = vsel %vm579_vm0, %v1291_v42, 0.0  ;;  %1351 = vadd.xlane.f32.xlu1 %v1350_v43  ;;  %v1066_v42 = vmul.f32 %v4312_v1, %v1042_v19 }
 0x3c6   : > { %1354 = vadd.xlane.f32.xlu0 %v1353_v45 }
 0x3f4   : > { %v1179_v51 = vpop.xlane.xlu0 %1178 }
 0x3f5   : > { %v4304_v54 = vpop.xlane.xlu1 %1030  ;;  %v1211_v4 = vmul.f32 0.03125, %v1179_v51 }
 0x3f7   : > { %v1235_v20 = vmul.f32 %v4309_v62, %v1211_v4 }
 0x3f8   : > { %v1313_v56 = vpop.xlane.xlu0 %1312 }
 0x3f9   : > { %v1161_v58 = vpop.xlane.xlu1 %1160  ;;  %v1357_v8 = vmul.f32 0.03125, %v1313_v56  ;;  %v1251_v43 = vadd.f32 %v1235_v20, %v1067_v18 }
 0x3fa   : > { %v1205_v60 = vmul.f32 0.03125, %v1161_v58 }
 0x3fb   : > { %v1381_v23 = vmul.f32 %v4317_v7, %v1357_v8  ;;  %v1044_v8 = vmul.f32 0.03125, %v4256_v49 }
 0x3fc   : > { %v1331_v0 = vpop.xlane.xlu0 %1330  ;;  %v1229_v2 = vmul.f32 %v4309_v62, %v1205_v60 }
 0x3fd   : > { %v1176_v3 = vpop.xlane.xlu1 %1175  ;;  %v1363_v10 = vmul.f32 0.03125, %v1331_v0  ;;  %v1068_v49 = vmul.f32 %v4312_v1, %v1044_v8 }
 0x3fe   : > { %v1210_v44 = vmul.f32 0.03125, %v1176_v3  ;;  %v1245_v13 = vadd.f32 %v1229_v2, %v1061_v5  ;;  %v1045_v5 = vmul.f32 0.03125, %v4246_v33 }
 0x3ff   : > { %v1387_v26 = vmul.f32 %v4317_v7, %v1363_v10 }
 0x400   : > { %v1158_v11 = vpop.xlane.xlu0 %1157  ;;  %v1234_v28 = vmul.f32 %v4309_v62, %v1210_v44  ;;  %v1397_v37 = vadd.f32 %v1381_v23, %v1245_v13  ;;  %v1069_v19 = vmul.f32 %v4312_v1, %v1045_v5 }
 0x401   : > { %v1204_v15 = vmul.f32 0.03125, %v1158_v11  ;;  %v1310_v17 = vpop.xlane.xlu1 %1309  ;;  %v1403_v50 = vadd.f32 %v1387_v26, %v1251_v43  ;;  %v1039_v11 = vmul.f32 0.03125, %v4241_v31 }
 0x402   : > { %v1356_v22 = vmul.f32 0.03125, %v1310_v17  ;;  %v1250_v51 = vadd.f32 %v1234_v28, %v1066_v42  ;;  %v1445_v57 = vadd.f32 %v3289_v36, %v1397_v37  ;;  %v3318_v36 = vld [vmem:[%s4017_s28 + $0x8] sm:$0xff]  }
 0x403   : > { %v1228_v24 = vmul.f32 %v4309_v62, %v1204_v15  ;;  %v1451_v0 = vadd.f32 %v3301_v47, %v1403_v50  ;;  %v3321_v15 = vld [vmem:[%s4017_s28 + $0x20] sm:$0xff]   ;;  %v1063_v25 = vmul.f32 %v4312_v1, %v1039_v11  ;;  %v3293_v50 = vunpack.c.h.bf16 %v3318_v36 }
 0x404   : > { %v1380_v30 = vmul.f32 %v4317_v7, %v1356_v22  ;;  %v1167_v32 = vpop.xlane.xlu0 %1166  ;;  %v1038_v22 = vmul.f32 0.03125, %v4248_v41  ;;  %v3305_v31 = vunpack.c.h.bf16 %v3321_v15  ;;  %v3304_v28 = vunpack.c.l.bf16 %v3321_v15 }
 0x405   : > { %v1244_v38 = vadd.f32 %v1228_v24, %v1060_v29  ;;  %v1328_v40 = vpop.xlane.xlu1 %1327  ;;  %v1207_v10 = vmul.f32 0.03125, %v1167_v32 }
 0x406   : > { %v1362_v45 = vmul.f32 0.03125, %v1328_v40  ;;  %v1062_v43 = vmul.f32 %v4312_v1, %v1038_v22 }
 0x407   : > { %v1396_v48 = vadd.f32 %v1380_v30, %v1244_v38  ;;  %v1231_v23 = vmul.f32 %v4309_v62, %v1207_v10 }
 0x408   : > { %v1386_v55 = vmul.f32 %v4317_v7, %v1362_v45  ;;  %v1185_v56 = vpop.xlane.xlu0 %1184 }
 0x409   : > { %v1444_v58 = vadd.f32 %v3288_v39, %v1396_v48  ;;  %v1182_v59 = vpop.xlane.xlu1 %1181  ;;  %v1213_v63 = vmul.f32 0.03125, %v1185_v56  ;;  %v1247_v45 = vadd.f32 %v1231_v23, %v1063_v25 }
 0x40a   : > { %v1402_v60 = vadd.f32 %v1386_v55, %v1250_v51  ;;  %v1212_v3 = vmul.f32 0.03125, %v1182_v59 }
 0x40b   : > { %v1460_v61 = vpack.c.bf16 %v1445_v57, %v1444_v58  ;;  %v1237_v44 = vmul.f32 %v4309_v62, %v1213_v63  ;;  %v1040_v63 = vmul.f32 0.03125, %v4274_v9 }
 0x40c   : > { %v1450_v2 = vadd.f32 %v3300_v53, %v1402_v60  ;;  %v1319_v4 = vpop.xlane.xlu0 %1318  ;;  %v1236_v13 = vmul.f32 %v4309_v62, %v1212_v3  ;;  %v3292_v53 = vunpack.c.l.bf16 %v3318_v36  ;;  %v1041_v3 = vmul.f32 0.03125, %v4252_v46 }
 0x40d   : > { %1468 = vst [vmem:[#allocation2] sm:$0xff] %v1460_v61  ;;  %v1316_v6 = vpop.xlane.xlu1 %1315  ;;  %v1359_v20 = vmul.f32 0.03125, %v1319_v4  ;;  %v1253_v24 = vadd.f32 %v1237_v44, %v1069_v19  ;;  %v1046_v44 = vmul.f32 0.03125, %v4281_v14  ;;  %v1064_v15 = vmul.f32 %v4312_v1, %v1040_v63  ;;  %v3319_v19 = vld [vmem:[%s4017_s28 + $0x10] sm:$0xff]  }
 0x40e   : > { %v1463_v27 = vpack.c.bf16 %v1451_v0, %v1450_v2  ;;  %v1252_v26 = vadd.f32 %v1236_v13, %v1068_v49  ;;  %v1358_v41 = vmul.f32 0.03125, %v1316_v6  ;;  %v1047_v46 = vmul.f32 0.03125, %v4260_v52 }
 0x40f   : > { %v1383_v37 = vmul.f32 %v4317_v7, %v1359_v20  ;;  %v1070_v23 = vmul.f32 %v4312_v1, %v1046_v44 }
 0x410   : > { %1471 = vst [vmem:[#allocation2 + $0x18] sm:$0xff] %v1463_v27  ;;  %v1337_v17 = vpop.xlane.xlu0 %1336  ;;  %v1382_v57 = vmul.f32 %v4317_v7, %v1358_v41 }
 0x411   : > { %v1365_v33 = vmul.f32 0.03125, %v1337_v17  ;;  %v1334_v21 = vpop.xlane.xlu1 %1333  ;;  %v1399_v56 = vadd.f32 %v1383_v37, %v1247_v45 }
 0x412   : > { %v1364_v29 = vmul.f32 0.03125, %v1334_v21  ;;  %v1065_v21 = vmul.f32 %v4312_v1, %v1041_v3 }
 0x413   : > { %v1389_v18 = vmul.f32 %v4317_v7, %v1365_v33  ;;  %v1447_v5 = vadd.f32 %v3293_v50, %v1399_v56  ;;  %v1049_v56 = vmul.f32 0.03125, %v4278_v12 }
 0x414   : > { %v1388_v30 = vmul.f32 %v4317_v7, %v1364_v29  ;;  %v1164_v32 = vpop.xlane.xlu0 %1163 }
 0x415   : > { %v1405_v38 = vadd.f32 %v1389_v18, %v1253_v24  ;;  %v1206_v39 = vmul.f32 0.03125, %v1164_v32  ;;  %v1170_v40 = vpop.xlane.xlu1 %1169  ;;  %v3322_v18 = vld [vmem:[%s4017_s28 + $0x28] sm:$0xff]   ;;  %v1071_v32 = vmul.f32 %v4312_v1, %v1047_v46  ;;  %v1073_v12 = vmul.f32 %v4312_v1, %v1049_v56 }
 0x416   : > { %v1404_v42 = vadd.f32 %v1388_v30, %v1252_v26  ;;  %v1208_v59 = vmul.f32 0.03125, %v1170_v40 }
 0x417   : > { %v1453_v47 = vadd.f32 %v3305_v31, %v1405_v38  ;;  %v1230_v48 = vmul.f32 %v4309_v62, %v1206_v39  ;;  %v3296_v31 = vunpack.c.l.bf16 %v3319_v19  ;;  %v3308_v39 = vunpack.c.l.bf16 %v3322_v18 }
 0x418   : > { %v1452_v51 = vadd.f32 %v3304_v28, %v1404_v42  ;;  %v1173_v55 = vpop.xlane.xlu0 %1172  ;;  %v1232_v8 = vmul.f32 %v4309_v62, %v1208_v59  ;;  %v3297_v28 = vunpack.c.h.bf16 %v3319_v19 }
 0x419   : > { %v1246_v58 = vadd.f32 %v1230_v48, %v1062_v43  ;;  %v1188_v60 = vpop.xlane.xlu1 %1187  ;;  %v1209_v2 = vmul.f32 0.03125, %v1173_v55  ;;  %v1048_v43 = vmul.f32 0.03125, %v4293_v35 }
 0x41a   : > { %v1464_v61 = vpack.c.bf16 %v1453_v47, %v1452_v51  ;;  %v1214_v27 = vmul.f32 0.03125, %v1188_v60  ;;  %v1248_v22 = vadd.f32 %v1232_v8, %v1064_v15  ;;  %v3309_v47 = vunpack.c.h.bf16 %v3322_v18  ;;  %v3324_v18 = vld [vmem:[%s4017_s28 + $0x38] sm:$0xff]  }
 0x41b   : > { %v1398_v0 = vadd.f32 %v1382_v57, %v1246_v58  ;;  %v1233_v17 = vmul.f32 %v4309_v62, %v1209_v2  ;;  %v1072_v35 = vmul.f32 %v4312_v1, %v1048_v43 }
 0x41c   : > { %1472 = vst [vmem:[#allocation2 + $0x20] sm:$0xff] %v1464_v61  ;;  %v1191_v4 = vpop.xlane.xlu0 %1190  ;;  %v1238_v14 = vmul.f32 %v4309_v62, %v1214_v27 }
 0x41d   : > { %v1446_v6 = vadd.f32 %v3292_v53, %v1398_v0  ;;  %v1322_v10 = vpop.xlane.xlu1 %1321  ;;  %v1215_v11 = vmul.f32 0.03125, %v1191_v4  ;;  %v1249_v26 = vadd.f32 %v1233_v17, %v1065_v21 }
 0x41e   : > { %v1360_v13 = vmul.f32 0.03125, %v1322_v10  ;;  %v1254_v41 = vadd.f32 %v1238_v14, %v1070_v23 }
 0x41f   : > { %v1461_v9 = vpack.c.bf16 %v1447_v5, %v1446_v6  ;;  %v1239_v24 = vmul.f32 %v4309_v62, %v1215_v11  ;;  %v3323_v5 = vld [vmem:[%s4017_s28 + $0x30] sm:$0xff]  }
 0x420   : > { %v1384_v20 = vmul.f32 %v4317_v7, %v1360_v13  ;;  %v1325_v33 = vpop.xlane.xlu0 %1324  ;;  %v3312_v11 = vunpack.c.l.bf16 %v3323_v5 }
 0x421   : > { %1469 = vst [vmem:[#allocation2 + $0x8] sm:$0xff] %v1461_v9  ;;  %v1361_v49 = vmul.f32 0.03125, %v1325_v33  ;;  %v1340_v29 = vpop.xlane.xlu1 %1339  ;;  %v1255_v45 = vadd.f32 %v1239_v24, %v1071_v32  ;;  %v3313_v9 = vunpack.c.h.bf16 %v3323_v5 }
 0x422   : > { %v1366_v25 = vmul.f32 0.03125, %v1340_v29  ;;  %v1400_v52 = vadd.f32 %v1384_v20, %v1248_v22  ;;  %v1050_v22 = vmul.f32 0.03125, %v4304_v54  ;;  %v1051_v29 = vmul.f32 0.03125, %v4291_v34 }
 0x423   : > { %v1385_v30 = vmul.f32 %v4317_v7, %v1361_v49  ;;  %v3316_v54 = vunpack.c.l.bf16 %v3324_v18  ;;  %v3317_v34 = vunpack.c.h.bf16 %v3324_v18 }
 0x424   : > { %v1390_v36 = vmul.f32 %v4317_v7, %v1366_v25  ;;  %v1343_v37 = vpop.xlane.xlu0 %1342  ;;  %v1448_v50 = vadd.f32 %v3296_v31, %v1400_v52 }
 0x425   : > { %v1401_v38 = vadd.f32 %v1385_v30, %v1249_v26  ;;  %v1367_v40 = vmul.f32 0.03125, %v1343_v37  ;;  %v1194_v42 = vpop.xlane.xlu1 %1193  ;;  %v1074_v26 = vmul.f32 %v4312_v1, %v1050_v22  ;;  %v1075_v30 = vmul.f32 %v4312_v1, %v1051_v29 }
 0x426   : > { %v1216_v48 = vmul.f32 0.03125, %v1194_v42  ;;  %v1406_v53 = vadd.f32 %v1390_v36, %v1254_v41 }
 0x427   : > { %v1449_v51 = vadd.f32 %v3297_v28, %v1401_v38  ;;  %v1391_v55 = vmul.f32 %v4317_v7, %v1367_v40 }
 0x428   : > { %v1197_v57 = vpop.xlane.xlu0 %1196  ;;  %v1240_v60 = vmul.f32 %v4309_v62, %v1216_v48  ;;  %v1454_v2 = vadd.f32 %v3308_v39, %v1406_v53 }
 0x429   : > { %v1462_v58 = vpack.c.bf16 %v1449_v51, %v1448_v50  ;;  %v1407_v59 = vadd.f32 %v1391_v55, %v1255_v45  ;;  %v1217_v61 = vmul.f32 0.03125, %v1197_v57  ;;  %v1346_v63 = vpop.xlane.xlu1 %1345 }
 0x42a   : > { %v1368_v0 = vmul.f32 0.03125, %v1346_v63  ;;  %v1256_v10 = vadd.f32 %v1240_v60, %v1072_v35 }
 0x42b   : > { %1470 = vst [vmem:[#allocation2 + $0x10] sm:$0xff] %v1462_v58  ;;  %v1455_v3 = vadd.f32 %v3309_v47, %v1407_v59  ;;  %v1241_v4 = vmul.f32 %v4309_v62, %v1217_v61 }
 0x42c   : > { %v1392_v6 = vmul.f32 %v4317_v7, %v1368_v0  ;;  %v1349_v8 = vpop.xlane.xlu0 %1348 }
 0x42d   : > { %v1465_v27 = vpack.c.bf16 %v1455_v3, %v1454_v2  ;;  %v1369_v44 = vmul.f32 0.03125, %v1349_v8  ;;  %v1257_v13 = vadd.f32 %v1241_v4, %v1073_v12 }
 0x42e   : > { %v1408_v15 = vadd.f32 %v1392_v6, %v1256_v10 }
 0x42f   : > { %1473 = vst [vmem:[#allocation2 + $0x28] sm:$0xff] %v1465_v27  ;;  %v1393_v17 = vmul.f32 %v4317_v7, %v1369_v44 }
 0x430   : > { %v1456_v46 = vadd.f32 %v3312_v11, %v1408_v15 }
 0x431   : > { %v1409_v19 = vadd.f32 %v1393_v17, %v1257_v13 }
 0x433   : > { %v1457_v20 = vadd.f32 %v3313_v9, %v1409_v19 }
 0x435   : > { %v1466_v33 = vpack.c.bf16 %v1457_v20, %v1456_v46 }
 0x437   : > { %1474 = vst [vmem:[#allocation2 + $0x30] sm:$0xff] %v1466_v33 }
 0x44e   : > { %v1200_v21 = vpop.xlane.xlu1 %1199 }
 0x44f   : > { %v1218_v14 = vmul.f32 0.03125, %v1200_v21  ;;  %v1203_v49 = vpop.xlane.xlu0 %1202 }
 0x450   : > { %v1219_v23 = vmul.f32 0.03125, %v1203_v49 }
 0x451   : > { %v1242_v24 = vmul.f32 %v4309_v62, %v1218_v14 }
 0x452   : > { %v1243_v31 = vmul.f32 %v4309_v62, %v1219_v23  ;;  %v1352_v25 = vpop.xlane.xlu1 %1351 }
 0x453   : > { %v1370_v52 = vmul.f32 0.03125, %v1352_v25  ;;  %v1355_v28 = vpop.xlane.xlu0 %1354  ;;  %v1258_v36 = vadd.f32 %v1242_v24, %v1074_v26 }
 0x454   : > { %v1371_v32 = vmul.f32 0.03125, %v1355_v28  ;;  %v1259_v41 = vadd.f32 %v1243_v31, %v1075_v30 }
 0x455   : > { %v1394_v37 = vmul.f32 %v4317_v7, %v1370_v52 }
 0x456   : > { %v1395_v38 = vmul.f32 %v4317_v7, %v1371_v32 }
 0x457   : > { %v1410_v39 = vadd.f32 %v1394_v37, %v1258_v36 }
 0x458   : > { %v1411_v40 = vadd.f32 %v1395_v38, %v1259_v41 }
 0x459   : > { %v1458_v62 = vadd.f32 %v3316_v54, %v1410_v39 }
 0x45a   : > { %v1459_v42 = vadd.f32 %v3317_v34, %v1411_v40 }
 0x45c   : > { %v1467_v43 = vpack.c.bf16 %v1459_v42, %v1458_v62 }
 0x45e   : > { %1475 = vst [vmem:[#allocation2 + $0x38] sm:$0xff] %v1467_v43 }
 0x45f PF: > { %v1543_v45 = vld [vmem:[#allocation2] sm:$0xff]  ;;  %v1553_v1 = vld [vmem:[%s4011_s17 + $0x10] sm:$0xff]  ;;  %v3854_v48 = vmov 0   ;;  %v1544_v7 = vld [vmem:[#allocation2 + $0x8] sm:$0xff]  ;;  %p3283_p13 = scmp.ne.s32.totalorder %s3831_s15, 1 }
 0x460   : > { %v1551_v47 = vld [vmem:[%s4011_s17] sm:$0xff]  ;;  %3628 = vset.pattern.permute.xlu1 %v3854_v48  ;;  %3627 = vset.pattern.permute.xlu0 %v3854_v48  ;;  %v1554_v50 = vld [vmem:[%s4011_s17 + $0x18] sm:$0xff]  ;;  %v1552_v51 = vld [vmem:[%s4011_s17 + $0x8] sm:$0xff] }
 0x461   : > { %3439 = vmatprep.subr.bf16.mxu0 %v1543_v45  ;;  %3539 = vmatprep.subr.bf16.mxu1 %v1543_v45  ;;  %v1545_v53 = vld [vmem:[#allocation2 + $0x10] sm:$0xff]  ;;  %v1556_v55 = vld [vmem:[%s4011_s17 + $0x28] sm:$0xff]  ;;  %v1555_v56 = vld [vmem:[%s4011_s17 + $0x20] sm:$0xff] }
 0x462   : > { %1627 = vperm.xlu1 %3628, %v1553_v1   ;;  %1617 = vperm.xlu0 %3627, %v1551_v47   ;;  %v3629_v57 = vld [vmem:[%s4006_s21] sm:$0xff]   ;;  %v1546_v58 = vld [vmem:[#allocation2 + $0x18] sm:$0xff]  ;;  %v1557_v61 = vld [vmem:[%s4011_s17 + $0x30] sm:$0xff] }
 0x463   : > { %3440 = vmatpush3.bf16.msra.mxu0 %v1543_v45  ;;  %3547 = vmatpush3.bf16.msra.mxu1 %v1543_v45  ;;  %v3630_v59 = vld [vmem:[%s4006_s21 + $0x80] sm:$0xff]   ;;  %v1558_v60 = vld [vmem:[%s4011_s17 + $0x38] sm:$0xff]  ;;  %v1560_v0 = vld [vmem:[%s4011_s17 + $0x48] sm:$0xff] }
 0x464   : > { %3441 = vmatprep.subr.bf16.mxu0 %v1544_v7  ;;  %3540 = vmatprep.subr.bf16.mxu1 %v1544_v7  ;;  %v1547_v63 = vld [vmem:[#allocation2 + $0x20] sm:$0xff]  ;;  %v1548_v2 = vld [vmem:[#allocation2 + $0x28] sm:$0xff]  ;;  %v1562_v3 = vld [vmem:[%s4011_s17 + $0x58] sm:$0xff] }
 0x465   : > { %3455 = vmatprep.mubr.bf16.mxu0 %v3629_v57  ;;  %3487 = vmatprep.mubr.bf16.mxu1 %v3630_v59  ;;  %v1559_v35 = vld [vmem:[%s4011_s17 + $0x40] sm:$0xff]  ;;  %v1561_v4 = vld [vmem:[%s4011_s17 + $0x50] sm:$0xff]  ;;  %v1564_v6 = vld [vmem:[%s4011_s17 + $0x68] sm:$0xff] }
 0x466   : > { %1632 = vperm.xlu1 %3628, %v1554_v50   ;;  %1622 = vperm.xlu0 %3627, %v1552_v51   ;;  %v1549_v5 = vld [vmem:[#allocation2 + $0x30] sm:$0xff]  ;;  %v1563_v8 = vld [vmem:[%s4011_s17 + $0x60] sm:$0xff]  ;;  %v1550_v12 = vld [vmem:[#allocation2 + $0x38] sm:$0xff] }
 0x467   : > { %3442 = vmatpush3.bf16.msra.mxu0 %v1544_v7  ;;  %3548 = vmatpush3.bf16.msra.mxu1 %v1544_v7  ;;  %v1566_v27 = vld [vmem:[%s4011_s17 + $0x78] sm:$0xff]  ;;  %v1565_v10 = vld [vmem:[%s4011_s17 + $0x70] sm:$0xff]  ;;  %v3631_v44 = vld [vmem:[%s4006_s21 + $0x8] sm:$0xff]  }
 0x468   : > { %3443 = vmatprep.subr.bf16.mxu0 %v1545_v53  ;;  %3541 = vmatprep.subr.bf16.mxu1 %v1545_v53  ;;  %v3632_v11 = vld [vmem:[%s4006_s21 + $0x88] sm:$0xff]   ;;  %v1567_v15 = vld [vmem:[%s4011_s17 + $0x80] sm:$0xff]  ;;  %v3633_v9 = vld [vmem:[%s4006_s21 + $0x10] sm:$0xff]  }
 0x469   : > { %v1568_v13 = vld [vmem:[%s4011_s17 + $0x88] sm:$0xff]  ;;  %v3634_v17 = vld [vmem:[%s4006_s21 + $0x90] sm:$0xff]   ;;  %v1570_v19 = vld [vmem:[%s4011_s17 + $0x98] sm:$0xff] }
 0x46a   : > { %1642 = vperm.xlu1 %3628, %v1556_v55   ;;  %1637 = vperm.xlu0 %3627, %v1555_v56   ;;  %v1569_v46 = vld [vmem:[%s4011_s17 + $0x90] sm:$0xff]  ;;  %v3635_v20 = vld [vmem:[%s4006_s21 + $0x18] sm:$0xff]   ;;  %v1572_v21 = vld [vmem:[%s4011_s17 + $0xa8] sm:$0xff] }
 0x46b   : > { %3444 = vmatpush3.bf16.msra.mxu0 %v1545_v53  ;;  %3549 = vmatpush3.bf16.msra.mxu1 %v1545_v53  ;;  %v3636_v33 = vld [vmem:[%s4006_s21 + $0x98] sm:$0xff]   ;;  %v1571_v22 = vld [vmem:[%s4011_s17 + $0xa0] sm:$0xff]  ;;  %v1573_v23 = vld [vmem:[%s4011_s17 + $0xb0] sm:$0xff] }
 0x46c   : > { %3445 = vmatprep.subr.bf16.mxu0 %v1546_v58  ;;  %3542 = vmatprep.subr.bf16.mxu1 %v1546_v58  ;;  %v3637_v14 = vld [vmem:[%s4006_s21 + $0x20] sm:$0xff]   ;;  %v1574_v29 = vld [vmem:[%s4011_s17 + $0xb8] sm:$0xff]  ;;  %v3639_v24 = vld [vmem:[%s4006_s21 + $0x28] sm:$0xff]  }
 0x46d   : > { %v3638_v49 = vld [vmem:[%s4006_s21 + $0xa0] sm:$0xff]   ;;  %v3640_v31 = vld [vmem:[%s4006_s21 + $0xa8] sm:$0xff]   ;;  %v3641_v26 = vld [vmem:[%s4006_s21 + $0x30] sm:$0xff]  }
 0x46e   : > { %1652 = vperm.xlu1 %3628, %v1558_v60   ;;  %1647 = vperm.xlu0 %3627, %v1557_v61   ;;  %v1576_v18 = vld [vmem:[%s4011_s17 + $0xc8] sm:$0xff]  ;;  %v1575_v25 = vld [vmem:[%s4011_s17 + $0xc0] sm:$0xff]  ;;  %v3642_v52 = vld [vmem:[%s4006_s21 + $0xb0] sm:$0xff]  }
 0x46f   : > { %3446 = vmatpush3.bf16.msra.mxu0 %v1546_v58  ;;  %3550 = vmatpush3.bf16.msra.mxu1 %v1546_v58  ;;  %v1578_v28 = vld [vmem:[%s4011_s17 + $0xd8] sm:$0xff]  ;;  %v1577_v30 = vld [vmem:[%s4011_s17 + $0xd0] sm:$0xff]  ;;  %v1580_v54 = vld [vmem:[%s4011_s17 + $0xe8] sm:$0xff] }
 0x470   : > { %3447 = vmatprep.subr.bf16.mxu0 %v1547_v63  ;;  %3543 = vmatprep.subr.bf16.mxu1 %v1547_v63  ;;  %v3643_v32 = vld [vmem:[%s4006_s21 + $0x38] sm:$0xff]   ;;  %v1579_v37 = vld [vmem:[%s4011_s17 + $0xe0] sm:$0xff]  ;;  %v1581_v39 = vld [vmem:[%s4011_s17 + $0xf0] sm:$0xff] }
 0x471   : > { %v3644_v36 = vld [vmem:[%s4006_s21 + $0xb8] sm:$0xff]   ;;  %v3645_v41 = vld [vmem:[%s4006_s21 + $0x40] sm:$0xff]   ;;  %v3647_v40 = vld [vmem:[%s4006_s21 + $0x48] sm:$0xff]  }
 0x472   : > { %1662 = vperm.xlu1 %3628, %v1560_v0   ;;  %1657 = vperm.xlu0 %3627, %v1559_v35   ;;  %v3646_v34 = vld [vmem:[%s4006_s21 + $0xc0] sm:$0xff]   ;;  %v1582_v38 = vld [vmem:[%s4011_s17 + $0xf8] sm:$0xff]  ;;  %v3648_v62 = vld [vmem:[%s4006_s21 + $0xc8] sm:$0xff]  }
 0x473   : > { %3448 = vmatpush3.bf16.msra.mxu0 %v1547_v63  ;;  %3551 = vmatpush3.bf16.msra.mxu1 %v1547_v63  ;;  %v1584_v42 = vld [vmem:[%s4011_s17 + $0x108] sm:$0xff]  ;;  %v1583_v43 = vld [vmem:[%s4011_s17 + $0x100] sm:$0xff]  ;;  %v3649_v45 = vld [vmem:[%s4006_s21 + $0x50] sm:$0xff]  }
 0x474   : > { %3449 = vmatprep.subr.bf16.mxu0 %v1548_v2  ;;  %3544 = vmatprep.subr.bf16.mxu1 %v1548_v2  ;;  %v3650_v1 = vld [vmem:[%s4006_s21 + $0xd0] sm:$0xff]   ;;  %v1586_v47 = vld [vmem:[%s4011_s17 + $0x118] sm:$0xff]  ;;  %v1588_v51 = vld [vmem:[%s4011_s17 + $0x128] sm:$0xff] }
 0x475   : > { %v1585_v48 = vld [vmem:[%s4011_s17 + $0x110] sm:$0xff]  ;;  %v3651_v7 = vld [vmem:[%s4006_s21 + $0x58] sm:$0xff]   ;;  %v1587_v53 = vld [vmem:[%s4011_s17 + $0x120] sm:$0xff] }
 0x476   : > { %1672 = vperm.xlu1 %3628, %v1562_v3   ;;  %1667 = vperm.xlu0 %3627, %v1561_v4   ;;  %v3652_v50 = vld [vmem:[%s4006_s21 + $0xd8] sm:$0xff]   ;;  %v3653_v55 = vld [vmem:[%s4006_s21 + $0x60] sm:$0xff]   ;;  %v1589_v58 = vld [vmem:[%s4011_s17 + $0x130] sm:$0xff] }
 0x477   : > { %3450 = vmatpush3.bf16.msra.mxu0 %v1548_v2  ;;  %3552 = vmatpush3.bf16.msra.mxu1 %v1548_v2  ;;  %v3654_v56 = vld [vmem:[%s4006_s21 + $0xe0] sm:$0xff]   ;;  %v1590_v57 = vld [vmem:[%s4011_s17 + $0x138] sm:$0xff]  ;;  %v3655_v59 = vld [vmem:[%s4006_s21 + $0x68] sm:$0xff]  }
 0x478   : > { %3451 = vmatprep.subr.bf16.mxu0 %v1549_v5  ;;  %3545 = vmatprep.subr.bf16.mxu1 %v1549_v5  ;;  %v3656_v60 = vld [vmem:[%s4006_s21 + $0xe8] sm:$0xff]   ;;  %v1591_v63 = vld [vmem:[%s4011_s17 + $0x140] sm:$0xff]  ;;  %v3657_v0 = vld [vmem:[%s4006_s21 + $0x70] sm:$0xff]  }
 0x479   : > { %v1592_v61 = vld [vmem:[%s4011_s17 + $0x148] sm:$0xff]  ;;  %v3658_v35 = vld [vmem:[%s4006_s21 + $0xf0] sm:$0xff]   ;;  %v1594_v2 = vld [vmem:[%s4011_s17 + $0x158] sm:$0xff] }
 0x47a   : > { %1682 = vperm.xlu1 %3628, %v1564_v6   ;;  %1677 = vperm.xlu0 %3627, %v1563_v8   ;;  %v1593_v3 = vld [vmem:[%s4011_s17 + $0x150] sm:$0xff]  ;;  %v3659_v4 = vld [vmem:[%s4006_s21 + $0x78] sm:$0xff]   ;;  %v1596_v6 = vld [vmem:[%s4011_s17 + $0x168] sm:$0xff] }
 0x47b   : > { %3452 = vmatpush3.bf16.msra.mxu0 %v1549_v5  ;;  %3553 = vmatpush3.bf16.msra.mxu1 %v1549_v5  ;;  %v3660_v5 = vld [vmem:[%s4006_s21 + $0xf8] sm:$0xff]   ;;  %v1595_v8 = vld [vmem:[%s4011_s17 + $0x160] sm:$0xff]  ;;  %s3282_s21 = sshll.u32 %s3831_s15, 9 }
 0x47c   : > { %3453 = vmatprep.subr.bf16.mxu0 %v1550_v12  ;;  %3546 = vmatprep.subr.bf16.mxu1 %v1550_v12 }
 0x47e   : > { %1692 = vperm.xlu1 %3628, %v1566_v27   ;;  %1687 = vperm.xlu0 %3627, %v1565_v10   ;;  %v1597_v27 = vld [vmem:[%s4011_s17 + $0x170] sm:$0xff]  ;;  %v1600_v10 = vld [vmem:[%s4011_s17 + $0x188] sm:$0xff] }
 0x47f   : > { %3454 = vmatpush3.bf16.msra.mxu0 %v1550_v12  ;;  %3554 = vmatpush3.bf16.msra.mxu1 %v1550_v12  ;;  %v1598_v12 = vld [vmem:[%s4011_s17 + $0x178] sm:$0xff] }
 0x482   : > { %3456 = vmatmul.mubr.bf16.vlgmr.msra.gmra.mrb[0].mxu0 %v3631_v44  ;;  %3488 = vmatmul.mubr.bf16.vlgmr.msra.gmra.mrb[0].mxu1 %v3632_v11  ;;  %v1599_v44 = vld [vmem:[%s4011_s17 + $0x180] sm:$0xff]  ;;  %v1602_v11 = vld [vmem:[%s4011_s17 + $0x198] sm:$0xff] }
 0x483   : > { %1702 = vperm.xlu1 %3628, %v1568_v13   ;;  %1697 = vperm.xlu0 %3627, %v1567_v15   ;;  %v1601_v13 = vld [vmem:[%s4011_s17 + $0x190] sm:$0xff]  ;;  %v1604_v15 = vld [vmem:[%s4011_s17 + $0x1a8] sm:$0xff] }
 0x484   : > { %3459 = vmatprep.mubr.bf16.mxu0 %v3633_v9  ;;  %3491 = vmatprep.mubr.bf16.mxu1 %v3634_v17  ;;  %v1603_v9 = vld [vmem:[%s4011_s17 + $0x1a0] sm:$0xff]  ;;  %v1606_v17 = vld [vmem:[%s4011_s17 + $0x1b8] sm:$0xff] }
 0x487   : > { %1712 = vperm.xlu1 %3628, %v1570_v19   ;;  %1707 = vperm.xlu0 %3627, %v1569_v46   ;;  %v1605_v19 = vld [vmem:[%s4011_s17 + $0x1b0] sm:$0xff]  ;;  %v2417_v46 = vlaneseq }
 0x48a   : > { %3460 = vmatmul.mubr.bf16.gmra.mrb[4].mxu0 %v3635_v20  ;;  %3492 = vmatmul.mubr.bf16.gmra.mrb[4].mxu1 %v3636_v33  ;;  %v1608_v20 = vld [vmem:[%s4011_s17 + $0x1c8] sm:$0xff]  ;;  %v1607_v33 = vld [vmem:[%s4011_s17 + $0x1c0] sm:$0xff] }
 0x48b   : > { %1722 = vperm.xlu1 %3628, %v1572_v21   ;;  %1717 = vperm.xlu0 %3627, %v1571_v22   ;;  %v4477_v21 = vshrl.u32 %v2417_v46, 7 }
 0x48c   : > { %3463 = vmatprep.mubr.bf16.mxu0 %v3637_v14  ;;  %3495 = vmatprep.mubr.bf16.mxu1 %v3638_v49  ;;  %v1610_v49 = vld [vmem:[%s4011_s17 + $0x1d8] sm:$0xff] }
 0x48d   : > { %v5743_v22 = vsub.s32 0, %v4477_v21  ;;  %v2452_v14 = vadd.s32 272, %v4477_v21 }
 0x48f   : > { %1732 = vperm.xlu1 %3628, %v1574_v29   ;;  %1727 = vperm.xlu0 %3627, %v1573_v23   ;;  %v1609_v29 = vld [vmem:[%s4011_s17 + $0x1d0] sm:$0xff]  ;;  %v4484_v23 = vstv %s3282_s21 }
 0x492   : > { %3464 = vmatmul.mubr.bf16.gmra.mrb[8].mxu0 %v3639_v24  ;;  %3496 = vmatmul.mubr.bf16.gmra.mrb[8].mxu1 %v3640_v31  ;;  %v4489_v24 = vrot.slane %v4001_v16, %v5743_v22  ;;  %v4492_v31 = vadd.s32 %v4484_v23, %v2452_v14 }
 0x493   : > { %1742 = vperm.xlu1 %3628, %v1576_v18   ;;  %1737 = vperm.xlu0 %3627, %v1575_v25   ;;  %v2453_v18 = vadd.s32 280, %v4477_v21  ;;  %v1612_v25 = vld [vmem:[%s4011_s17 + $0x1e8] sm:$0xff] }
 0x494   : > { %3467 = vmatprep.mubr.bf16.mxu0 %v3641_v26  ;;  %3499 = vmatprep.mubr.bf16.mxu1 %v3642_v52  ;;  %5835 = vst [vmem:[#allocation12_spill] sm:$0xff] %v4492_v31  ;;  %v1611_v26 = vld [vmem:[%s4011_s17 + $0x1e0] sm:$0xff]  ;;  %v2421_v31 = vadd.s32 24, %v4477_v21 }
 0x495   : > { %v4500_v52 = vadd.s32 %v4484_v23, %v2453_v18 }
 0x497   : > { %1752 = vperm.xlu1 %3628, %v1578_v28   ;;  %1747 = vperm.xlu0 %3627, %v1577_v30   ;;  %5836 = vst [vmem:[#allocation13_spill] sm:$0xff] %v4500_v52  ;;  %v2451_v28 = vadd.s32 264, %v4477_v21  ;;  %v2483_v52 = vadd.s32 %v4484_v23, %v4477_v21 }
 0x499   : > { %v4506_v30 = vadd.s32 %v4484_v23, %v2451_v28  ;;  %v2471_v28 = vadd.s32 424, %v4477_v21  ;;  %vm2552_vm9 = vcmp.eq.s32.totalorder %v2483_v52, %v4489_v24 }
 0x49a   : > { %3468 = vmatmul.mubr.bf16.gmra.mrb[12].mxu0 %v3643_v32  ;;  %3500 = vmatmul.mubr.bf16.gmra.mrb[12].mxu1 %v3644_v36  ;;  %v1614_v32 = vld [vmem:[%s4011_s17 + $0x1f8] sm:$0xff]  ;;  %v1613_v36 = vld [vmem:[%s4011_s17 + $0x1f0] sm:$0xff] }
 0x49b   : > { %1762 = vperm.xlu1 %3628, %v1580_v54   ;;  %1757 = vperm.xlu0 %3627, %v1579_v37   ;;  %5837 = vst [vmem:[#allocation14_spill] sm:$0xff] %v4506_v30  ;;  %vm2585_vm6 = vcmp.eq.s32.totalorder %v4506_v30, %v4489_v24  ;;  %v2456_v54 = vadd.s32 304, %v4477_v21  ;;  %v2454_v37 = vadd.s32 288, %v4477_v21 }
 0x49c   : > { %3471 = vmatprep.mubr.bf16.mxu0 %v3645_v41  ;;  %3503 = vmatprep.mubr.bf16.mxu1 %v3646_v34  ;;  %v2457_v34 = vadd.s32 312, %v4477_v21 }
 0x49d   : > { %v4515_v41 = vadd.s32 %v4484_v23, %v2456_v54 }
 0x49f   : > { %1772 = vperm.xlu1 %3628, %v1582_v38   ;;  %1767 = vperm.xlu0 %3627, %v1581_v39   ;;  %5838 = vst [vmem:[#allocation15_spill] sm:$0xff] %v4515_v41  ;;  %v4519_v38 = vadd.s32 %v4484_v23, %v2454_v37  ;;  %v2455_v39 = vadd.s32 296, %v4477_v21  ;;  %v4662_v37 = vadd.s32 %v4484_v23, %v2471_v28  ;;  %v2481_v28 = vadd.s32 504, %v4477_v21 }
 0x4a1   : > { %5839 = vst [vmem:[#allocation16_spill] sm:$0xff] %v4519_v38  ;;  %5857 = vst [vmem:[#allocation34_spill] sm:$0xff] %v4662_v37 }
 0x4a2   : > { %3472 = vmatmul.mubr.bf16.gmra.mrb[16].mxu0 %v3647_v40  ;;  %3504 = vmatmul.mubr.bf16.gmra.mrb[16].mxu1 %v3648_v62 }
 0x4a3   : > { %1782 = vperm.xlu1 %3628, %v1584_v42   ;;  %1777 = vperm.xlu0 %3627, %v1583_v43   ;;  %v4529_v42 = vadd.s32 %v4484_v23, %v2457_v34  ;;  %v4534_v43 = vadd.s32 %v4484_v23, %v2455_v39  ;;  %v2476_v34 = vadd.s32 464, %v4477_v21 }
 0x4a4   : > { %3475 = vmatprep.mubr.bf16.mxu0 %v3649_v45  ;;  %3507 = vmatprep.mubr.bf16.mxu1 %v3650_v1 }
 0x4a5   : > { %5840 = vst [vmem:[#allocation17_spill] sm:$0xff] %v4529_v42  ;;  %5841 = vst [vmem:[#allocation18_spill] sm:$0xff] %v4534_v43  ;;  %v2419_v42 = vadd.s32 8, %v4477_v21 }
 0x4a7   : > { %1792 = vperm.xlu1 %3628, %v1586_v47   ;;  %1787 = vperm.xlu0 %3627, %v1585_v48   ;;  %v2460_v47 = vadd.s32 336, %v4477_v21  ;;  %v2458_v48 = vadd.s32 320, %v4477_v21  ;;  %v2484_v30 = vadd.s32 %v4484_v23, %v2419_v42 }
 0x4a9   : > { %vm2553_vm7 = vcmp.eq.s32.totalorder %v2484_v30, %v4489_v24 }
 0x4aa   : > { %3476 = vmatmul.mubr.bf16.gmra.mrb[20].mxu0 %v3651_v7  ;;  %3508 = vmatmul.mubr.bf16.gmra.mrb[20].mxu1 %v3652_v50  ;;  %v4547_v7 = vadd.s32 %v4484_v23, %v2460_v47  ;;  %v2461_v50 = vadd.s32 344, %v4477_v21 }
 0x4ab   : > { %1802 = vperm.xlu1 %3628, %v1588_v51   ;;  %1797 = vperm.xlu0 %3627, %v1587_v53   ;;  %v4551_v51 = vadd.s32 %v4484_v23, %v2458_v48  ;;  %v2459_v53 = vadd.s32 328, %v4477_v21  ;;  %v2474_v48 = vadd.s32 448, %v4477_v21 }
 0x4ac   : > { %3479 = vmatprep.mubr.bf16.mxu0 %v3653_v55  ;;  %3511 = vmatprep.mubr.bf16.mxu1 %v3654_v56  ;;  %5842 = vst [vmem:[#allocation19_spill] sm:$0xff] %v4547_v7 }
 0x4ad   : > { %5843 = vst [vmem:[#allocation20_spill] sm:$0xff] %v4551_v51  ;;  %v2420_v51 = vadd.s32 16, %v4477_v21 }
 0x4af   : > { %1812 = vperm.xlu1 %3628, %v1590_v57   ;;  %1807 = vperm.xlu0 %3627, %v1589_v58   ;;  %v4561_v57 = vadd.s32 %v4484_v23, %v2461_v50  ;;  %v4566_v58 = vadd.s32 %v4484_v23, %v2459_v53  ;;  %v4675_v50 = vadd.s32 %v4484_v23, %v2476_v34  ;;  %v2477_v53 = vadd.s32 472, %v4477_v21 }
 0x4b0   : > { %v2485_v38 = vadd.s32 %v4484_v23, %v2420_v51 }
 0x4b1   : > { %5844 = vst [vmem:[#allocation21_spill] sm:$0xff] %v4561_v57  ;;  %5845 = vst [vmem:[#allocation22_spill] sm:$0xff] %v4566_v58  ;;  %vm2610_vm2 = vcmp.eq.s32.totalorder %v4675_v50, %v4489_v24 }
 0x4b2   : > { %3480 = vmatmul.mubr.bf16.gmra.mrb[24].mxu0 %v3655_v59  ;;  %3512 = vmatmul.mubr.bf16.gmra.mrb[24].mxu1 %v3656_v60  ;;  %5858 = vst [vmem:[#allocation35_spill] sm:$0xff] %v4675_v50  ;;  %vm2554_vm12 = vcmp.eq.s32.totalorder %v2485_v38, %v4489_v24 }
 0x4b3   : > { %1822 = vperm.xlu1 %3628, %v1592_v61   ;;  %1817 = vperm.xlu0 %3627, %v1591_v63   ;;  %v2464_v61 = vadd.s32 368, %v4477_v21  ;;  %v2462_v63 = vadd.s32 352, %v4477_v21 }
 0x4b4   : > { %3483 = vmatprep.mubr.bf16.mxu0 %v3657_v0  ;;  %3515 = vmatprep.mubr.bf16.mxu1 %v3658_v35  ;;  %v2465_v35 = vadd.s32 376, %v4477_v21 }
 0x4b5   : > { %v4579_v0 = vadd.s32 %v4484_v23, %v2464_v61  ;;  %v4679_v61 = vadd.s32 %v4484_v23, %v2474_v48  ;;  %v2479_v48 = vadd.s32 488, %v4477_v21 }
 0x4b7   : > { %1832 = vperm.xlu1 %3628, %v1594_v2   ;;  %1827 = vperm.xlu0 %3627, %v1593_v3   ;;  %5846 = vst [vmem:[#allocation23_spill] sm:$0xff] %v4579_v0  ;;  %v4583_v2 = vadd.s32 %v4484_v23, %v2462_v63  ;;  %v2463_v3 = vadd.s32 360, %v4477_v21  ;;  %5859 = vst [vmem:[#allocation36_spill] sm:$0xff] %v4679_v61  ;;  %v2475_v63 = vadd.s32 456, %v4477_v21 }
 0x4b8   : > { %vm2608_vm15 = vcmp.eq.s32.totalorder %v4679_v61, %v4489_v24 }
 0x4b9   : > { %5847 = vst [vmem:[#allocation24_spill] sm:$0xff] %v4583_v2 }
 0x4ba   : > { %3484 = vmatmul.mubr.bf16.gmra.mrb[28].mxu0 %v3659_v4  ;;  %3516 = vmatmul.mubr.bf16.gmra.mrb[28].mxu1 %v3660_v5 }
 0x4bb   : > { %1842 = vperm.xlu1 %3628, %v1596_v6   ;;  %1837 = vperm.xlu0 %3627, %v1595_v8   ;;  %v4593_v6 = vadd.s32 %v4484_v23, %v2465_v35  ;;  %v4598_v8 = vadd.s32 %v4484_v23, %v2463_v3  ;;  %v4685_v35 = vadd.s32 %v4484_v23, %v2477_v53 }
 0x4bc   : > { %v4717_v53 = vadd.s32 %v4484_v23, %v2481_v28 }
 0x4bd   : > { %5848 = vst [vmem:[#allocation25_spill] sm:$0xff] %v4593_v6  ;;  %5849 = vst [vmem:[#allocation26_spill] sm:$0xff] %v4598_v8  ;;  %vm2611_vm1 = vcmp.eq.s32.totalorder %v4685_v35, %v4489_v24 }
 0x4be   : > { %5860 = vst [vmem:[#allocation37_spill] sm:$0xff] %v4685_v35  ;;  %5868 = vst [vmem:[#allocation45_spill] sm:$0xff] %v4717_v53  ;;  %vm2615_vm11 = vcmp.eq.s32.totalorder %v4717_v53, %v4489_v24  ;;  %v2422_v53 = vadd.s32 32, %v4477_v21 }
 0x4bf   : > { %1852 = vperm.xlu1 %3628, %v1598_v12   ;;  %1847 = vperm.xlu0 %3627, %v1597_v27  }
 0x4c0   : > { %v2487_v50 = vadd.s32 %v4484_v23, %v2422_v53 }
 0x4c2   : > { %vm2556_vm5 = vcmp.eq.s32.totalorder %v2487_v50, %v4489_v24  ;;  %v2434_v50 = vadd.s32 128, %v4477_v21 }
 0x4c3   : > { %1862 = vperm.xlu1 %3628, %v1600_v10   ;;  %1857 = vperm.xlu0 %3627, %v1599_v44   ;;  %v2468_v10 = vadd.s32 400, %v4477_v21  ;;  %v2466_v44 = vadd.s32 384, %v4477_v21 }
 0x4c7   : > { %1872 = vperm.xlu1 %3628, %v1602_v11   ;;  %1867 = vperm.xlu0 %3627, %v1601_v13   ;;  %v4611_v11 = vadd.s32 %v4484_v23, %v2468_v10  ;;  %v2469_v13 = vadd.s32 408, %v4477_v21 }
 0x4c9   : > { %5850 = vst [vmem:[#allocation27_spill] sm:$0xff] %v4611_v11  ;;  %v4625_v46 = vadd.s32 %v4484_v23, %v2469_v13  ;;  %v2480_v13 = vadd.s32 496, %v4477_v21 }
 0x4cb   : > { %1882 = vperm.xlu1 %3628, %v1604_v15   ;;  %1877 = vperm.xlu0 %3627, %v1603_v9   ;;  %v4615_v15 = vadd.s32 %v4484_v23, %v2466_v44  ;;  %v2467_v9 = vadd.s32 392, %v4477_v21  ;;  %5852 = vst [vmem:[#allocation29_spill] sm:$0xff] %v4625_v46  ;;  %v4694_v44 = vadd.s32 %v4484_v23, %v2475_v63 }
 0x4cd   : > { %5851 = vst [vmem:[#allocation28_spill] sm:$0xff] %v4615_v15  ;;  %5863 = vst [vmem:[#allocation40_spill] sm:$0xff] %v4694_v44  ;;  %vm2609_vm3 = vcmp.eq.s32.totalorder %v4694_v44, %v4489_v24  ;;  %v2425_v44 = vadd.s32 56, %v4477_v21 }
 0x4cf   : > { %1892 = vperm.xlu1 %3628, %v1606_v17   ;;  %1887 = vperm.xlu0 %3627, %v1605_v19  }
 0x4d3   : > { %1902 = vperm.xlu1 %3628, %v1608_v20   ;;  %1897 = vperm.xlu0 %3627, %v1607_v33   ;;  %v4630_v20 = vadd.s32 %v4484_v23, %v2467_v9 }
 0x4d5   : > { %5853 = vst [vmem:[#allocation30_spill] sm:$0xff] %v4630_v20 }
 0x4d7   : > { %1912 = vperm.xlu1 %3628, %v1610_v49   ;;  %1907 = vperm.xlu0 %3627, %v1609_v29   ;;  %v2472_v49 = vadd.s32 432, %v4477_v21  ;;  %v2470_v29 = vadd.s32 416, %v4477_v21 }
 0x4d9   : > { %v4643_v18 = vadd.s32 %v4484_v23, %v2472_v49 }
 0x4db   : > { %1922 = vperm.xlu1 %3628, %v1612_v25   ;;  %1917 = vperm.xlu0 %3627, %v1611_v26   ;;  %5854 = vst [vmem:[#allocation31_spill] sm:$0xff] %v4643_v18  ;;  %v2473_v25 = vadd.s32 440, %v4477_v21  ;;  %v4647_v26 = vadd.s32 %v4484_v23, %v2470_v29  ;;  %v2478_v29 = vadd.s32 480, %v4477_v21 }
 0x4dd   : > { %5855 = vst [vmem:[#allocation32_spill] sm:$0xff] %v4647_v26  ;;  %v4711_v34 = vadd.s32 %v4484_v23, %v2478_v29 }
 0x4df   : > { %1932 = vperm.xlu1 %3628, %v1614_v32   ;;  %1927 = vperm.xlu0 %3627, %v1613_v36   ;;  %v4653_v32 = vadd.s32 %v4484_v23, %v2473_v25  ;;  %v4707_v25 = vadd.s32 %v4484_v23, %v2480_v13  ;;  %5867 = vst [vmem:[#allocation44_spill] sm:$0xff] %v4711_v34 }
 0x4e0   : > { %vm2612_vm13 = vcmp.eq.s32.totalorder %v4711_v34, %v4489_v24  ;;  %v4724_v13 = vadd.s32 %v4484_v23, %v2479_v48  ;;  %v2423_v34 = vadd.s32 40, %v4477_v21 }
 0x4e1   : > { %v4522_v40 = vpop.permute.xlu1 %1627  ;;  %v4524_v62 = vpop.permute.xlu0 %1617  ;;  %5856 = vst [vmem:[#allocation33_spill] sm:$0xff] %v4653_v32  ;;  %5866 = vst [vmem:[#allocation43_spill] sm:$0xff] %v4707_v25  ;;  %vm2614_vm0 = vcmp.eq.s32.totalorder %v4707_v25, %v4489_v24 }
 0x4e2   : > { %5870 = vst [vmem:[#allocation47_spill] sm:$0xff] %v4724_v13  ;;  %vm2613_vm14 = vcmp.eq.s32.totalorder %v4724_v13, %v4489_v24  ;;  %v2424_v13 = vadd.s32 48, %v4477_v21 }
 0x4e5   : > { %v4540_v45 = vpop.permute.xlu1 %1632  ;;  %v4542_v1 = vpop.permute.xlu0 %1622 }
 0x4e9   : > { %v4554_v55 = vpop.permute.xlu1 %1642  ;;  %v4556_v56 = vpop.permute.xlu0 %1637 }
 0x4ed   : > { %v4572_v59 = vpop.permute.xlu1 %1652  ;;  %v4574_v60 = vpop.permute.xlu0 %1647 }
 0x4f1   : > { %v4586_v4 = vpop.permute.xlu1 %1662  ;;  %v4588_v5 = vpop.permute.xlu0 %1657 }
 0x4f5   : > { %v4604_v12 = vpop.permute.xlu1 %1672  ;;  %v4606_v27 = vpop.permute.xlu0 %1667 }
 0x4f9   : > { %v4618_v17 = vpop.permute.xlu1 %1682  ;;  %v4620_v19 = vpop.permute.xlu0 %1677 }
 0x4fd   : > { %v4636_v33 = vpop.permute.xlu1 %1692  ;;  %v4638_v14 = vpop.permute.xlu0 %1687 }
 0x502   : > { %v4655_v36 = vpop.permute.xlu1 %1702  ;;  %v4657_v54 = vpop.permute.xlu0 %1697 }
 0x506   : > { %v4669_v39 = vpop.permute.xlu1 %1712  ;;  %v4671_v47 = vpop.permute.xlu0 %1707 }
 0x50a   : > { %v4687_v3 = vpop.permute.xlu1 %1722  ;;  %v4689_v10 = vpop.permute.xlu0 %1717 }
 0x50b   : > { %5861 = vst [vmem:[#allocation38_spill] sm:$0xff] %v4687_v3  ;;  %5862 = vst [vmem:[#allocation39_spill] sm:$0xff] %v4689_v10 }
 0x50e   : > { %v4701_v9 = vpop.permute.xlu1 %1732  ;;  %v4703_v49 = vpop.permute.xlu0 %1727 }
 0x50f   : > { %5864 = vst [vmem:[#allocation41_spill] sm:$0xff] %v4701_v9  ;;  %5865 = vst [vmem:[#allocation42_spill] sm:$0xff] %v4703_v49  ;;  %v4805_v9 = vadd.s32 %v4484_v23, %v2423_v34  ;;  %v2427_v34 = vadd.s32 72, %v4477_v21 }
 0x511   : > { %vm2557_vm4 = vcmp.eq.s32.totalorder %v4805_v9, %v4489_v24  ;;  %v4861_v38 = vadd.s32 %v4484_v23, %v2427_v34 }
 0x512   : > { %v4719_v63 = vpop.permute.xlu0 %1737  ;;  %v4728_v29 = vpop.permute.xlu1 %1742 }
 0x513   : > { %5869 = vst [vmem:[#allocation46_spill] sm:$0xff] %v4719_v63  ;;  %5871 = vst [vmem:[#allocation48_spill] sm:$0xff] %v4728_v29  ;;  %v2486_v29 = vadd.s32 %v4484_v23, %v2421_v31 }
 0x515   : > { %vm2555_vm10 = vcmp.eq.s32.totalorder %v2486_v29, %v4489_v24 }
 0x516   : > { %v4732_v22 = vpop.permute.xlu0 %1747  ;;  %v4734_v28 = vpop.permute.xlu1 %1752 }
 0x517   : > { %5872 = vst [vmem:[#allocation49_spill] sm:$0xff] %v4732_v22  ;;  %5873 = vst [vmem:[#allocation50_spill] sm:$0xff] %v4734_v28 }
 0x51a   : > { %v4736_v16 = vpop.permute.xlu0 %1757  ;;  %v4738_v32 = vpop.permute.xlu1 %1762 }
 0x51b   : > { %5874 = vst [vmem:[#allocation51_spill] sm:$0xff] %v4736_v16  ;;  %5875 = vst [vmem:[#allocation52_spill] sm:$0xff] %v4738_v32 }
 0x51e   : > { %v4740_v18 = vpop.permute.xlu0 %1767  ;;  %v4742_v48 = vpop.permute.xlu1 %1772 }
 0x51f   : > { %5876 = vst [vmem:[#allocation53_spill] sm:$0xff] %v4740_v18  ;;  %5877 = vst [vmem:[#allocation54_spill] sm:$0xff] %v4742_v48  ;;  %v4783_v18 = vadd.s32 256, %v4477_v21 }
 0x521   : > { %5879 = vst [vmem:[#allocation56_spill] sm:$0xff] %v4783_v18  ;;  %v4796_v18 = vadd.s32 %v4484_v23, %v2424_v13 }
 0x522   : > { %v1778_v37 = vpop.permute.xlu0 %1777  ;;  %v1783_v26 = vpop.permute.xlu1 %1782 }
 0x523   : > { %vm2558_vm8 = vcmp.eq.s32.totalorder %v4796_v18, %v4489_v24  ;;  %v2435_v18 = vadd.s32 136, %v4477_v21 }
 0x526   : > { %v1788_v46 = vpop.permute.xlu0 %1787  ;;  %v1793_v11 = vpop.permute.xlu1 %1792 }
 0x52a   : > { %v4744_v20 = vpop.permute.xlu0 %1797  ;;  %v4746_v15 = vpop.permute.xlu1 %1802 }
 0x52e   : > { %v4748_v6 = vpop.permute.xlu0 %1807  ;;  %v4750_v0 = vpop.permute.xlu1 %1812 }
 0x532   : > { %v4752_v8 = vpop.permute.xlu0 %1817  ;;  %v4754_v2 = vpop.permute.xlu1 %1822 }
 0x536   : > { %v4756_v57 = vpop.permute.xlu0 %1827  ;;  %v4758_v7 = vpop.permute.xlu1 %1832 }
 0x53a   : > { %v4760_v58 = vpop.permute.xlu0 %1837  ;;  %v4764_v41 = vpop.permute.xlu1 %1842 }
 0x53e   : > { %v4766_v43 = vpop.permute.xlu0 %1847  ;;  %v4776_v25 = vpop.permute.xlu1 %1852 }
 0x542   : > { %v4778_v16 = vpop.permute.xlu0 %1857 }
 0x546   : > { %v4842_v30 = vpop.permute.xlu0 %1867 }
 0x555   : > { %v3457_v32 = vpop.f32.mrb[0].mxu0  ;;  %v3489_v48 = vpop.f32.mrb[0].mxu1 }
 0x556   : > { %v4780_v51 = vadd.f32 %v3489_v48, %v1788_v46  ;;  %v2161_v42 = vpop.f32.mrb[1].mxu0  ;;  %v2289_v35 = vpop.f32.mrb[1].mxu1 }
 0x557   : > { %v4791_v28 = vadd.f32 %v2161_v42, %v4524_v62  ;;  %v4793_v46 = vadd.f32 %v2289_v35, %v1778_v37  ;;  %v3458_v48 = vpop.f32.mrb[2].mxu0  ;;  %v3490_v61 = vpop.f32.mrb[2].mxu1  ;;  %v2426_v62 = vadd.s32 64, %v4477_v21  ;;  %v4809_v37 = vadd.f32 %v3457_v32, %v4522_v40 }
 0x558   : > { %5878 = vst [vmem:[#allocation55_spill] sm:$0xff] %v4780_v51  ;;  %v4800_v63 = vadd.f32 %v3458_v48, %v4540_v45  ;;  %v4802_v22 = vadd.f32 %v3490_v61, %v1793_v11  ;;  %v2164_v31 = vpop.f32.mrb[3].mxu0  ;;  %v2292_v3 = vpop.f32.mrb[3].mxu1  ;;  %v4817_v45 = vadd.s32 %v4484_v23, %v2425_v44  ;;  %v2428_v11 = vadd.s32 80, %v4477_v21 }
 0x559   : > { %5880 = vst [vmem:[#allocation57_spill] sm:$0xff] %v4793_v46  ;;  %5883 = vst [vmem:[#allocation60_spill] sm:$0xff] %v4809_v37  ;;  %v2782_v35 = vmax.f32 %v4793_v46, %v4780_v51  ;;  %v4814_v53 = vadd.f32 %v2164_v31, %v4542_v1  ;;  %v2429_v61 = vadd.s32 88, %v4477_v21  ;;  %v2616_v40 = vsel %vm2552_vm9, %v4791_v28, 0.0  ;;  %v4840_v31 = vpop.permute.xlu1 %1862 }
 0x55a   : > { %5881 = vst [vmem:[#allocation58_spill] sm:$0xff] %v4800_v63  ;;  %5882 = vst [vmem:[#allocation59_spill] sm:$0xff] %v4802_v22  ;;  %v4830_v44 = vadd.f32 %v2292_v3, %v1783_v26  ;;  %v4838_v52 = vadd.s32 %v4484_v23, %v2426_v62  ;;  %v2618_v26 = vsel %vm2554_vm12, %v4809_v37, 0.0  ;;  %v4855_v51 = vadd.s32 %v4484_v23, %v2428_v11 }
 0x55b   : > { %v2786_v32 = vmax.f32 %v2782_v35, %v4802_v22  ;;  %v2617_v1 = vsel %vm2553_vm7, %v4814_v53, 0.0  ;;  %vm2559_vm7 = vcmp.eq.s32.totalorder %v4817_v45, %v4489_v24  ;;  %v4858_v46 = vadd.s32 %v4484_v23, %v2429_v61 }
 0x55c   : > { %5884 = vst [vmem:[#allocation61_spill] sm:$0xff] %v4830_v44  ;;  %v2680_v13 = vadd.f32 %v2617_v1, %v2616_v40  ;;  %v2430_v40 = vadd.s32 96, %v4477_v21  ;;  %vm2560_vm9 = vcmp.eq.s32.totalorder %v4838_v52, %v4489_v24  ;;  %vm2561_vm12 = vcmp.eq.s32.totalorder %v4861_v38, %v4489_v24 }
 0x55d   : > { %v3461_v42 = vpop.f32.mrb[4].mxu0  ;;  %v3493_v48 = vpop.f32.mrb[4].mxu1  ;;  %v2790_v3 = vmax.f32 %v2786_v32, %v4830_v44  ;;  %v2438_v45 = vadd.s32 160, %v4477_v21  ;;  %v2439_v38 = vadd.s32 168, %v4477_v21 }
 0x55e   : > { %v4849_v35 = vadd.f32 %v3493_v48, %v4748_v6  ;;  %v2681_v62 = vadd.f32 %v2680_v13, %v2618_v26  ;;  %v2177_v1 = vpop.f32.mrb[5].mxu0  ;;  %v2305_v22 = vpop.f32.mrb[5].mxu1  ;;  %v2619_v6 = vsel %vm2555_vm10, %v4800_v63, 0.0  ;;  %v2432_v13 = vadd.s32 112, %v4477_v21 }
 0x55f   : > { %v3462_v48 = vpop.f32.mrb[6].mxu0  ;;  %v3494_v44 = vpop.f32.mrb[6].mxu1  ;;  %v2433_v26 = vadd.s32 120, %v4477_v21  ;;  %v4870_v11 = vadd.f32 %v2177_v1, %v4556_v56  ;;  %v4873_v49 = vadd.f32 %v2305_v22, %v4744_v20  ;;  %v2431_v56 = vadd.s32 104, %v4477_v21 }
 0x560   : > { %5885 = vst [vmem:[#allocation62_spill] sm:$0xff] %v4849_v35  ;;  %v2794_v32 = vmax.f32 %v2790_v3, %v4849_v35  ;;  %v2682_v61 = vadd.f32 %v2681_v62, %v2619_v6  ;;  %v4876_v34 = vadd.f32 %v3462_v48, %v4572_v59  ;;  %v2180_v29 = vpop.f32.mrb[7].mxu0  ;;  %v2308_v10 = vpop.f32.mrb[7].mxu1  ;;  %v4884_v35 = vadd.s32 %v4484_v23, %v2430_v40 }
 0x561   : > { %5886 = vst [vmem:[#allocation63_spill] sm:$0xff] %v4870_v11  ;;  %5887 = vst [vmem:[#allocation64_spill] sm:$0xff] %v4873_v49  ;;  %v4879_v3 = vadd.f32 %v2180_v29, %v4554_v55  ;;  %v4888_v62 = vadd.f32 %v3461_v42, %v4574_v60  ;;  %v2620_v22 = vsel %vm2556_vm5, %v4870_v11, 0.0  ;;  %v4895_v55 = vadd.f32 %v3494_v44, %v4750_v0  ;;  %v4897_v20 = vpop.permute.xlu1 %1872  ;;  %v4899_v1 = vpop.permute.xlu0 %1877 }
 0x562   : > { %5888 = vst [vmem:[#allocation65_spill] sm:$0xff] %v4876_v34  ;;  %v2798_v59 = vmax.f32 %v2794_v32, %v4873_v49  ;;  %5892 = vst [vmem:[#allocation69_spill] sm:$0xff] %v4899_v1  ;;  %v2683_v40 = vadd.f32 %v2682_v61, %v2620_v22  ;;  %vm2562_vm10 = vcmp.eq.s32.totalorder %v4855_v51, %v4489_v24  ;;  %v2437_v1 = vadd.s32 152, %v4477_v21 }
 0x563   : > { %5889 = vst [vmem:[#allocation66_spill] sm:$0xff] %v4879_v3  ;;  %5890 = vst [vmem:[#allocation67_spill] sm:$0xff] %v4888_v62  ;;  %v4906_v60 = vadd.s32 %v4484_v23, %v2432_v13  ;;  %v2621_v0 = vsel %vm2557_vm4, %v4879_v3, 0.0  ;;  %v4915_v44 = vadd.f32 %v2308_v10, %v4746_v15  ;;  %v4918_v48 = vadd.s32 %v4484_v23, %v2433_v26 }
 0x564   : > { %5891 = vst [vmem:[#allocation68_spill] sm:$0xff] %v4895_v55  ;;  %v2802_v42 = vmax.f32 %v2798_v59, %v4895_v55  ;;  %v2684_v61 = vadd.f32 %v2683_v40, %v2621_v0  ;;  %vm2563_vm5 = vcmp.eq.s32.totalorder %v4858_v46, %v4489_v24  ;;  %vm2564_vm4 = vcmp.eq.s32.totalorder %v4884_v35, %v4489_v24 }
 0x565   : > { %5893 = vst [vmem:[#allocation70_spill] sm:$0xff] %v4915_v44  ;;  %v3465_v6 = vpop.f32.mrb[8].mxu0  ;;  %v3497_v32 = vpop.f32.mrb[8].mxu1  ;;  %v4928_v15 = vadd.s32 %v4484_v23, %v2431_v56  ;;  %v2436_v10 = vadd.s32 144, %v4477_v21  ;;  %v2622_v9 = vsel %vm2558_vm8, %v4888_v62, 0.0  ;;  %v4943_v49 = vadd.s32 %v4484_v23, %v2434_v50 }
 0x566   : > { %v4921_v13 = vadd.f32 %v3497_v32, %v4756_v57  ;;  %v2193_v29 = vpop.f32.mrb[9].mxu0  ;;  %v2321_v22 = vpop.f32.mrb[9].mxu1  ;;  %v2806_v57 = vmax.f32 %v2802_v42, %v4915_v44  ;;  %v2685_v32 = vadd.f32 %v2684_v61, %v2622_v9  ;;  %v2440_v61 = vadd.s32 176, %v4477_v21 }
 0x567   : > { %v4937_v26 = vadd.f32 %v2193_v29, %v4588_v5  ;;  %v4940_v59 = vadd.f32 %v2321_v22, %v4752_v8  ;;  %v3466_v40 = vpop.f32.mrb[10].mxu0  ;;  %v3498_v0 = vpop.f32.mrb[10].mxu1  ;;  %v2623_v5 = vsel %vm2559_vm7, %v4876_v34, 0.0  ;;  %vm2565_vm8 = vcmp.eq.s32.totalorder %v4928_v15, %v4489_v24 }
 0x568   : > { %5894 = vst [vmem:[#allocation71_spill] sm:$0xff] %v4921_v13  ;;  %v2196_v56 = vpop.f32.mrb[11].mxu0  ;;  %v2324_v55 = vpop.f32.mrb[11].mxu1  ;;  %v2810_v8 = vmax.f32 %v2806_v57, %v4921_v13  ;;  %v2686_v50 = vadd.f32 %v2685_v32, %v2623_v5  ;;  %v4958_v29 = vadd.f32 %v3466_v40, %v4604_v12  ;;  %v4967_v9 = vadd.f32 %v3465_v6, %v4606_v27 }
 0x569   : > { %5895 = vst [vmem:[#allocation72_spill] sm:$0xff] %v4937_v26  ;;  %5896 = vst [vmem:[#allocation73_spill] sm:$0xff] %v4940_v59  ;;  %v2624_v42 = vsel %vm2560_vm9, %v4937_v26, 0.0  ;;  %v4961_v22 = vadd.f32 %v2196_v56, %v4586_v4  ;;  %v4971_v57 = vadd.f32 %v3498_v0, %v4758_v7  ;;  %v4974_v32 = vadd.s32 %v4484_v23, %v2436_v10  ;;  %v4976_v12 = vpop.permute.xlu1 %1882  ;;  %v4978_v4 = vpop.permute.xlu0 %1887 }
 0x56a   : > { %5897 = vst [vmem:[#allocation74_spill] sm:$0xff] %v4958_v29  ;;  %5899 = vst [vmem:[#allocation76_spill] sm:$0xff] %v4967_v9  ;;  %v2780_v52 = vmax.f32 %v4940_v59, %v2810_v8  ;;  %v2687_v40 = vadd.f32 %v2686_v50, %v2624_v42  ;;  %vm2566_vm7 = vcmp.eq.s32.totalorder %v4906_v60, %v4489_v24  ;;  %v2441_v7 = vadd.s32 184, %v4477_v21 }
 0x56b   : > { %5898 = vst [vmem:[#allocation75_spill] sm:$0xff] %v4961_v22  ;;  %5900 = vst [vmem:[#allocation77_spill] sm:$0xff] %v4971_v57  ;;  %v4983_v56 = vadd.s32 %v4484_v23, %v2437_v1  ;;  %v4986_v27 = vadd.s32 %v4484_v23, %v2435_v18  ;;  %v2625_v10 = vsel %vm2561_vm12, %v4961_v22, 0.0  ;;  %v4995_v0 = vadd.f32 %v2324_v55, %v4754_v2 }
 0x56c   : > { %v2784_v6 = vmax.f32 %v2780_v52, %v4971_v57  ;;  %v4998_v1 = vadd.s32 %v4484_v23, %v2440_v61  ;;  %v2688_v42 = vadd.f32 %v2687_v40, %v2625_v10  ;;  %vm2567_vm9 = vcmp.eq.s32.totalorder %v4918_v48, %v4489_v24 }
 0x56d   : > { %5901 = vst [vmem:[#allocation78_spill] sm:$0xff] %v4995_v0  ;;  %v3469_v5 = vpop.f32.mrb[12].mxu0  ;;  %v3501_v8 = vpop.f32.mrb[12].mxu1  ;;  %vm2568_vm12 = vcmp.eq.s32.totalorder %v4943_v49, %v4489_v24  ;;  %v5008_v2 = vadd.s32 %v4484_v23, %v2438_v45  ;;  %v2626_v55 = vsel %vm2562_vm10, %v4967_v9, 0.0  ;;  %v5023_v59 = vadd.s32 %v4484_v23, %v2441_v7 }
 0x56e   : > { %v5001_v18 = vadd.f32 %v3501_v8, %v4766_v43  ;;  %v2209_v50 = vpop.f32.mrb[13].mxu0  ;;  %v2337_v13 = vpop.f32.mrb[13].mxu1  ;;  %v2788_v43 = vmax.f32 %v2784_v6, %v4995_v0  ;;  %v2689_v8 = vadd.f32 %v2688_v42, %v2626_v55  ;;  %v2444_v44 = vadd.s32 208, %v4477_v21 }
 0x56f   : > { %v5017_v61 = vadd.f32 %v2209_v50, %v4620_v19  ;;  %v5020_v52 = vadd.f32 %v2337_v13, %v4760_v58  ;;  %v3470_v40 = vpop.f32.mrb[14].mxu0  ;;  %v3502_v10 = vpop.f32.mrb[14].mxu1  ;;  %v2442_v51 = vadd.s32 192, %v4477_v21  ;;  %v2627_v19 = vsel %vm2563_vm5, %v4958_v29, 0.0 }
 0x570   : > { %5902 = vst [vmem:[#allocation79_spill] sm:$0xff] %v5001_v18  ;;  %v2212_v45 = vpop.f32.mrb[15].mxu0  ;;  %v2340_v57 = vpop.f32.mrb[15].mxu1  ;;  %v2792_v58 = vmax.f32 %v2788_v43, %v5001_v18  ;;  %v2445_v6 = vadd.s32 216, %v4477_v21  ;;  %v2690_v7 = vadd.f32 %v2689_v8, %v2627_v19  ;;  %v5038_v42 = vadd.f32 %v3470_v40, %v4636_v33 }
 0x571   : > { %5903 = vst [vmem:[#allocation80_spill] sm:$0xff] %v5017_v61  ;;  %5904 = vst [vmem:[#allocation81_spill] sm:$0xff] %v5020_v52  ;;  %v2628_v13 = vsel %vm2564_vm4, %v5017_v61, 0.0  ;;  %v5041_v50 = vadd.f32 %v2212_v45, %v4618_v17  ;;  %vm2569_vm10 = vcmp.eq.s32.totalorder %v4986_v27, %v4489_v24  ;;  %v2443_v46 = vadd.s32 200, %v4477_v21  ;;  %v5056_v33 = vpop.permute.xlu1 %1892  ;;  %v5058_v17 = vpop.permute.xlu0 %1897 }
 0x572   : > { %5905 = vst [vmem:[#allocation82_spill] sm:$0xff] %v5038_v42  ;;  %v5047_v55 = vadd.f32 %v3469_v5, %v4638_v14  ;;  %v2796_v35 = vmax.f32 %v2792_v58, %v5020_v52  ;;  %v5051_v43 = vadd.f32 %v3502_v10, %v4776_v25  ;;  %v5054_v8 = vadd.s32 %v4484_v23, %v2439_v38 }
 0x573   : > { %5906 = vst [vmem:[#allocation83_spill] sm:$0xff] %v5041_v50  ;;  %v2691_v40 = vadd.f32 %v2690_v7, %v2628_v13  ;;  %vm2570_vm5 = vcmp.eq.s32.totalorder %v4974_v32, %v4489_v24  ;;  %v5063_v45 = vadd.s32 %v4484_v23, %v2444_v44  ;;  %v5066_v14 = vadd.s32 %v4484_v23, %v2442_v51 }
 0x574   : > { %5907 = vst [vmem:[#allocation84_spill] sm:$0xff] %v5047_v55  ;;  %5908 = vst [vmem:[#allocation85_spill] sm:$0xff] %v5051_v43  ;;  %v2446_v25 = vadd.s32 224, %v4477_v21  ;;  %v2800_v5 = vmax.f32 %v2796_v35, %v5051_v43  ;;  %v2629_v38 = vsel %vm2565_vm8, %v5041_v50, 0.0  ;;  %v5075_v10 = vadd.f32 %v2340_v57, %v4764_v41 }
 0x575   : > { %v3473_v19 = vpop.f32.mrb[16].mxu0  ;;  %v3505_v58 = vpop.f32.mrb[16].mxu1  ;;  %v5078_v44 = vadd.s32 %v4484_v23, %v2445_v6  ;;  %v2692_v13 = vadd.f32 %v2691_v40, %v2629_v38  ;;  %vm2571_vm4 = vcmp.eq.s32.totalorder %v4983_v56, %v4489_v24  ;;  %vm2572_vm8 = vcmp.eq.s32.totalorder %v5008_v2, %v4489_v24 }
 0x576   : > { %v5081_v51 = vadd.f32 %v3505_v58, %v4842_v30  ;;  %v2225_v7 = vpop.f32.mrb[17].mxu0  ;;  %v2353_v18 = vpop.f32.mrb[17].mxu1  ;;  %v5088_v41 = vadd.s32 %v4484_v23, %v2443_v46  ;;  %v5091_v15 = vadd.s32 240, %v4477_v21  ;;  %v2630_v30 = vsel %vm2566_vm7, %v5047_v55, 0.0 }
 0x577   : > { %v2804_v57 = vmax.f32 %v2800_v5, %v5075_v10  ;;  %v5099_v6 = vadd.f32 %v2225_v7, %v4657_v54  ;;  %v5102_v35 = vadd.f32 %v2353_v18, %v4778_v16  ;;  %v3474_v40 = vpop.f32.mrb[18].mxu0  ;;  %v3506_v38 = vpop.f32.mrb[18].mxu1  ;;  %v2693_v46 = vadd.f32 %v2692_v13, %v2630_v30 }
 0x578   : > { %v2228_v58 = vpop.f32.mrb[19].mxu0  ;;  %v2356_v43 = vpop.f32.mrb[19].mxu1  ;;  %v5105_v52 = vadd.s32 %v4484_v23, %v2446_v25  ;;  %v5108_v0 = vadd.s32 248, %v4477_v21  ;;  %v5111_v60 = vadd.s32 232, %v4477_v21  ;;  %v2754_v54 = vmax.f32 %v4809_v37, %v4888_v62 }
 0x579   : > { %5909 = vst [vmem:[#allocation86_spill] sm:$0xff] %v5099_v6  ;;  %v2631_v16 = vsel %vm2567_vm9, %v5038_v42, 0.0  ;;  %v2808_v18 = vmax.f32 %v2804_v57, %v5081_v51  ;;  %v2632_v25 = vsel %vm2568_vm12, %v5099_v6, 0.0  ;;  %vm2574_vm7 = vcmp.eq.s32.totalorder %v4998_v1, %v4489_v24 }
 0x57a   : > { %v2752_v5 = vmax.f32 %v4791_v28, %v4870_v11  ;;  %v2694_v13 = vadd.f32 %v2693_v46, %v2631_v16  ;;  %v5129_v7 = vadd.f32 %v3474_v40, %v4669_v39  ;;  %v5132_v48 = vadd.f32 %v2228_v58, %v4655_v36  ;;  %v5145_v46 = vpop.permute.xlu1 %1902  ;;  %v1908_v39 = vpop.permute.xlu0 %1907  ;;  %v5933_v11 = vld [vmem:[#allocation56_spill] sm:$0xff] }
 0x57b   : > { %vm2573_vm9 = vcmp.eq.s32.totalorder %v5054_v8, %v4489_v24  ;;  %v2755_v49 = vmax.f32 %v4800_v63, %v4876_v34  ;;  %v5139_v30 = vadd.f32 %v3473_v19, %v4671_v47  ;;  %v2779_v57 = vmax.f32 %v5102_v35, %v2808_v18  ;;  %v5934_v63 = vld [vmem:[#allocation52_spill] sm:$0xff] }
 0x57c   : > { %v5143_v62 = vadd.f32 %v3506_v38, %v4897_v20  ;;  %v2753_v36 = vmax.f32 %v4814_v53, %v4879_v3  ;;  %v2758_v40 = vmax.f32 %v2754_v54, %v4967_v9  ;;  %v2756_v58 = vmax.f32 %v2752_v5, %v4937_v26  ;;  %v5913_v9 = vld [vmem:[#allocation42_spill] sm:$0xff] }
 0x57d   : > { %5910 = vst [vmem:[#allocation87_spill] sm:$0xff] %v5139_v30  ;;  %v2695_v16 = vadd.f32 %v2694_v13, %v2632_v25  ;;  %v2759_v34 = vmax.f32 %v2755_v49, %v4958_v29  ;;  %v2633_v20 = vsel %vm2569_vm10, %v5132_v48, 0.0  ;;  %v5158_v19 = vadd.f32 %v2356_v43, %v4840_v31  ;;  %v3477_v38 = vpop.f32.mrb[20].mxu0  ;;  %v3509_v18 = vpop.f32.mrb[20].mxu1  ;;  %v5911_v43 = vld [vmem:[#allocation39_spill] sm:$0xff] }
 0x57e   : > { %v2783_v47 = vmax.f32 %v2779_v57, %v5143_v62  ;;  %vm2575_vm12 = vcmp.eq.s32.totalorder %v5023_v59, %v4489_v24  ;;  %v2757_v54 = vmax.f32 %v2753_v36, %v4961_v22  ;;  %v2762_v25 = vmax.f32 %v2758_v40, %v5047_v55  ;;  %v2241_v49 = vpop.f32.mrb[21].mxu0  ;;  %v2369_v57 = vpop.f32.mrb[21].mxu1  ;;  %v5912_v40 = vld [vmem:[#allocation69_spill] sm:$0xff] }
 0x57f   : > { %v2696_v5 = vadd.f32 %v2695_v16, %v2633_v20  ;;  %v5165_v13 = vadd.f32 %v3509_v18, %v4978_v4  ;;  %vm2576_vm10 = vcmp.eq.s32.totalorder %v5066_v14, %v4489_v24  ;;  %v2634_v31 = vsel %vm2570_vm5, %v5139_v30, 0.0  ;;  %v3478_v4 = vpop.f32.mrb[22].mxu0  ;;  %v3510_v20 = vpop.f32.mrb[22].mxu1 }
 0x580   : > { %v2787_v27 = vmax.f32 %v2783_v47, %v5158_v19  ;;  %v5175_v36 = vadd.f32 %v2241_v49, %v5911_v43  ;;  %v5178_v16 = vadd.f32 %v2369_v57, %v5912_v40  ;;  %v2760_v18 = vmax.f32 %v2756_v58, %v5017_v61  ;;  %v2244_v32 = vpop.f32.mrb[23].mxu0  ;;  %v2372_v26 = vpop.f32.mrb[23].mxu1 }
 0x581   : > { %v2763_v55 = vmax.f32 %v2759_v34, %v5038_v42  ;;  %v2697_v29 = vadd.f32 %v2696_v5, %v2634_v31  ;;  %v5183_v22 = vadd.f32 %v3477_v38, %v5913_v9  ;;  %v2761_v47 = vmax.f32 %v2757_v54, %v5041_v50  ;;  %v5914_v38 = vld [vmem:[#allocation41_spill] sm:$0xff]  ;;  %v5915_v31 = vld [vmem:[#allocation38_spill] sm:$0xff]  ;;  %v5927_v50 = vld [vmem:[#allocation51_spill] sm:$0xff] }
 0x582   : > { %v2635_v49 = vsel %vm2571_vm4, %v5129_v7, 0.0  ;;  %v2791_v57 = vmax.f32 %v2787_v27, %v5165_v13  ;;  %v2636_v34 = vsel %vm2572_vm8, %v5175_v36, 0.0  ;;  %v5197_v5 = vadd.f32 %v3478_v4, %v5914_v38 }
 0x583   : > { %v2767_v58 = vmax.f32 %v2763_v55, %v5129_v7  ;;  %v2698_v9 = vadd.f32 %v2697_v29, %v2635_v49  ;;  %v5200_v54 = vadd.f32 %v2244_v32, %v5915_v31  ;;  %vm2577_vm5 = vcmp.eq.s32.totalorder %v5088_v41, %v4489_v24  ;;  %v1913_v55 = vpop.permute.xlu1 %1912  ;;  %v5210_v29 = vpop.permute.xlu0 %1917 }
 0x584   : > { %v2766_v56 = vmax.f32 %v2762_v25, %v5139_v30  ;;  %v2765_v27 = vmax.f32 %v2761_v47, %v5132_v48  ;;  %v2795_v43 = vmax.f32 %v2791_v57, %v5178_v16  ;;  %v5208_v2 = vadd.f32 %v3510_v20, %v5056_v33 }
 0x585   : > { %v2764_v40 = vmax.f32 %v2760_v18, %v5099_v6  ;;  %v2638_v4 = vsel %vm2574_vm7, %v5183_v22, 0.0  ;;  %v2699_v32 = vadd.f32 %v2698_v9, %v2636_v34  ;;  %v2771_v25 = vmax.f32 %v2767_v58, %v5197_v5  ;;  %v3481_v1 = vpop.f32.mrb[24].mxu0  ;;  %v3513_v49 = vpop.f32.mrb[24].mxu1  ;;  %v5916_v58 = vld [vmem:[#allocation49_spill] sm:$0xff] }
 0x586   : > { %vm2578_vm4 = vcmp.eq.s32.totalorder %v5063_v45, %v4489_v24  ;;  %v2799_v47 = vmax.f32 %v2795_v43, %v5208_v2  ;;  %v2637_v33 = vsel %vm2573_vm9, %v5200_v54, 0.0  ;;  %v2769_v20 = vmax.f32 %v2765_v27, %v5200_v54  ;;  %v2257_v8 = vpop.f32.mrb[25].mxu0  ;;  %v2385_v31 = vpop.f32.mrb[25].mxu1 }
 0x587   : > { %v5227_v18 = vadd.f32 %v2372_v26, %v4976_v12  ;;  %vm2579_vm8 = vcmp.eq.s32.totalorder %v5078_v44, %v4489_v24  ;;  %v2770_v57 = vmax.f32 %v2766_v56, %v5183_v22  ;;  %v2700_v34 = vadd.f32 %v2699_v32, %v2637_v33  ;;  %v5917_v12 = vld [vmem:[#allocation46_spill] sm:$0xff]  ;;  %v3482_v6 = vpop.f32.mrb[26].mxu0  ;;  %v3514_v56 = vpop.f32.mrb[26].mxu1 }
 0x588   : > { %v5233_v9 = vadd.f32 %v3481_v1, %v5916_v58  ;;  %v5235_v38 = vadd.f32 %v3513_v49, %v1908_v39  ;;  %v2768_v27 = vmax.f32 %v2764_v40, %v5175_v36  ;;  %v5240_v43 = vadd.f32 %v2257_v8, %v5917_v12  ;;  %v2260_v1 = vpop.f32.mrb[27].mxu0  ;;  %v5920_v8 = vld [vmem:[#allocation50_spill] sm:$0xff]  ;;  %v1923_v14 = vpop.permute.xlu1 %1922 }
 0x589   : > { %v2803_v26 = vmax.f32 %v2799_v47, %v5227_v18  ;;  %v5243_v30 = vadd.f32 %v2385_v31, %v5058_v17  ;;  %v2639_v39 = vsel %vm2575_vm12, %v5197_v5, 0.0  ;;  %v2701_v32 = vadd.f32 %v2700_v34, %v2638_v4  ;;  %v2388_v17 = vpop.f32.mrb[27].mxu1 }
 0x58a   : > { %v5250_v33 = vmax.f32 %v2770_v57, %v5233_v9  ;;  %v5256_v47 = vsel %vm2610_vm2, %v5235_v38, 0.0  ;;  %v2640_v59 = vsel %vm2576_vm10, %v5240_v43, 0.0  ;;  %v5264_v4 = vmax.f32 %v2768_v27, %v5240_v43 }
 0x58b   : > { %v2807_v49 = vmax.f32 %v2803_v26, %v5235_v38  ;;  %v5270_v34 = vsel %vm2608_vm15, %v5243_v30, 0.0  ;;  %v2702_v58 = vadd.f32 %v2701_v32, %v2639_v39  ;;  %v5273_v31 = vadd.f32 %v3482_v6, %v5920_v8  ;;  %v5921_v26 = vld [vmem:[#allocation48_spill] sm:$0xff]  ;;  %v1928_v32 = vpop.permute.xlu0 %1927  ;;  %v5925_v8 = vld [vmem:[#allocation53_spill] sm:$0xff] }
 0x58c   : > { %v5275_v12 = vadd.f32 %v3514_v56, %v1913_v55  ;;  %v5278_v40 = vadd.f32 %v2260_v1, %v5921_v26  ;;  %v5282_v27 = vadd.f32 %v2388_v17, %v5145_v46  ;;  %v2513_v57 = vadd.s32 %v4484_v23, %v5091_v15 }
 0x58d   : > { %v2811_v42 = vmax.f32 %v2807_v49, %v5243_v30  ;;  %v2512_v39 = vadd.s32 %v4484_v23, %v5111_v60  ;;  %v2703_v6 = vadd.f32 %v2702_v58, %v2640_v59  ;;  %v2775_v55 = vmax.f32 %v2771_v25, %v5273_v31  ;;  %v3485_v49 = vpop.f32.mrb[28].mxu0  ;;  %v3517_v59 = vpop.f32.mrb[28].mxu1 }
 0x58e   : > { %v5293_v1 = vsel %vm2611_vm1, %v5275_v12, 0.0  ;;  %v2514_v46 = vadd.s32 %v4484_v23, %v5108_v0  ;;  %v2641_v15 = vsel %vm2577_vm5, %v5278_v40, 0.0  ;;  %v2773_v60 = vmax.f32 %v2769_v20, %v5278_v40  ;;  %v2273_v56 = vpop.f32.mrb[29].mxu0  ;;  %v2401_v20 = vpop.f32.mrb[29].mxu1 }
 0x58f   : > { %5923 = vst [vmem:[#allocation39_spill] sm:$0xff] %v5293_v1  ;;  %v5306_v25 = vsel %vm2609_vm3, %v5282_v27, 0.0  ;;  %vm2580_vm15 = vcmp.eq.s32.totalorder %v5105_v52, %v4489_v24  ;;  %v2813_v58 = vmax.f32 %v2775_v55, %v2811_v42  ;;  %v2704_v0 = vadd.f32 %v2703_v6, %v2641_v15  ;;  %v3486_v42 = vpop.f32.mrb[30].mxu0  ;;  %v3518_v6 = vpop.f32.mrb[30].mxu1 }
 0x590   : > { %v5311_v26 = vadd.f32 %v3485_v49, %v5925_v8  ;;  %v5313_v41 = vadd.f32 %v3517_v59, %v1928_v32  ;;  %v2642_v17 = vsel %vm2578_vm4, %v5233_v9, 0.0  ;;  %v5320_v61 = vadd.f32 %v2273_v56, %v5927_v50  ;;  %v2276_v50 = vpop.f32.mrb[31].mxu0  ;;  %v2404_v49 = vpop.f32.mrb[31].mxu1 }
 0x591   : > { %v5323_v3 = vadd.f32 %v2401_v20, %v5210_v29  ;;  %vm2581_vm1 = vcmp.eq.s32.totalorder %v2512_v39, %v4489_v24  ;;  %v2643_v32 = vsel %vm2579_vm8, %v5273_v31, 0.0  ;;  %v2777_v55 = vmax.f32 %v5275_v12, %v2813_v58  ;;  %v1933_v59 = vpop.permute.xlu1 %1932 }
 0x592   : > { %5926 = vst [vmem:[#allocation69_spill] sm:$0xff] %v5313_v41  ;;  %v2705_v15 = vadd.f32 %v2704_v0, %v2642_v17  ;;  %v2778_v45 = vmax.f32 %v5250_v33, %v5311_v26  ;;  %v5337_v8 = vsel %vm2614_vm0, %v5313_v41, 0.0  ;;  %v2644_v44 = vsel %vm2580_vm15, %v5320_v61, 0.0  ;;  %v5931_v17 = vld [vmem:[#allocation54_spill] sm:$0xff] }
 0x593   : > { %5929 = vst [vmem:[#allocation42_spill] sm:$0xff] %v5337_v8  ;;  %v2776_v58 = vmax.f32 %v5264_v4, %v5320_v61  ;;  %v5349_v33 = vsel %vm2612_vm13, %v5323_v3, 0.0  ;;  %v2781_v56 = vmax.f32 %v2777_v55, %v2773_v60  ;;  %v5352_v29 = vadd.f32 %v3486_v42, %v5931_v17 }
 0x594   : > { %v2706_v20 = vadd.f32 %v2705_v15, %v2643_v32  ;;  %v5354_v8 = vadd.f32 %v3518_v6, %v1933_v59  ;;  %v2515_v52 = vadd.s32 %v4484_v23, %v5933_v11  ;;  %v5359_v1 = vadd.f32 %v2276_v50, %v5934_v63  ;;  %v5943_v63 = vld [vmem:[#allocation59_spill] sm:$0xff] }
 0x595   : > { %v5361_v4 = vadd.f32 %v2404_v49, %v1923_v14  ;;  %v2785_v37 = vmax.f32 %v2781_v56, %v5282_v27  ;;  %vm2582_vm13 = vcmp.eq.s32.totalorder %v2513_v57, %v4489_v24  ;;  %vm2583_vm0 = vcmp.eq.s32.totalorder %v2514_v46, %v4489_v24  ;;  %v5937_v49 = vld [vmem:[#allocation57_spill] sm:$0xff] }
 0x596   : > { %5932 = vst [vmem:[#allocation41_spill] sm:$0xff] %v5354_v8  ;;  %v2707_v0 = vadd.f32 %v2706_v20, %v2644_v44  ;;  %v5369_v42 = vsel %vm2615_vm11, %v5354_v8, 0.0  ;;  %v2645_v23 = vsel %vm2581_vm1, %v5359_v1, 0.0  ;;  %v2646_v6 = vsel %vm2582_vm13, %v5311_v26, 0.0 }
 0x597   : > { %v5378_v11 = vsel %vm2613_vm14, %v5361_v4, 0.0  ;;  %v2789_v14 = vmax.f32 %v2785_v37, %v2778_v45  ;;  %vm2584_vm2 = vcmp.eq.s32.totalorder %v2515_v52, %v4489_v24  ;;  %v2647_v39 = vsel %vm2583_vm0, %v5352_v29, 0.0  ;;  %v5938_v37 = vld [vmem:[#allocation61_spill] sm:$0xff]  ;;  %v5940_v52 = vld [vmem:[#allocation55_spill] sm:$0xff] }
 0x598   : > { %v2708_v57 = vadd.f32 %v2707_v0, %v2645_v23  ;;  %v2648_v59 = vsel %vm2584_vm2, %v5937_v49, 0.0  ;;  %v2649_v46 = vsel %vm2585_vm6, %v5938_v37, 0.0  ;;  %v5941_v0 = vld [vmem:[#allocation12_spill] sm:$0xff] }
 0x599   : > { %v2793_v32 = vmax.f32 %v2789_v14, %v5313_v41  ;;  %vm5942_vm11 = vcmp.eq.s32.totalorder %v5941_v0, %v4489_v24  ;;  %v5944_v14 = vld [vmem:[#allocation13_spill] sm:$0xff]  ;;  %v5953_v0 = vld [vmem:[#allocation15_spill] sm:$0xff] }
 0x59a   : > { %v2709_v55 = vadd.f32 %v2708_v57, %v2646_v6  ;;  %v2650_v60 = vsel %vm5942_vm11, %v5940_v52, 0.0  ;;  %vm5945_vm14 = vcmp.eq.s32.totalorder %v5944_v14, %v4489_v24  ;;  %vm5954_vm7 = vcmp.eq.s32.totalorder %v5953_v0, %v4489_v24  ;;  %v5955_v14 = vld [vmem:[#allocation68_spill] sm:$0xff]  ;;  %v5964_v0 = vld [vmem:[#allocation71_spill] sm:$0xff] }
 0x59b   : > { %v2797_v15 = vmax.f32 %v2793_v32, %v2776_v58  ;;  %v2651_v57 = vsel %vm5945_vm14, %v5943_v63, 0.0  ;;  %v5962_v63 = vld [vmem:[#allocation22_spill] sm:$0xff] }
 0x59c   : > { %v2710_v50 = vadd.f32 %v2709_v55, %v2647_v39  ;;  %v5946_v55 = vld [vmem:[#allocation64_spill] sm:$0xff]  ;;  %vm5963_vm10 = vcmp.eq.s32.totalorder %v5962_v63, %v4489_v24 }
 0x59d   : > { %v2801_v44 = vmax.f32 %v2797_v15, %v5323_v3  ;;  %v5947_v39 = vld [vmem:[#allocation16_spill] sm:$0xff] }
 0x59e   : > { %v2711_v56 = vadd.f32 %v2710_v50, %v2648_v59  ;;  %vm5948_vm6 = vcmp.eq.s32.totalorder %v5947_v39, %v4489_v24 }
 0x59f   : > { %v2805_v20 = vmax.f32 %v2801_v44, %v5352_v29  ;;  %v2652_v15 = vsel %vm5948_vm6, %v5946_v55, 0.0  ;;  %v5949_v44 = vld [vmem:[#allocation70_spill] sm:$0xff]  ;;  %v5959_v55 = vld [vmem:[#allocation20_spill] sm:$0xff] }
 0x5a0   : > { %v2712_v17 = vadd.f32 %v2711_v56, %v2649_v46  ;;  %v5950_v56 = vld [vmem:[#allocation18_spill] sm:$0xff]  ;;  %vm5960_vm12 = vcmp.eq.s32.totalorder %v5959_v55, %v4489_v24  ;;  %v5968_v55 = vld [vmem:[#allocation77_spill] sm:$0xff] }
 0x5a1   : > { %v2809_v58 = vmax.f32 %v2805_v20, %v5354_v8  ;;  %vm5951_vm3 = vcmp.eq.s32.totalorder %v5950_v56, %v4489_v24 }
 0x5a2   : > { %v2713_v23 = vadd.f32 %v2712_v17, %v2650_v60  ;;  %v2653_v45 = vsel %vm5951_vm3, %v5949_v44, 0.0  ;;  %v5952_v17 = vld [vmem:[#allocation62_spill] sm:$0xff] }
 0x5a3   : > { %v2812_v6 = vmax.f32 %v5359_v1, %v2809_v58  ;;  %v2654_v60 = vsel %vm5954_vm7, %v5952_v17, 0.0  ;;  %v5961_v44 = vld [vmem:[#allocation78_spill] sm:$0xff] }
 0x5a4   : > { %v2714_v32 = vadd.f32 %v2713_v23, %v2651_v57  ;;  %v5956_v57 = vld [vmem:[#allocation17_spill] sm:$0xff] }
 0x5a5   : > { %v2814_v59 = vmax.f32 %v2812_v6, %v5361_v4  ;;  %vm5957_vm9 = vcmp.eq.s32.totalorder %v5956_v57, %v4489_v24  ;;  %v5431_v57 = vld [vmem:[#allocation3] sm:$0x1] }
 0x5a6   : > { %v2715_v50 = vadd.f32 %v2714_v32, %v2652_v15  ;;  %v2655_v32 = vsel %vm5957_vm9, %v5955_v14, 0.0  ;;  %v5958_v15 = vld [vmem:[#allocation73_spill] sm:$0xff]  ;;  %5967 = vst [vmem:[#allocation38_spill] sm:$0xff] %v5431_v57 }
 0x5a7   : > { %v2815_v20 = vrot.slane %v2814_v59, 4 }
 0x5a8   : > { %v2716_v46 = vadd.f32 %v2715_v50, %v2653_v45  ;;  %v2656_v50 = vsel %vm5960_vm12, %v5958_v15, 0.0  ;;  %v5969_v15 = vld [vmem:[#allocation21_spill] sm:$0xff] }
 0x5a9   : > { %v2816_v23 = vmax.f32 %v2814_v59, %v2815_v20  ;;  %vm5970_vm4 = vcmp.eq.s32.totalorder %v5969_v15, %v4489_v24 }
 0x5aa   : > { %v2717_v58 = vadd.f32 %v2716_v46, %v2654_v60  ;;  %v2657_v46 = vsel %vm5963_vm10, %v5961_v44, 0.0  ;;  %v5965_v60 = vld [vmem:[#allocation19_spill] sm:$0xff] }
 0x5ab   : > { %v2817_v39 = vrot.slane %v2816_v23, 2  ;;  %vm5966_vm5 = vcmp.eq.s32.totalorder %v5965_v60, %v4489_v24 }
 0x5ac   : > { %v2718_v6 = vadd.f32 %v2717_v58, %v2655_v32  ;;  %v2658_v58 = vsel %vm5966_vm5, %v5964_v0, 0.0 }
 0x5ad   : > { %v2818_v45 = vmax.f32 %v2816_v23, %v2817_v39  ;;  %v2659_v23 = vsel %vm5970_vm4, %v5968_v55, 0.0  ;;  %v5972_v39 = vld [vmem:[#allocation81_spill] sm:$0xff] }
 0x5ae   : > { %v2719_v56 = vadd.f32 %v2718_v6, %v2656_v50  ;;  %v5973_v50 = vld [vmem:[#allocation24_spill] sm:$0xff] }
 0x5af   : > { %v2819_v20 = vrot.slane %v2818_v45, 1  ;;  %vm5974_vm8 = vcmp.eq.s32.totalorder %v5973_v50, %v4489_v24  ;;  %v5981_v50 = vld [vmem:[#allocation85_spill] sm:$0xff] }
 0x5b0   : > { %v2720_v59 = vadd.f32 %v2719_v56, %v2657_v46  ;;  %v2660_v56 = vsel %vm5974_vm8, %v5972_v39, 0.0 }
 0x5b1   : > { %v2820_v14 = vmax.f32 %v2818_v45, %v2819_v20  ;;  %v5975_v45 = vld [vmem:[#allocation26_spill] sm:$0xff]  ;;  %v5977_v20 = vld [vmem:[#allocation79_spill] sm:$0xff] }
 0x5b2   : > { %v2721_v32 = vadd.f32 %v2720_v59, %v2658_v58  ;;  %vm5976_vm15 = vcmp.eq.s32.totalorder %v5975_v45, %v4489_v24  ;;  %v5984_v45 = vld [vmem:[#allocation28_spill] sm:$0xff] }
 0x5b3   : > { %v5438_v63 = vmax.f32 %v5431_v57, %v2820_v14  ;;  %v2661_v15 = vsel %vm5976_vm15, %v5075_v10, 0.0  ;;  %v5978_v14 = vld [vmem:[#allocation23_spill] sm:$0xff]  ;;  %vm5985_vm0 = vcmp.eq.s32.totalorder %v5984_v45, %v4489_v24  ;;  %v5994_v45 = vld [vmem:[#allocation34_spill] sm:$0xff] }
 0x5b4   : > { %v2722_v6 = vadd.f32 %v2721_v32, %v2659_v23  ;;  %vm5979_vm1 = vcmp.eq.s32.totalorder %v5978_v14, %v4489_v24  ;;  %v5980_v32 = vsub.s32 0, %v4477_v21  ;;  %vm5995_vm3 = vcmp.eq.s32.totalorder %v5994_v45, %v4489_v24 }
 0x5b5   : > { %5971 = vst [vmem:[#allocation49_spill] sm:$0xff] %v5438_v63  ;;  %3096 = vst [vmem:[#allocation3] sm:$0x1] %v5438_v63  ;;  %v2662_v58 = vsel %vm5979_vm1, %v5977_v20, 0.0 }
 0x5b6   : > { %v2723_v46 = vadd.f32 %v2722_v6, %v2660_v56  ;;  %v5458_v23 = vrot.slane %v5438_v63, %v5980_v32  ;;  %v5982_v56 = vld [vmem:[#allocation25_spill] sm:$0xff]  ;;  %v6001_v63 = vld [vmem:[#allocation39_spill] sm:$0xff] }
 0x5b7   : > { %vm5983_vm13 = vcmp.eq.s32.totalorder %v5982_v56, %v4489_v24 }
 0x5b8   : > { %v2724_v59 = vadd.f32 %v2723_v46, %v2661_v15  ;;  %v2663_v60 = vsel %vm5983_vm13, %v5981_v50, 0.0  ;;  %v2664_v46 = vsel %vm5985_vm0, %v5102_v35, 0.0  ;;  %v5986_v15 = vld [vmem:[#allocation30_spill] sm:$0xff] }
 0x5b9   : > { %vm5987_vm2 = vcmp.eq.s32.totalorder %v5986_v15, %v4489_v24 }
 0x5ba   : > { %v2725_v6 = vadd.f32 %v2724_v59, %v2662_v58  ;;  %v2665_v21 = vsel %vm5987_vm2, %v5158_v19, 0.0  ;;  %v5992_v58 = vld [vmem:[#allocation32_spill] sm:$0xff] }
 0x5bb   : > { %vm5993_vm6 = vcmp.eq.s32.totalorder %v5992_v58, %v4489_v24 }
 0x5bc   : > { %v2726_v57 = vadd.f32 %v2725_v6, %v2663_v60  ;;  %v5988_v6 = vld [vmem:[#allocation27_spill] sm:$0xff]  ;;  %v5990_v60 = vld [vmem:[#allocation29_spill] sm:$0xff] }
 0x5bd   : > { %vm5989_vm11 = vcmp.eq.s32.totalorder %v5988_v6, %v4489_v24  ;;  %vm5991_vm14 = vcmp.eq.s32.totalorder %v5990_v60, %v4489_v24  ;;  %v2668_v6 = vsel %vm5993_vm6, %v5178_v16, 0.0 }
 0x5be   : > { %v2727_v59 = vadd.f32 %v2726_v57, %v2664_v46  ;;  %v2666_v56 = vsel %vm5989_vm11, %v5081_v51, 0.0  ;;  %v2667_v32 = vsel %vm5991_vm14, %v5143_v62, 0.0 }
 0x5c0   : > { %v2728_v46 = vadd.f32 %v2727_v59, %v2665_v21  ;;  %v2669_v21 = vsel %vm5995_vm3, %v5227_v18, 0.0  ;;  %v5996_v59 = vld [vmem:[#allocation31_spill] sm:$0xff] }
 0x5c1   : > { %vm5997_vm7 = vcmp.eq.s32.totalorder %v5996_v59, %v4489_v24  ;;  %v2834_v59 = vsub.f32 %v4814_v53, %v5458_v23 }
 0x5c2   : > { %v2729_v15 = vadd.f32 %v2728_v46, %v2666_v56  ;;  %v2670_v56 = vsel %vm5997_vm7, %v5165_v13, 0.0 }
 0x5c3   : > { %v2899_v60 = vmul.f32 1.442695, %v2834_v59  ;;  %v6005_v59 = vld [vmem:[#allocation42_spill] sm:$0xff] }
 0x5c4   : > { %v2730_v57 = vadd.f32 %v2729_v15, %v2667_v32 }
 0x5c6   : > { %v2731_v14 = vadd.f32 %v2730_v57, %v2668_v6 }
 0x5c8   : > { %v2732_v46 = vadd.f32 %v2731_v14, %v2669_v21  ;;  %v5998_v21 = vld [vmem:[#allocation33_spill] sm:$0xff] }
 0x5c9   : > { %vm5999_vm9 = vcmp.eq.s32.totalorder %v5998_v21, %v4489_v24  ;;  %v6000_v24 = vld [vmem:[#allocation60_spill] sm:$0xff] }
 0x5ca   : > { %v2733_v45 = vadd.f32 %v2732_v46, %v2670_v56  ;;  %v2671_v6 = vsel %vm5999_vm9, %v5208_v2, 0.0  ;;  %v2833_v46 = vsub.f32 %v4791_v28, %v5458_v23  ;;  %v2835_v21 = vsub.f32 %v6000_v24, %v5458_v23  ;;  %v6003_v28 = vld [vmem:[#allocation63_spill] sm:$0xff] }
 0x5cb   : > { %v2837_v53 = vsub.f32 %v6003_v28, %v5458_v23 }
 0x5cc   : > { %v2734_v32 = vadd.f32 %v2733_v45, %v2671_v6  ;;  %v2897_v57 = vmul.f32 1.442695, %v2833_v46  ;;  %v6002_v45 = vld [vmem:[#allocation58_spill] sm:$0xff] }
 0x5cd   : > { %v2905_v24 = vmul.f32 1.442695, %v2837_v53 }
 0x5ce   : > { %v2735_v56 = vadd.f32 %v2734_v32, %v5270_v34  ;;  %v2836_v34 = vsub.f32 %v6002_v45, %v5458_v23  ;;  %3661 = vpow2.f32 %v2897_v57 }
 0x5cf   : > { %3663 = vpow2.f32 %v2899_v60 }
 0x5d0   : > { %v2736_v15 = vadd.f32 %v2735_v56, %v5306_v25  ;;  %v2901_v25 = vmul.f32 1.442695, %v2835_v21  ;;  %v2903_v56 = vmul.f32 1.442695, %v2836_v34 }
 0x5d2   : > { %v2737_v14 = vadd.f32 %v2736_v15, %v5256_v47  ;;  %v6004_v15 = vld [vmem:[#allocation66_spill] sm:$0xff]  ;;  %3665 = vpow2.f32 %v2901_v25 }
 0x5d3   : > { %v2838_v6 = vsub.f32 %v6004_v15, %v5458_v23  ;;  %3667 = vpow2.f32 %v2903_v56  ;;  %v6009_v15 = vld [vmem:[#allocation75_spill] sm:$0xff] }
 0x5d4   : > { %v2738_v58 = vadd.f32 %v2737_v14, %v6001_v63  ;;  %v6006_v63 = vld [vmem:[#allocation67_spill] sm:$0xff]  ;;  %3669 = vpow2.f32 %v2905_v24  ;;  %v2842_v25 = vsub.f32 %v6009_v15, %v5458_v23  ;;  %v6011_v24 = vld [vmem:[#allocation74_spill] sm:$0xff] }
 0x5d5   : > { %v2839_v14 = vsub.f32 %v6006_v63, %v5458_v23  ;;  %v2907_v60 = vmul.f32 1.442695, %v2838_v6  ;;  %v2547_v15 = vld [vmem:[#allocation5] sm:$0x1] }
 0x5d6   : > { %v2739_v32 = vadd.f32 %v2738_v58, %v5349_v33  ;;  %v6007_v58 = vld [vmem:[#allocation65_spill] sm:$0xff] }
 0x5d7   : > { %v2840_v57 = vsub.f32 %v6007_v58, %v5458_v23  ;;  %v2909_v34 = vmul.f32 1.442695, %v2839_v14  ;;  %3671 = vpow2.f32 %v2907_v60  ;;  %v2844_v14 = vsub.f32 %v6011_v24, %v5458_v23 }
 0x5d8   : > { %v2740_v47 = vadd.f32 %v2739_v32, %v5378_v11  ;;  %v6008_v11 = vld [vmem:[#allocation72_spill] sm:$0xff]  ;;  %v3662_v32 = vpop.eup %3661 }
 0x5d9   : > { %v2841_v45 = vsub.f32 %v6008_v11, %v5458_v23  ;;  %v2911_v53 = vmul.f32 1.442695, %v2840_v57  ;;  %3673 = vpow2.f32 %v2909_v34  ;;  %v6012_v57 = vld [vmem:[#allocation80_spill] sm:$0xff] }
 0x5da   : > { %v2741_v46 = vadd.f32 %v2740_v47, %v6005_v59  ;;  %v3664_v47 = vpop.eup %3663  ;;  %v6010_v59 = vld [vmem:[#allocation76_spill] sm:$0xff]  ;;  %v2845_v60 = vsub.f32 %v6012_v57, %v5458_v23 }
 0x5db   : > { %v2913_v6 = vmul.f32 1.442695, %v2841_v45  ;;  %v3025_v63 = vadd.f32 %v3664_v47, %v3662_v32  ;;  %3675 = vpow2.f32 %v2911_v53  ;;  %v6013_v32 = vld [vmem:[#allocation83_spill] sm:$0xff]  ;;  %v2919_v47 = vmul.f32 1.442695, %v2844_v14  ;;  %v6016_v14 = vld [vmem:[#allocation86_spill] sm:$0xff] }
 0x5dc   : > { %v2742_v33 = vadd.f32 %v2741_v46, %v5369_v42  ;;  %v2843_v46 = vsub.f32 %v6010_v59, %v5458_v23  ;;  %v3666_v58 = vpop.eup %3665  ;;  %v2921_v24 = vmul.f32 1.442695, %v2845_v60 }
 0x5dd   : > { %v3026_v11 = vadd.f32 %v3666_v58, %v3025_v63  ;;  %v3668_v8 = vpop.eup %3667  ;;  %3677 = vpow2.f32 %v2913_v6  ;;  %v6014_v63 = vld [vmem:[#allocation84_spill] sm:$0xff] }
 0x5de   : > { %v2743_v21 = vrot.slane %v2742_v33, 4  ;;  %v2917_v41 = vmul.f32 1.442695, %v2843_v46  ;;  %v3670_v45 = vpop.eup %3669  ;;  %v2847_v58 = vsub.f32 %v6014_v63, %v5458_v23  ;;  %v6015_v46 = vld [vmem:[#allocation82_spill] sm:$0xff] }
 0x5df   : > { %v3027_v34 = vadd.f32 %v3668_v8, %v3026_v11  ;;  %v2848_v8 = vsub.f32 %v6015_v46, %v5458_v23 }
 0x5e0   : > { %v2744_v28 = vadd.f32 %v2743_v21, %v2742_v33  ;;  %v2915_v33 = vmul.f32 1.442695, %v2842_v25 }
 0x5e1   : > { %v3028_v53 = vadd.f32 %v3670_v45, %v3027_v34  ;;  %v3672_v25 = vpop.eup %3671 }
 0x5e2   : > { %v2745_v42 = vrot.slane %v2744_v28, 2  ;;  %3679 = vpow2.f32 %v2915_v33  ;;  %v2849_v33 = vsub.f32 %v6016_v14, %v5458_v23  ;;  %v6020_v14 = vsub.f32 %v5175_v36, %v5458_v23 }
 0x5e3   : > { %3681 = vpow2.f32 %v2917_v41  ;;  %v3029_v57 = vadd.f32 %v3672_v25, %v3028_v53  ;;  %v3674_v6 = vpop.eup %3673  ;;  %v2927_v41 = vmul.f32 1.442695, %v2848_v8  ;;  %v6018_v25 = vsub.f32 %v5132_v48, %v5458_v23 }
 0x5e4   : > { %v2746_v56 = vadd.f32 %v2745_v42, %v2744_v28  ;;  %v2846_v28 = vsub.f32 %v6013_v32, %v5458_v23  ;;  %3683 = vpow2.f32 %v2919_v47  ;;  %v6017_v32 = vld [vmem:[#allocation87_spill] sm:$0xff]  ;;  %v2929_v53 = vmul.f32 1.442695, %v2849_v33 }
 0x5e5   : > { %v3676_v11 = vpop.eup %3675  ;;  %3685 = vpow2.f32 %v2921_v24  ;;  %v2931_v63 = vmul.f32 1.442695, %v6018_v25  ;;  %v6019_v8 = vsub.f32 %v5129_v7, %v5458_v23  ;;  %v2937_v33 = vmul.f32 1.442695, %v6020_v14 }
 0x5e6   : > { %v2747_v21 = vrot.slane %v2746_v56, 1  ;;  %v6022_v7 = vsub.f32 %v5183_v22, %v5458_v23  ;;  %v6023_v36 = vsub.f32 %v5197_v5, %v5458_v23  ;;  %v6025_v22 = vsub.f32 %v5278_v40, %v5458_v23 }
 0x5e7   : > { %v3678_v34 = vpop.eup %3677  ;;  %v6026_v5 = vsub.f32 %v5233_v9, %v5458_v23  ;;  %v6028_v40 = vsub.f32 %v5320_v61, %v5458_v23  ;;  %v6029_v9 = vsub.f32 %v5359_v1, %v5458_v23  ;;  %v6031_v1 = vsub.f32 %v5352_v29, %v5458_v23 }
 0x5e8   : > { %v2748_v59 = vadd.f32 %v2747_v21, %v2746_v56  ;;  %v2923_v56 = vmul.f32 1.442695, %v2846_v28  ;;  %v3030_v21 = vadd.f32 %v3674_v6, %v3029_v57 }
 0x5ea   : > { %v2749_v42 = vadd.f32 %v2748_v59, %v2547_v15  ;;  %v2925_v15 = vmul.f32 1.442695, %v2847_v58  ;;  %v3031_v59 = vadd.f32 %v3676_v11, %v3030_v21  ;;  %3687 = vpow2.f32 %v2923_v56 }
 0x5eb   : > { %v2935_v56 = vmul.f32 1.442695, %v6019_v8 }
 0x5ec   : > { %2750 = vst [vmem:[#allocation5] sm:$0x1] %v2749_v42  ;;  %v3032_v60 = vadd.f32 %v3678_v34, %v3031_v59  ;;  %v3680_v45 = vpop.eup %3679  ;;  %v2851_v42 = vsub.f32 %v6017_v32, %v5458_v23  ;;  %3689 = vpow2.f32 %v2925_v15  ;;  %v6021_v59 = vsub.f32 %v5200_v54, %v5458_v23 }
 0x5ed   : > { %v3682_v28 = vpop.eup %3681  ;;  %3691 = vpow2.f32 %v2927_v41  ;;  %v6024_v54 = vsub.f32 %v5240_v43, %v5458_v23  ;;  %v6027_v43 = vsub.f32 %v5273_v31, %v5458_v23  ;;  %v2865_v31 = vsub.f32 %v5937_v49, %v5458_v23 }
 0x5ee   : > { %v3033_v47 = vadd.f32 %v3680_v45, %v3032_v60  ;;  %v3684_v58 = vpop.eup %3683  ;;  %3693 = vpow2.f32 %v2929_v53  ;;  %v2933_v57 = vmul.f32 1.442695, %v2851_v42  ;;  %v2939_v34 = vmul.f32 1.442695, %v6021_v59 }
 0x5ef   : > { %v3686_v46 = vpop.eup %3685  ;;  %3695 = vpow2.f32 %v2931_v63  ;;  %v2941_v45 = vmul.f32 1.442695, %v6022_v7  ;;  %v2943_v53 = vmul.f32 1.442695, %v6023_v36  ;;  %v2945_v25 = vmul.f32 1.442695, %v6024_v54 }
 0x5f0   : > { %v3034_v24 = vadd.f32 %v3682_v28, %v3033_v47  ;;  %3697 = vpow2.f32 %v2933_v57  ;;  %v2955_v59 = vmul.f32 1.442695, %v6029_v9  ;;  %v2867_v49 = vsub.f32 %v5940_v52, %v5458_v23  ;;  %v6032_v54 = vld [vmem:[#allocation59_spill] sm:$0xff]  ;;  %v6034_v52 = vld [vmem:[#allocation70_spill] sm:$0xff] }
 0x5f1   : > { %3699 = vpow2.f32 %v2935_v56 }
 0x5f2   : > { %v3035_v6 = vadd.f32 %v3684_v58, %v3034_v24  ;;  %3701 = vpow2.f32 %v2937_v33  ;;  %v2947_v58 = vmul.f32 1.442695, %v6025_v22  ;;  %v2953_v33 = vmul.f32 1.442695, %v6028_v40  ;;  %v6033_v22 = vld [vmem:[#allocation64_spill] sm:$0xff] }
 0x5f3   : > { %3703 = vpow2.f32 %v2939_v34  ;;  %v2869_v29 = vsub.f32 %v6033_v22, %v5458_v23  ;;  %v6035_v40 = vld [vmem:[#allocation68_spill] sm:$0xff] }
 0x5f4   : > { %v3036_v21 = vadd.f32 %v3686_v46, %v3035_v6  ;;  %v3688_v11 = vpop.eup %3687  ;;  %3705 = vpow2.f32 %v2941_v45  ;;  %v2949_v46 = vmul.f32 1.442695, %v6026_v5  ;;  %v2870_v5 = vsub.f32 %v6034_v52, %v5458_v23 }
 0x5f5   : > { %3707 = vpow2.f32 %v2943_v53 }
 0x5f6   : > { %v3037_v48 = vadd.f32 %v3688_v11, %v3036_v21  ;;  %v3690_v15 = vpop.eup %3689  ;;  %3709 = vpow2.f32 %v2945_v25  ;;  %v2951_v21 = vmul.f32 1.442695, %v6027_v43  ;;  %v2868_v25 = vsub.f32 %v6032_v54, %v5458_v23 }
 0x5f7   : > { %v3692_v60 = vpop.eup %3691  ;;  %3711 = vpow2.f32 %v2947_v58  ;;  %v2965_v58 = vmul.f32 1.442695, %v2867_v49  ;;  %v2871_v43 = vsub.f32 %v5952_v17, %v5458_v23  ;;  %v2874_v17 = vsub.f32 %v5961_v44, %v5458_v23 }
 0x5f8   : > { %v3038_v41 = vadd.f32 %v3690_v15, %v3037_v48  ;;  %v3694_v42 = vpop.eup %3693  ;;  %3713 = vpow2.f32 %v2949_v46  ;;  %v2967_v46 = vmul.f32 1.442695, %v2868_v25  ;;  %v2877_v44 = vsub.f32 %v5972_v39, %v5458_v23 }
 0x5f9   : > { %v3696_v28 = vpop.eup %3695  ;;  %3715 = vpow2.f32 %v2951_v21  ;;  %v2969_v21 = vmul.f32 1.442695, %v2869_v29  ;;  %v2979_v49 = vmul.f32 1.442695, %v2874_v17  ;;  %v2880_v39 = vsub.f32 %v5981_v50, %v5458_v23 }
 0x5fa   : > { %v3039_v32 = vadd.f32 %v3692_v60, %v3038_v41  ;;  %v3698_v24 = vpop.eup %3697  ;;  %3717 = vpow2.f32 %v2953_v33  ;;  %v6030_v60 = vsub.f32 %v5311_v26, %v5458_v23  ;;  %v2872_v33 = vsub.f32 %v6035_v40, %v5458_v23 }
 0x5fb   : > { %v3700_v6 = vpop.eup %3699  ;;  %3719 = vpow2.f32 %v2955_v59  ;;  %v6036_v59 = vld [vmem:[#allocation73_spill] sm:$0xff]  ;;  %v2985_v22 = vmul.f32 1.442695, %v2877_v44  ;;  %v2883_v50 = vsub.f32 %v5081_v51, %v5458_v23  ;;  %v2886_v51 = vsub.f32 %v5227_v18, %v5458_v23 }
 0x5fc   : > { %v3040_v47 = vadd.f32 %v3694_v42, %v3039_v32  ;;  %v3702_v56 = vpop.eup %3701  ;;  %v2957_v7 = vmul.f32 1.442695, %v6030_v60  ;;  %v2866_v32 = vsub.f32 %v5938_v37, %v5458_v23  ;;  %v2959_v42 = vmul.f32 1.442695, %v6031_v1 }
 0x5fd   : > { %v3704_v14 = vpop.eup %3703 }
 0x5fe   : > { %v3041_v63 = vadd.f32 %v3696_v28, %v3040_v47  ;;  %v3706_v15 = vpop.eup %3705  ;;  %3721 = vpow2.f32 %v2957_v7  ;;  %v2961_v47 = vmul.f32 1.442695, %v2865_v31  ;;  %v2975_v7 = vmul.f32 1.442695, %v2872_v33 }
 0x5ff   : > { %v3708_v41 = vpop.eup %3707  ;;  %3723 = vpow2.f32 %v2959_v42 }
 0x600   : > { %v3042_v57 = vadd.f32 %v3698_v24, %v3041_v63  ;;  %v3710_v61 = vpop.eup %3709  ;;  %v2963_v63 = vmul.f32 1.442695, %v2866_v32  ;;  %3725 = vpow2.f32 %v2961_v47  ;;  %v2875_v32 = vsub.f32 %v5964_v0, %v5458_v23 }
 0x601   : > { %v3712_v53 = vpop.eup %3711  ;;  %v2878_v0 = vsub.f32 %v5075_v10, %v5458_v23  ;;  %v2881_v10 = vsub.f32 %v5102_v35, %v5458_v23  ;;  %v2884_v35 = vsub.f32 %v5143_v62, %v5458_v23  ;;  %v2887_v62 = vsub.f32 %v5165_v13, %v5458_v23 }
 0x602   : > { %v3043_v8 = vadd.f32 %v3700_v6, %v3042_v57  ;;  %v3714_v26 = vpop.eup %3713  ;;  %3727 = vpow2.f32 %v2963_v63  ;;  %v6037_v13 = vsub.f32 %v5243_v30, %v5458_v23  ;;  %v6040_v30 = vsub.f32 %v5275_v12, %v5458_v23 }
 0x603   : > { %v3716_v24 = vpop.eup %3715  ;;  %3729 = vpow2.f32 %v2965_v58  ;;  %v3005_v18 = vmul.f32 1.442695, %v2887_v62 }
 0x604   : > { %v3044_v11 = vadd.f32 %v3702_v56, %v3043_v8  ;;  %v3718_v6 = vpop.eup %3717  ;;  %3731 = vpow2.f32 %v2967_v46 }
 0x605   : > { %v3720_v56 = vpop.eup %3719  ;;  %3733 = vpow2.f32 %v2969_v21 }
 0x606   : > { %v3045_v48 = vadd.f32 %v3704_v14, %v3044_v11 }
 0x608   : > { %v3046_v34 = vadd.f32 %v3706_v15, %v3045_v48  ;;  %v3722_v14 = vpop.eup %3721  ;;  %v2971_v48 = vmul.f32 1.442695, %v2870_v5 }
 0x609   : > { %v3724_v9 = vpop.eup %3723 }
 0x60a   : > { %v3047_v45 = vadd.f32 %v3708_v41, %v3046_v34  ;;  %v2873_v34 = vsub.f32 %v6036_v59, %v5458_v23  ;;  %v2973_v41 = vmul.f32 1.442695, %v2871_v43  ;;  %v3726_v60 = vpop.eup %3725  ;;  %3735 = vpow2.f32 %v2971_v48 }
 0x60c   : > { %v3048_v36 = vadd.f32 %v3710_v61, %v3047_v45  ;;  %v3728_v61 = vpop.eup %3727  ;;  %3737 = vpow2.f32 %v2973_v41  ;;  %v2977_v1 = vmul.f32 1.442695, %v2873_v34  ;;  %v2999_v41 = vmul.f32 1.442695, %v2884_v35 }
 0x60d   : > { %3739 = vpow2.f32 %v2975_v7 }
 0x60e   : > { %v3049_v28 = vadd.f32 %v3712_v53, %v3048_v36  ;;  %v3730_v36 = vpop.eup %3729  ;;  %v2876_v53 = vsub.f32 %v5968_v55, %v5458_v23  ;;  %3741 = vpow2.f32 %v2977_v1  ;;  %v2879_v55 = vsub.f32 %v5977_v20, %v5458_v23 }
 0x60f   : > { %3743 = vpow2.f32 %v2979_v49  ;;  %v2882_v20 = vsub.f32 %v5158_v19, %v5458_v23  ;;  %v2885_v19 = vsub.f32 %v5178_v16, %v5458_v23  ;;  %v2888_v16 = vsub.f32 %v5208_v2, %v5458_v23 }
 0x610   : > { %v3050_v37 = vadd.f32 %v3714_v26, %v3049_v28  ;;  %v3732_v28 = vpop.eup %3731  ;;  %v2981_v26 = vmul.f32 1.442695, %v2875_v32  ;;  %v2983_v63 = vmul.f32 1.442695, %v2876_v53  ;;  %v2989_v5 = vmul.f32 1.442695, %v2879_v55 }
 0x611   : > { %v3734_v25 = vpop.eup %3733  ;;  %v2995_v33 = vmul.f32 1.442695, %v2882_v20  ;;  %v3001_v17 = vmul.f32 1.442695, %v2885_v19  ;;  %v3007_v53 = vmul.f32 1.442695, %v2888_v16  ;;  %v6038_v2 = vsub.f32 %v5282_v27, %v5458_v23 }
 0x612   : > { %v3051_v57 = vadd.f32 %v3716_v24, %v3050_v37  ;;  %3745 = vpow2.f32 %v2981_v26  ;;  %v6041_v27 = vsub.f32 %v5323_v3, %v5458_v23 }
 0x613   : > { %3747 = vpow2.f32 %v2983_v63  ;;  %v6039_v63 = vsub.f32 %v5235_v38, %v5458_v23  ;;  %v6042_v38 = vsub.f32 %v5361_v4, %v5458_v23 }
 0x614   : > { %v3052_v8 = vadd.f32 %v3718_v6, %v3051_v57  ;;  %v3736_v24 = vpop.eup %3735  ;;  %v2987_v57 = vmul.f32 1.442695, %v2878_v0  ;;  %3749 = vpow2.f32 %v2985_v22  ;;  %v3015_v22 = vmul.f32 1.442695, %v6040_v30 }
 0x616   : > { %v3053_v11 = vadd.f32 %v3720_v56, %v3052_v8  ;;  %v3738_v58 = vpop.eup %3737  ;;  %3751 = vpow2.f32 %v2987_v57  ;;  %v2991_v56 = vmul.f32 1.442695, %v2880_v39  ;;  %v3017_v39 = vmul.f32 1.442695, %v6041_v27 }
 0x617   : > { %v3740_v52 = vpop.eup %3739  ;;  %3753 = vpow2.f32 %v2989_v5 }
 0x618   : > { %v3054_v15 = vadd.f32 %v3722_v14, %v3053_v11  ;;  %v3742_v8 = vpop.eup %3741  ;;  %v2993_v11 = vmul.f32 1.442695, %v2881_v10  ;;  %3755 = vpow2.f32 %v2991_v56 }
 0x619   : > { %v3744_v21 = vpop.eup %3743 }
 0x61a   : > { %v3055_v31 = vadd.f32 %v3724_v9, %v3054_v15  ;;  %3757 = vpow2.f32 %v2993_v11  ;;  %v2997_v9 = vmul.f32 1.442695, %v2883_v50 }
 0x61b   : > { %3759 = vpow2.f32 %v2995_v33 }
 0x61c   : > { %v3056_v45 = vadd.f32 %v3726_v60, %v3055_v31  ;;  %v3746_v40 = vpop.eup %3745  ;;  %3761 = vpow2.f32 %v2997_v9  ;;  %v6047_v9 = vld [vmem:[#allocation38_spill] sm:$0xff] }
 0x61d   : > { %v3748_v15 = vpop.eup %3747  ;;  %3763 = vpow2.f32 %v2999_v41 }
 0x61e   : > { %v3057_v42 = vadd.f32 %v3728_v61, %v3056_v45  ;;  %v3750_v34 = vpop.eup %3749  ;;  %v3003_v61 = vmul.f32 1.442695, %v2886_v51  ;;  %3765 = vpow2.f32 %v3001_v17 }
 0x620   : > { %v3058_v47 = vadd.f32 %v3730_v36, %v3057_v42  ;;  %v3752_v60 = vpop.eup %3751  ;;  %3767 = vpow2.f32 %v3003_v61 }
 0x621   : > { %v3754_v45 = vpop.eup %3753  ;;  %3769 = vpow2.f32 %v3005_v18 }
 0x622   : > { %v3059_v54 = vadd.f32 %v3732_v28, %v3058_v47  ;;  %v3756_v1 = vpop.eup %3755  ;;  %v3009_v28 = vmul.f32 1.442695, %v6037_v13  ;;  %3771 = vpow2.f32 %v3007_v53 }
 0x624   : > { %v3060_v37 = vadd.f32 %v3734_v25, %v3059_v54  ;;  %v3758_v36 = vpop.eup %3757  ;;  %v3011_v54 = vmul.f32 1.442695, %v6038_v2  ;;  %3773 = vpow2.f32 %v3009_v28  ;;  %v3107_v28 = vld [vmem:[#allocation5] sm:$0x1] (!%p3283_p13) }
 0x625   : > { %v3760_v47 = vpop.eup %3759 }
 0x626   : > { %v3061_v29 = vadd.f32 %v3736_v24, %v3060_v37  ;;  %v3762_v26 = vpop.eup %3761  ;;  %v3013_v37 = vmul.f32 1.442695, %v6039_v63  ;;  %3775 = vpow2.f32 %v3011_v54 }
 0x627   : > { %v3764_v0 = vpop.eup %3763 }
 0x628   : > { %v3062_v6 = vadd.f32 %v3738_v58, %v3061_v29  ;;  %v3766_v55 = vpop.eup %3765  ;;  %3777 = vpow2.f32 %v3013_v37 }
 0x629   : > { %3779 = vpow2.f32 %v3015_v22 }
 0x62a   : > { %v3063_v46 = vadd.f32 %v3740_v52, %v3062_v6  ;;  %v3768_v58 = vpop.eup %3767  ;;  %v3019_v52 = vmul.f32 1.442695, %v6042_v38  ;;  %3781 = vpow2.f32 %v3017_v39 }
 0x62b   : > { %v3770_v6 = vpop.eup %3769 }
 0x62c   : > { %v3064_v43 = vadd.f32 %v3742_v8, %v3063_v46  ;;  %v3772_v5 = vpop.eup %3771  ;;  %v6043_v46 = vld [vmem:[#allocation69_spill] sm:$0xff]  ;;  %3783 = vpow2.f32 %v3019_v52 }
 0x62d   : > { %v6044_v12 = vsub.f32 %v6043_v46, %v5458_v23 }
 0x62e   : > { %v3065_v14 = vadd.f32 %v3744_v21, %v3064_v43  ;;  %v3774_v56 = vpop.eup %3773  ;;  %v6045_v43 = vld [vmem:[#allocation41_spill] sm:$0xff] }
 0x62f   : > { %v3021_v8 = vmul.f32 1.442695, %v6044_v12  ;;  %v6046_v3 = vsub.f32 %v6045_v43, %v5458_v23 }
 0x630   : > { %v3066_v48 = vadd.f32 %v3746_v40, %v3065_v14  ;;  %v3776_v11 = vpop.eup %3775 }
 0x631   : > { %v3023_v21 = vmul.f32 1.442695, %v6046_v3  ;;  %3785 = vpow2.f32 %v3021_v8 }
 0x632   : > { %v3067_v59 = vadd.f32 %v3748_v15, %v3066_v48  ;;  %v3778_v4 = vpop.eup %3777 }
 0x633   : > { %3787 = vpow2.f32 %v3023_v21  ;;  %v3780_v35 = vpop.eup %3779 }
 0x634   : > { %v3068_v31 = vadd.f32 %v3750_v34, %v3067_v59  ;;  %v3782_v48 = vpop.eup %3781  ;;  %v6048_v59 = vld [vmem:[#allocation49_spill] sm:$0xff] }
 0x635   : > { %v6049_v34 = vsub.f32 %v6047_v9, %v6048_v59 }
 0x636   : > { %v3069_v7 = vadd.f32 %v3752_v60, %v3068_v31  ;;  %v3784_v19 = vpop.eup %3783 }
 0x637   : > { %v2823_v51 = vmul.f32 1.442695, %v6049_v34 }
 0x638   : > { %v3070_v32 = vadd.f32 %v3754_v45, %v3069_v7 }
 0x639   : > { %3789 = vpow2.f32 %v2823_v51 }
 0x63a   : > { %v3071_v42 = vadd.f32 %v3756_v1, %v3070_v32  ;;  %v2825_v32 = vld [vmem:[#allocation4] sm:$0x1] }
 0x63b   : > { %v3786_v31 = vpop.eup %3785 }
 0x63c   : > { %v3072_v49 = vadd.f32 %v3758_v36, %v3071_v42 }
 0x63d   : > { %v3788_v60 = vpop.eup %3787 }
 0x63e   : > { %v3073_v44 = vadd.f32 %v3760_v47, %v3072_v49  ;;  %v3101_v47 = vld [vmem:[#allocation3] sm:$0x1] (!%p3283_p13) }
 0x640   : > { %v3074_v25 = vadd.f32 %v3762_v26, %v3073_v44  ;;  %v6050_v26 = vld [vmem:[#allocation11_spill] sm:$0xff] (!%p3283_p13) }
 0x641   : > { %vm3106_vm12 = vcmp.ge.s32.totalorder (!%p3283_p13), %v6050_v26, 0 }
 0x642   : > { %v3075_v24 = vadd.f32 %v3764_v0, %v3074_v25 }
 0x643   : > { %v3790_v61 = vpop.eup %3789 }
 0x644   : > { %v3076_v29 = vadd.f32 %v3766_v55, %v3075_v24  ;;  %v2826_v18 = vmul.f32 %v3790_v61, %v2825_v32 }
 0x646   : > { %v3077_v57 = vadd.f32 %v3768_v58, %v3076_v29 }
 0x648   : > { %v3078_v10 = vadd.f32 %v3770_v6, %v3077_v57 }
 0x64a   : > { %v3079_v20 = vadd.f32 %v3772_v5, %v3078_v10 }
 0x64c   : > { %v3080_v50 = vadd.f32 %v3774_v56, %v3079_v20 }
 0x64e   : > { %v3081_v14 = vadd.f32 %v3776_v11, %v3080_v50 }
 0x650   : > { %v3082_v40 = vadd.f32 %v3778_v4, %v3081_v14 }
 0x652   : > { %v3083_v33 = vadd.f32 %v3780_v35, %v3082_v40 }
 0x654   : > { %v3084_v15 = vadd.f32 %v3782_v48, %v3083_v33 }
 0x656   : > { %v3085_v41 = vadd.f32 %v3784_v19, %v3084_v15 }
 0x658   : > { %v3086_v23 = vadd.f32 %v3786_v31, %v3085_v41 }
 0x65a   : > { %v3087_v62 = vadd.f32 %v3788_v60, %v3086_v23 }
 0x65c   : > { %v3088_v17 = vrot.slane %v3087_v62, 4 }
 0x65e   : > { %v3089_v7 = vadd.f32 %v3088_v17, %v3087_v62 }
 0x660   : > { %v3090_v45 = vrot.slane %v3089_v7, 2 }
 0x662   : > { %v3091_v16 = vadd.f32 %v3090_v45, %v3089_v7 }
 0x664   : > { %v3092_v1 = vrot.slane %v3091_v16, 1  ;;  %3100 = sbr.rel (%p3283_p13) target bundleno = 1669 (0x685), region = 109 }
 0x666   : > { %v3093_v42 = vadd.f32 %v3092_v1, %v3091_v16 }
 0x668   : > { %v3094_v36 = vadd.f32 %v3093_v42, %v2826_v18 }
 0x66a   : > { %3095 = vst [vmem:[#allocation4] sm:$0x1] %v3094_v36 }
 0x671   : > { %v3102_v53 = vld [vmem:[#allocation4] sm:$0x1] }
 0x672   : > { %3791 = vlog2.f32 %v3102_v53 }
 0x67c   : > { %v3792_v49 = vpop.eup %3791 }
 0x67d   : > { %v3104_v13 = vmul.f32 0.6931472, %v3792_v49 }
 0x67f   : > { %v3105_v44 = vadd.f32 %v3104_v13, %v3101_v47 }
 0x681   : > { %v3108_v2 = vsub.f32 %v3105_v44, %v3107_v28 }
 0x683   : > { %v3109_v54 = vsel %vm3106_vm12, %v3108_v2, 0.0 }
 0x684   : > { %3110 = vst [vmem:[%s540_s6] sm:$0x1] %v3109_v54 }
 0x685 PF: > { %s20_s19 = sadd.s32 1, %s3847_s19   ;;  %s6051_s15 = sld [smem:[#allocation7_spill]] }
 0x686   : > { %p17_p0 = scmp.ge.s32.totalorder %s20_s19, 6   ;;  %s6052_s16 = sld [smem:[#allocation8_spill]] }
 0x687   : > { %s6053_s17 = sld [smem:[#allocation9_spill]]  ;;  %s6054_s18 = sld [smem:[#allocation10_spill]] }
 0x688   : > { %s6055_s13 = smov %s3827_s14  ;;  %s6056_s14 = smov %s3959_s24 }
 0x689   :  { %19 = sbr.rel (!%p17_p0) target bundleno = 7 (0x7), region = 156 }

</bundles_post_ra>
